<compile_context>
chip_gen: v7x
topology: tpu7x:2x2x1
jax: 0.10.0
libtpu: 0.0.40
codegen_flags: <defaults>
</compile_context>

<pallas_src>
import functools

import numpy as np
import jax
import jax.numpy as jnp
from jax.experimental import pallas as pl
from jax.experimental.pallas import tpu as pltpu

D_IN = 3
D_OUT = 1
HIDDEN = 64
SKIP_OUT = HIDDEN - D_IN           # layer before the skip layer outputs dims[l+1] - dims[0]
INV_SQRT2 = 1.0 / np.sqrt(2.0)


def _softplus100(x):
    # Branch-free, numerically stable Softplus(beta=100):
    #   softplus(x) = max(x, 0) + log1p(exp(-|beta*x|)) / beta
    # Equals PyTorch's thresholded form to < 2e-11 absolute (exp(-20) tail).
    # Python-float constants keep the input dtype (bf16 stays bf16 on v6e/v7x).
    z = x * 100.0
    return jnp.maximum(x, 0.0) + jnp.log1p(jnp.exp(-jnp.abs(z))) * 0.01


def _softplus100_ref(x):
    # PyTorch-faithful nn.Softplus(beta=100, threshold=20) for the pure-JAX reference.
    beta = 100.0
    z = beta * x
    return jnp.where(z > 20.0, x, jnp.log1p(jnp.exp(jnp.minimum(z, 20.0))) / beta)


def implicit_mlp_kernel(x_ref,
                        wstack_ref, b0_ref,
                        w1_ref, b1_ref,
                        w2a_ref, b2_ref,
                        w3_ref, b3_ref,
                        w4_ref, b4_ref,
                        out_ref,
                        *, elementwise_dtype):
    """Feature-major MLP: x_ref (3, TN); weights (out, in); out_ref (1, TN).

    wstack_ref is [w0 ; w2b*inv_sqrt2] stacked to (128, 3) so x hits the MXU once.
    """
    cdt = wstack_ref.dtype               # matmul operand dtype (bf16 or f32)
    edt = elementwise_dtype              # softplus / activation dtype (bf16 on v6e/v7x)
    x = x_ref[...].astype(cdt)           # (3, TN)

    def mm(w_ref, a):
        # MXU dot with f32 accumulation.
        return jnp.dot(w_ref[...], a, preferred_element_type=jnp.float32)

    # Fused K=3 dot: one MXU pass over the tile for both x-consumers.
    xw = mm(wstack_ref, x)                                     # (128, TN) f32
    skip = xw[HIDDEN:, :].astype(edt)                          # resident skip term (64, TN)

    # l = 0
    h = _softplus100((xw[:HIDDEN, :] + b0_ref[...]).astype(edt))               # (64, TN) edt

    # l = 1  (output padded 61 -> 64; padded rows give softplus(0) but are annihilated
    #         by the matching zero columns of w2a)
    h = _softplus100((mm(w1_ref, h.astype(cdt)) + b1_ref[...]).astype(edt))    # (64, TN)

    # l = 2 (skip layer): lin(cat([h, input], 1) / sqrt(2))
    #       == (w2a/sqrt2) @ h + (w2b/sqrt2) @ x + b2   (scale folded into the weights)
    h = _softplus100((mm(w2a_ref, h.astype(cdt)) + b2_ref[...]).astype(edt) + skip)

    # l = 3
    h = _softplus100((mm(w3_ref, h.astype(cdt)) + b3_ref[...]).astype(edt))    # (64, TN)

    # l = 4 (last layer, no activation) -- lane-dense (1, TN) store
    out_ref[...] = (mm(w4_ref, h.astype(cdt)) + b4_ref[...]).astype(out_ref.dtype)


def init_params(key, bias=1.0):
    """Deterministic init mirroring ImplicitNetwork.__init__ (geometric_init, multires=0).

    Stored in (in_features, out_features) orientation (PyTorch weight transposed)."""
    ks = jax.random.split(key, 5)
    p = {}
    # l=0: N(0, sqrt(2)/sqrt(out_dim)), bias 0.
    p["w0"] = (jax.random.normal(ks[0], (D_IN, HIDDEN), jnp.float32)
               * np.sqrt(2.0) / np.sqrt(HIDDEN))
    p["b0"] = jnp.zeros((1, HIDDEN), jnp.float32)
    # l=1: out_dim = hidden - d_in (skip at l=2)
    p["w1"] = (jax.random.normal(ks[1], (HIDDEN, SKIP_OUT), jnp.float32)
               * np.sqrt(2.0) / np.sqrt(SKIP_OUT))
    p["b1"] = jnp.zeros((1, SKIP_OUT), jnp.float32)
    # l=2 (skip layer): input dim = hidden (= SKIP_OUT + D_IN after concat)
    w2 = (jax.random.normal(ks[2], (HIDDEN, HIDDEN), jnp.float32)
          * np.sqrt(2.0) / np.sqrt(HIDDEN))
    p["w2a"] = w2[:SKIP_OUT, :]      # multiplies the running activation
    p["w2b"] = w2[SKIP_OUT:, :]      # multiplies the original input (concat part)
    p["b2"] = jnp.zeros((1, HIDDEN), jnp.float32)
    # l=3
    p["w3"] = (jax.random.normal(ks[3], (HIDDEN, HIDDEN), jnp.float32)
               * np.sqrt(2.0) / np.sqrt(HIDDEN))
    p["b3"] = jnp.zeros((1, HIDDEN), jnp.float32)
    # l=4 (geometric init of the last layer)
    p["w4"] = (jax.random.normal(ks[4], (HIDDEN, D_OUT), jnp.float32) * 1e-4
               + np.sqrt(np.pi) / np.sqrt(HIDDEN))
    p["b4"] = jnp.full((1, D_OUT), -bias, jnp.float32)
    return p


def _pack_params(params, compute_dtype):
    """Transpose to feature-major (out, in), fuse [w0 ; w2b/sqrt2] into one (128, 3) stack,
    fold 1/sqrt(2) into the skip weights, zero-pad the 61-wide skip dims to 64,
    cast matmul weights to the compute dtype (biases stay f32)."""
    pad = HIDDEN - SKIP_OUT
    cdt = compute_dtype
    w0 = params["w0"].T                                                    # (64, 3)
    w2b_s = params["w2b"].T * INV_SQRT2                                    # (64, 3) scaled
    wstack = jnp.concatenate([w0, w2b_s], axis=0).astype(cdt)              # (128, 3)
    b0 = params["b0"].T.astype(jnp.float32)                                # (64, 1)
    w1 = jnp.pad(params["w1"].T, ((0, pad), (0, 0))).astype(cdt)           # (64, 64) zero rows
    b1 = jnp.pad(params["b1"].T, ((0, pad), (0, 0))).astype(jnp.float32)   # (64, 1)
    w2a = (jnp.pad(params["w2a"].T, ((0, 0), (0, pad)))
           * INV_SQRT2).astype(cdt)                                        # (64, 64) zero cols
    b2 = params["b2"].T.astype(jnp.float32)                                # (64, 1)
    w3 = params["w3"].T.astype(cdt)                                        # (64, 64)
    b3 = params["b3"].T.astype(jnp.float32)                                # (64, 1)
    w4 = params["w4"].T.astype(cdt)                                        # (1, 64)
    b4 = params["b4"].T.astype(jnp.float32)                                # (1, 1)
    return [wstack, b0, w1, b1, w2a, b2, w3, b3, w4, b4]


def _tpu_generation():
    try:
        kind = jax.devices()[0].device_kind.lower()
    except Exception:  # pragma: no cover
        return None
    for g in ("v7", "v6", "v5", "v4"):
        if g in kind:
            return g
    return None


def _default_config():
    """Generation-aware defaults: elementwise dtype, tile size, grid steps, VMEM limit."""
    gen = _tpu_generation()
    if gen == "v7":
        # 64 MiB VMEM / TC, 2 TCs share the parallel grid axis -> smaller footprint,
        # >= 8 (even) grid steps so both cores pipeline their x/out blocks.
        return dict(preferred_tile_n=4096, min_steps=8,
                    vmem_limit_bytes=48 << 20, elementwise_dtype=jnp.bfloat16)
    if gen == "v6":
        # bf16 VPU/EUP + 128 MiB VMEM: bf16 activations, big tiles.
        return dict(preferred_tile_n=8192, min_steps=2,
                    vmem_limit_bytes=96 << 20, elementwise_dtype=jnp.bfloat16)
    if gen == "v5":
        # No bf16 VPU/EUP: keep softplus in f32; big tiles need the vmem limit raised
        # above the 16 MiB scoped default.
        return dict(preferred_tile_n=8192, min_steps=2,
                    vmem_limit_bytes=96 << 20, elementwise_dtype=jnp.float32)
    # Unknown / older chip: conservative.
    return dict(preferred_tile_n=2048, min_steps=2,
                vmem_limit_bytes=None, elementwise_dtype=jnp.float32)


def _choose_tile_n(n, preferred, min_steps=2):
    """Largest multiple-of-128 divisor of n <= preferred, preferring >= min_steps grid
    steps (and an even step count so v7x's two TensorCores both stay busy)."""
    cands = [t for t in range(128, min(n, preferred) + 1, 128) if n % t == 0]
    assert cands, "N must be a multiple of 128"

    def pick(cs):
        even = [t for t in cs if (n // t) % 2 == 0]
        return max(even) if even else max(cs)

    good = [t for t in cands if n // t >= min_steps]
    if good:
        return pick(good)
    multi = [t for t in cands if n // t >= 2]
    if multi:
        return pick(multi)
    return max(cands)


def implicit_network_forward(x, params, *, tile_n=None, preferred_tile_n=None,
                             compute_dtype=jnp.bfloat16, elementwise_dtype=None,
                             vmem_limit_bytes=None, min_steps=None,
                             input_feature_major=False, output_feature_major=False):
    cfg = _default_config()
    if preferred_tile_n is None:
        preferred_tile_n = cfg["preferred_tile_n"]
    if elementwise_dtype is None:
        elementwise_dtype = cfg["elementwise_dtype"]
    if vmem_limit_bytes is None:
        vmem_limit_bytes = cfg["vmem_limit_bytes"]
    if min_steps is None:
        min_steps = cfg["min_steps"]

    if input_feature_major:
        d_in, N = x.shape
        x_fm = x
    else:
        N, d_in = x.shape
        # TODO(synk): callers that can supply x as (3, N) and consume (1, N) should use the
        # feature-major flags to drop these two XLA transpose passes (pure HBM overhead).
        x_fm = x.T
    assert d_in == D_IN
    assert N % 128 == 0, "pad the point count to a multiple of 128"
    if tile_n is None:
        tile_n = _choose_tile_n(N, preferred_tile_n, min_steps)
    assert tile_n % 128 == 0 and N % tile_n == 0
    grid = (N // tile_n,)

    ordered = _pack_params(params, compute_dtype)

    kernel = functools.partial(implicit_mlp_kernel, elementwise_dtype=elementwise_dtype)

    def full_spec(arr):
        nd = arr.ndim
        return pl.BlockSpec(arr.shape, lambda i, _nd=nd: (0,) * _nd)

    # Per-point flops: fused (128x3) dot + three 64x64 dots + the 1x64 head.
    flops_per_pt = 2 * (2 * D_IN * HIDDEN + 3 * HIDDEN * HIDDEN + HIDDEN * D_OUT)
    param_bytes = sum(int(np.prod(a.shape)) * a.dtype.itemsize for a in ordered)
    cost = pl.CostEstimate(
        flops=int(N * flops_per_pt),
        transcendentals=int(N * HIDDEN * 4 * 2),       # exp + log1p per softplus element
        bytes_accessed=int(N * (D_IN + D_OUT) * 4 + param_bytes),
    )

    out_fm = pl.pallas_call(
        kernel,
        out_shape=jax.ShapeDtypeStruct((D_OUT, N), jnp.float32),
        grid_spec=pltpu.PrefetchScalarGridSpec(
            num_scalar_prefetch=0,
            grid=grid,
            in_specs=[pl.BlockSpec((D_IN, tile_n), lambda i: (0, i))]
                     + [full_spec(a) for a in ordered],
            out_specs=pl.BlockSpec((D_OUT, tile_n), lambda i: (0, i)),
        ),
        compiler_params=pltpu.CompilerParams(
            dimension_semantics=("parallel",),
            vmem_limit_bytes=vmem_limit_bytes,
        ),
        cost_estimate=cost,
    )(x_fm, *ordered)

    return out_fm if output_feature_major else out_fm.T          # (N, d_out) by default


def reference_forward(x, p):
    """Pure-JAX f32 reference following the PyTorch forward loop (for validation)."""
    inp = x
    h = _softplus100_ref(inp @ p["w0"] + p["b0"])
    h = _softplus100_ref(h @ p["w1"] + p["b1"])
    cat = jnp.concatenate([h, inp], axis=1) / np.sqrt(2.0)
    w2 = jnp.concatenate([p["w2a"], p["w2b"]], axis=0)
    h = _softplus100_ref(cat @ w2 + p["b2"])
    h = _softplus100_ref(h @ p["w3"] + p["b3"])
    return h @ p["w4"] + p["b4"]


if __name__ == "__main__":
    key = jax.random.PRNGKey(0)
    k_x, k_p = jax.random.split(key)
    N = 1024                                   # small test; tile auto-picks a >=2-step grid
    x = jax.random.normal(k_x, (N, D_IN), jnp.float32)
    params = init_params(k_p, bias=1.0)

    ref = reference_forward(x, params)

    # One-time sanity check of the 61->64 padding trick: zero cols of w2a must annihilate
    # the softplus(0) rows produced by the zero rows of w1.
    packed = _pack_params(params, jnp.float32)
    np.testing.assert_array_equal(np.asarray(packed[2])[SKIP_OUT:, :], 0.0)   # w1 pad rows
    np.testing.assert_array_equal(np.asarray(packed[4])[:, SKIP_OUT:], 0.0)   # w2a pad cols

    # Exact f32 path (matmuls + elementwise): tight check vs the PyTorch-equivalent reference.
    out_f32 = jax.block_until_ready(
        implicit_network_forward(x, params,
                                 compute_dtype=jnp.float32,
                                 elementwise_dtype=jnp.float32))
    np.testing.assert_allclose(np.asarray(out_f32), np.asarray(ref), rtol=1e-4, atol=1e-4)

    # Default fast path: bf16 MXU matmuls with f32 accumulation; elementwise dtype picked
    # per TPU generation (bf16 on v6e/v7x, f32 on v5-class chips).
    out_fast = jax.block_until_ready(implicit_network_forward(x, params))
    np.testing.assert_allclose(np.asarray(out_fast), np.asarray(ref), rtol=1e-1, atol=1e-1)

    assert out_f32.shape == (N, D_OUT) and out_fast.shape == (N, D_OUT)
    print("KERNEL_OK")
</pallas_src>

<mosaic_0001>
module attributes {stable_mosaic.version = 11 : i64} {
  func.func @implicit_mlp_kernel(%arg0: i32, %arg1: memref<3x512xf32, #tpu.memory_space<vmem>>, %arg2: memref<128x3xf32, #tpu.memory_space<vmem>>, %arg3: memref<64x1xf32, #tpu.memory_space<vmem>>, %arg4: memref<64x64xf32, #tpu.memory_space<vmem>>, %arg5: memref<64x1xf32, #tpu.memory_space<vmem>>, %arg6: memref<64x64xf32, #tpu.memory_space<vmem>>, %arg7: memref<64x1xf32, #tpu.memory_space<vmem>>, %arg8: memref<64x64xf32, #tpu.memory_space<vmem>>, %arg9: memref<64x1xf32, #tpu.memory_space<vmem>>, %arg10: memref<1x64xf32, #tpu.memory_space<vmem>>, %arg11: memref<1x1xf32, #tpu.memory_space<vmem>>, %arg12: memref<1x512xf32, #tpu.memory_space<vmem>>) attributes {dimension_semantics = [#tpu.dimension_semantics<parallel>], iteration_bounds = array<i64: 2>, scalar_prefetch = 0 : i64, scratch_operands = 0 : i64, tpu.core_type = #tpu.core_type<tc>, window_params = [{transform_indices = @transform_0, window_bounds = array<i64: 3, 512>}, {pipeline_mode = #tpu.pipeline_mode<synchronous>, transform_indices = @transform_1, window_bounds = array<i64: 128, 3>}, {pipeline_mode = #tpu.pipeline_mode<synchronous>, transform_indices = @transform_2, window_bounds = array<i64: 64, 1>}, {pipeline_mode = #tpu.pipeline_mode<synchronous>, transform_indices = @transform_3, window_bounds = array<i64: 64, 64>}, {pipeline_mode = #tpu.pipeline_mode<synchronous>, transform_indices = @transform_4, window_bounds = array<i64: 64, 1>}, {pipeline_mode = #tpu.pipeline_mode<synchronous>, transform_indices = @transform_5, window_bounds = array<i64: 64, 64>}, {pipeline_mode = #tpu.pipeline_mode<synchronous>, transform_indices = @transform_6, window_bounds = array<i64: 64, 1>}, {pipeline_mode = #tpu.pipeline_mode<synchronous>, transform_indices = @transform_7, window_bounds = array<i64: 64, 64>}, {pipeline_mode = #tpu.pipeline_mode<synchronous>, transform_indices = @transform_8, window_bounds = array<i64: 64, 1>}, {pipeline_mode = #tpu.pipeline_mode<synchronous>, transform_indices = @transform_9, window_bounds = array<i64: 1, 64>}, {pipeline_mode = #tpu.pipeline_mode<synchronous>, transform_indices = @transform_10, window_bounds = array<i64: 1, 1>}, {transform_indices = @transform_11, window_bounds = array<i64: 1, 512>}]} {
    %c0 = arith.constant 0 : index
    %c0_0 = arith.constant 0 : index
    %0 = vector.load %arg1[%c0, %c0_0] : memref<3x512xf32, #tpu.memory_space<vmem>>, vector<3x512xf32>
    %c0_1 = arith.constant 0 : index
    %c0_2 = arith.constant 0 : index
    %1 = vector.load %arg2[%c0_1, %c0_2] : memref<128x3xf32, #tpu.memory_space<vmem>>, vector<128x3xf32>
    %cst = arith.constant dense<0.000000e+00> : vector<128x512xf32>
    %2 = tpu.matmul %1, %0, %cst {dimension_numbers = #tpu.dot_dimension_numbers<[1], [0], [0], [1], [0, 0, 1, 1], [], []>} : vector<128x3xf32>, vector<3x512xf32>, vector<128x512xf32> -> vector<128x512xf32>
    %3 = vector.extract_strided_slice %2 {offsets = [64, 0], sizes = [64, 512], strides = [1, 1]} : vector<128x512xf32> to vector<64x512xf32>
    %4 = vector.extract_strided_slice %2 {offsets = [0, 0], sizes = [64, 512], strides = [1, 1]} : vector<128x512xf32> to vector<64x512xf32>
    %c0_3 = arith.constant 0 : index
    %c0_4 = arith.constant 0 : index
    %5 = vector.load %arg3[%c0_3, %c0_4] : memref<64x1xf32, #tpu.memory_space<vmem>>, vector<64x1xf32>
    %6 = vector.broadcast %5 : vector<64x1xf32> to vector<64x512xf32>
    %7 = arith.addf %4, %6 : vector<64x512xf32>
    %cst_5 = arith.constant 1.000000e+02 : f32
    %8 = vector.broadcast %cst_5 : f32 to vector<64x512xf32>
    %9 = arith.mulf %7, %8 : vector<64x512xf32>
    %cst_6 = arith.constant 0.000000e+00 : f32
    %10 = vector.broadcast %cst_6 : f32 to vector<64x512xf32>
    %11 = arith.maximumf %7, %10 : vector<64x512xf32>
    %12 = math.absf %9 : vector<64x512xf32>
    %cst_7 = arith.constant 0.000000e+00 : f32
    %13 = vector.broadcast %cst_7 : f32 to vector<64x512xf32>
    %14 = arith.subf %13, %12 : vector<64x512xf32>
    %15 = math.exp %14 : vector<64x512xf32>
    %16 = math.log1p %15 : vector<64x512xf32>
    %cst_8 = arith.constant 0.00999999977 : f32
    %17 = vector.broadcast %cst_8 : f32 to vector<64x512xf32>
    %18 = arith.mulf %16, %17 : vector<64x512xf32>
    %19 = arith.addf %11, %18 : vector<64x512xf32>
    %c0_9 = arith.constant 0 : index
    %c0_10 = arith.constant 0 : index
    %20 = vector.load %arg4[%c0_9, %c0_10] : memref<64x64xf32, #tpu.memory_space<vmem>>, vector<64x64xf32>
    %cst_11 = arith.constant dense<0.000000e+00> : vector<64x512xf32>
    %21 = tpu.matmul %20, %19, %cst_11 {dimension_numbers = #tpu.dot_dimension_numbers<[1], [0], [0], [1], [0, 0, 1, 1], [], []>} : vector<64x64xf32>, vector<64x512xf32>, vector<64x512xf32> -> vector<64x512xf32>
    %c0_12 = arith.constant 0 : index
    %c0_13 = arith.constant 0 : index
    %22 = vector.load %arg5[%c0_12, %c0_13] : memref<64x1xf32, #tpu.memory_space<vmem>>, vector<64x1xf32>
    %23 = vector.broadcast %22 : vector<64x1xf32> to vector<64x512xf32>
    %24 = arith.addf %21, %23 : vector<64x512xf32>
    %cst_14 = arith.constant 1.000000e+02 : f32
    %25 = vector.broadcast %cst_14 : f32 to vector<64x512xf32>
    %26 = arith.mulf %24, %25 : vector<64x512xf32>
    %cst_15 = arith.constant 0.000000e+00 : f32
    %27 = vector.broadcast %cst_15 : f32 to vector<64x512xf32>
    %28 = arith.maximumf %24, %27 : vector<64x512xf32>
    %29 = math.absf %26 : vector<64x512xf32>
    %cst_16 = arith.constant 0.000000e+00 : f32
    %30 = vector.broadcast %cst_16 : f32 to vector<64x512xf32>
    %31 = arith.subf %30, %29 : vector<64x512xf32>
    %32 = math.exp %31 : vector<64x512xf32>
    %33 = math.log1p %32 : vector<64x512xf32>
    %cst_17 = arith.constant 0.00999999977 : f32
    %34 = vector.broadcast %cst_17 : f32 to vector<64x512xf32>
    %35 = arith.mulf %33, %34 : vector<64x512xf32>
    %36 = arith.addf %28, %35 : vector<64x512xf32>
    %c0_18 = arith.constant 0 : index
    %c0_19 = arith.constant 0 : index
    %37 = vector.load %arg6[%c0_18, %c0_19] : memref<64x64xf32, #tpu.memory_space<vmem>>, vector<64x64xf32>
    %cst_20 = arith.constant dense<0.000000e+00> : vector<64x512xf32>
    %38 = tpu.matmul %37, %36, %cst_20 {dimension_numbers = #tpu.dot_dimension_numbers<[1], [0], [0], [1], [0, 0, 1, 1], [], []>} : vector<64x64xf32>, vector<64x512xf32>, vector<64x512xf32> -> vector<64x512xf32>
    %c0_21 = arith.constant 0 : index
    %c0_22 = arith.constant 0 : index
    %39 = vector.load %arg7[%c0_21, %c0_22] : memref<64x1xf32, #tpu.memory_space<vmem>>, vector<64x1xf32>
    %40 = vector.broadcast %39 : vector<64x1xf32> to vector<64x512xf32>
    %41 = arith.addf %38, %40 : vector<64x512xf32>
    %42 = arith.addf %41, %3 : vector<64x512xf32>
    %cst_23 = arith.constant 1.000000e+02 : f32
    %43 = vector.broadcast %cst_23 : f32 to vector<64x512xf32>
    %44 = arith.mulf %42, %43 : vector<64x512xf32>
    %cst_24 = arith.constant 0.000000e+00 : f32
    %45 = vector.broadcast %cst_24 : f32 to vector<64x512xf32>
    %46 = arith.maximumf %42, %45 : vector<64x512xf32>
    %47 = math.absf %44 : vector<64x512xf32>
    %cst_25 = arith.constant 0.000000e+00 : f32
    %48 = vector.broadcast %cst_25 : f32 to vector<64x512xf32>
    %49 = arith.subf %48, %47 : vector<64x512xf32>
    %50 = math.exp %49 : vector<64x512xf32>
    %51 = math.log1p %50 : vector<64x512xf32>
    %cst_26 = arith.constant 0.00999999977 : f32
    %52 = vector.broadcast %cst_26 : f32 to vector<64x512xf32>
    %53 = arith.mulf %51, %52 : vector<64x512xf32>
    %54 = arith.addf %46, %53 : vector<64x512xf32>
    %c0_27 = arith.constant 0 : index
    %c0_28 = arith.constant 0 : index
    %55 = vector.load %arg8[%c0_27, %c0_28] : memref<64x64xf32, #tpu.memory_space<vmem>>, vector<64x64xf32>
    %cst_29 = arith.constant dense<0.000000e+00> : vector<64x512xf32>
    %56 = tpu.matmul %55, %54, %cst_29 {dimension_numbers = #tpu.dot_dimension_numbers<[1], [0], [0], [1], [0, 0, 1, 1], [], []>} : vector<64x64xf32>, vector<64x512xf32>, vector<64x512xf32> -> vector<64x512xf32>
    %c0_30 = arith.constant 0 : index
    %c0_31 = arith.constant 0 : index
    %57 = vector.load %arg9[%c0_30, %c0_31] : memref<64x1xf32, #tpu.memory_space<vmem>>, vector<64x1xf32>
    %58 = vector.broadcast %57 : vector<64x1xf32> to vector<64x512xf32>
    %59 = arith.addf %56, %58 : vector<64x512xf32>
    %cst_32 = arith.constant 1.000000e+02 : f32
    %60 = vector.broadcast %cst_32 : f32 to vector<64x512xf32>
    %61 = arith.mulf %59, %60 : vector<64x512xf32>
    %cst_33 = arith.constant 0.000000e+00 : f32
    %62 = vector.broadcast %cst_33 : f32 to vector<64x512xf32>
    %63 = arith.maximumf %59, %62 : vector<64x512xf32>
    %64 = math.absf %61 : vector<64x512xf32>
    %cst_34 = arith.constant 0.000000e+00 : f32
    %65 = vector.broadcast %cst_34 : f32 to vector<64x512xf32>
    %66 = arith.subf %65, %64 : vector<64x512xf32>
    %67 = math.exp %66 : vector<64x512xf32>
    %68 = math.log1p %67 : vector<64x512xf32>
    %cst_35 = arith.constant 0.00999999977 : f32
    %69 = vector.broadcast %cst_35 : f32 to vector<64x512xf32>
    %70 = arith.mulf %68, %69 : vector<64x512xf32>
    %71 = arith.addf %63, %70 : vector<64x512xf32>
    %c0_36 = arith.constant 0 : index
    %c0_37 = arith.constant 0 : index
    %72 = vector.load %arg10[%c0_36, %c0_37] : memref<1x64xf32, #tpu.memory_space<vmem>>, vector<1x64xf32>
    %cst_38 = arith.constant dense<0.000000e+00> : vector<1x512xf32>
    %73 = tpu.matmul %72, %71, %cst_38 {dimension_numbers = #tpu.dot_dimension_numbers<[1], [0], [0], [1], [0, 0, 1, 1], [], []>} : vector<1x64xf32>, vector<64x512xf32>, vector<1x512xf32> -> vector<1x512xf32>
    %c0_39 = arith.constant 0 : index
    %c0_40 = arith.constant 0 : index
    %74 = vector.load %arg11[%c0_39, %c0_40] : memref<1x1xf32, #tpu.memory_space<vmem>>, vector<1x1xf32>
    %75 = vector.broadcast %74 : vector<1x1xf32> to vector<1x512xf32>
    %76 = arith.addf %73, %75 : vector<1x512xf32>
    %c0_41 = arith.constant 0 : index
    %c0_42 = arith.constant 0 : index
    %77 = vector.load %arg12[%c0_41, %c0_42] : memref<1x512xf32, #tpu.memory_space<vmem>>, vector<1x512xf32>
    tpu.vector_store %arg12[%c0_41, %c0_42], %76 {strides = array<i32>} : memref<1x512xf32, #tpu.memory_space<vmem>>, vector<1x512xf32>,
    return
  }
  func.func @transform_0(%arg0: i32) -> (i32, i32) {
    %c0_i32 = arith.constant 0 : i32
    %c0_i32_0 = arith.constant 0 : i32
    return %c0_i32, %arg0 : i32, i32
  }
  func.func @transform_1(%arg0: i32) -> (i32, i32) {
    %c0_i32 = arith.constant 0 : i32
    %c0_i32_0 = arith.constant 0 : i32
    %c0_i32_1 = arith.constant 0 : i32
    return %c0_i32, %c0_i32_0 : i32, i32
  }
  func.func @transform_2(%arg0: i32) -> (i32, i32) {
    %c0_i32 = arith.constant 0 : i32
    %c0_i32_0 = arith.constant 0 : i32
    %c0_i32_1 = arith.constant 0 : i32
    return %c0_i32, %c0_i32_0 : i32, i32
  }
  func.func @transform_3(%arg0: i32) -> (i32, i32) {
    %c0_i32 = arith.constant 0 : i32
    %c0_i32_0 = arith.constant 0 : i32
    %c0_i32_1 = arith.constant 0 : i32
    return %c0_i32, %c0_i32_0 : i32, i32
  }
  func.func @transform_4(%arg0: i32) -> (i32, i32) {
    %c0_i32 = arith.constant 0 : i32
    %c0_i32_0 = arith.constant 0 : i32
    %c0_i32_1 = arith.constant 0 : i32
    return %c0_i32, %c0_i32_0 : i32, i32
  }
  func.func @transform_5(%arg0: i32) -> (i32, i32) {
    %c0_i32 = arith.constant 0 : i32
    %c0_i32_0 = arith.constant 0 : i32
    %c0_i32_1 = arith.constant 0 : i32
    return %c0_i32, %c0_i32_0 : i32, i32
  }
  func.func @transform_6(%arg0: i32) -> (i32, i32) {
    %c0_i32 = arith.constant 0 : i32
    %c0_i32_0 = arith.constant 0 : i32
    %c0_i32_1 = arith.constant 0 : i32
    return %c0_i32, %c0_i32_0 : i32, i32
  }
  func.func @transform_7(%arg0: i32) -> (i32, i32) {
    %c0_i32 = arith.constant 0 : i32
    %c0_i32_0 = arith.constant 0 : i32
    %c0_i32_1 = arith.constant 0 : i32
    return %c0_i32, %c0_i32_0 : i32, i32
  }
  func.func @transform_8(%arg0: i32) -> (i32, i32) {
    %c0_i32 = arith.constant 0 : i32
    %c0_i32_0 = arith.constant 0 : i32
    %c0_i32_1 = arith.constant 0 : i32
    return %c0_i32, %c0_i32_0 : i32, i32
  }
  func.func @transform_9(%arg0: i32) -> (i32, i32) {
    %c0_i32 = arith.constant 0 : i32
    %c0_i32_0 = arith.constant 0 : i32
    %c0_i32_1 = arith.constant 0 : i32
    return %c0_i32, %c0_i32_0 : i32, i32
  }
  func.func @transform_10(%arg0: i32) -> (i32, i32) {
    %c0_i32 = arith.constant 0 : i32
    %c0_i32_0 = arith.constant 0 : i32
    %c0_i32_1 = arith.constant 0 : i32
    return %c0_i32, %c0_i32_0 : i32, i32
  }
  func.func @transform_11(%arg0: i32) -> (i32, i32) {
    %c0_i32 = arith.constant 0 : i32
    %c0_i32_0 = arith.constant 0 : i32
    return %c0_i32, %arg0 : i32, i32
  }
}

</mosaic_0001>

<bundles_post_ra>
// kernel: tpu_custom_call.1
= control target key start
LH: loop header
LB: loop body
LE: loop exit
PB: predicated region body
PF: predicated region fallthrough
CT: control target
= control target key end

     0   :  { %s8373_s0 = inlined_call_operand.vmem [shape: f32[3,1024], index: 0, kind: input, shape index: {}]   ;;  %s8374_s1 = inlined_call_operand.vmem [shape: f32[128,3], index: 1, kind: input, shape index: {}]   ;;  %s8375_s2 = inlined_call_operand.vmem [shape: f32[64,1], index: 2, kind: input, shape index: {}]   ;;  %s8376_s3 = inlined_call_operand.vmem [shape: f32[64,64], index: 3, kind: input, shape index: {}]   ;;  %s8377_s4 = inlined_call_operand.vmem [shape: f32[64,1], index: 4, kind: input, shape index: {}]   ;;  %s8378_s5 = inlined_call_operand.vmem [shape: f32[64,64], index: 5, kind: input, shape index: {}]   ;;  %s8379_s6 = inlined_call_operand.vmem [shape: f32[64,1], index: 6, kind: input, shape index: {}]   ;;  %s8380_s7 = inlined_call_operand.vmem [shape: f32[64,64], index: 7, kind: input, shape index: {}]   ;;  %s8381_s8 = inlined_call_operand.vmem [shape: f32[64,1], index: 8, kind: input, shape index: {}]   ;;  %s8382_s9 = inlined_call_operand.vmem [shape: f32[1,64], index: 9, kind: input, shape index: {}]   ;;  %s8383_s10 = inlined_call_operand.<no memory space> [shape: f32[1,1], index: 10, kind: input, shape index: {}]   ;;  %s8384_s11 = inlined_call_operand.hbm [shape: f32[1,1024], index: 11, kind: output, shape index: {}]  }
   0x1   :  { %v16_v0 = vstv %s8383_s10 }
   0x2   :  { %17 = vst [vmem:[#allocation2] sm:$0x1] %v16_v0 }
   0x3   :  { %18 = vsyncpa [#allocation4], 0 }
   0x4   :  { %20 = vsyncpa [#allocation4 + $0x1], 0  ;;  %s5243_s19 = smov 0   ;;  %s5245_s20 = smov 0  }
   0x5   :  { %s5247_s21 = smov 0   ;;  %s5249_s22 = smov 0  }
   0x6 LB: > { %s5264_s10 = sadd.s32 4294967295, %s5174_s22   ;;  %s4263_s23 = sadd.s32 4294967294, %s5174_s22   ;;  %s5174_s22 = sphi %s5249_s22, %s8712_s22   ;;  %s5170_s21 = sphi %s5247_s21, %s8711_s21   ;;  %s5166_s20 = sphi %s5245_s20, %s8710_s20   ;;  %s5162_s19 = sphi %s5243_s19, %s8709_s19  }
   0x7   : > { %s5268_s24 = sadd.s32 1, %s5174_s22   ;;  %s269_s25 = sadd.s32 1, %s5170_s21 }
   0x8   : > { %s266_s26 = ssub.s32 %s5174_s22, %s5268_s24  ;;  %p279_p0 = scmp.ne.s32.totalorder %s5170_s21, %s5166_s20 }
   0x9   : > { %p267_p1 = scmp.eq.s32.totalorder %s266_s26, 0  ;;  %p280_p2 = scmp.eq.s32.totalorder %s5264_s10, 1 }
   0xa   : > { %p285_p3 = scmp.ne.s32.totalorder %s5166_s20, %s5162_s19  ;;  %p286_p4 = scmp.eq.s32.totalorder %s4263_s23, 1 }
   0xb   : > { %s5279_s27 = scalar_select %p267_p1, %s5170_s21, %s269_s25  }
   0xc   : > { %p5281_p5 = por %p280_p2, %p279_p0  ;;  %p5285_p6 = por %p286_p4, %p285_p3 }
   0xd   : > { %8400 = sst [smem:[#allocation6_spill]] %s5279_s27  ;;  %p4266_p7 = scmp.ge.s32.totalorder %s5174_s22, 1 }
   0xe   : > { %p343_p8 = scmp.lt.s32.totalorder %s5174_s22, 3 }
  0x10   : > { %p344_p9 = pnand %p4266_p7, %p343_p8 }
  0x12   : > { %347 = sbr.rel (%p344_p9) target bundleno = 1798 (0x706), region = 64 }
  0x19   : > { %s4268_s30 = sshll.u32 %s5264_s10, 2  ;;  %v8386_v1 = vmov 0.0   ;;  %v5177_v2 = vmov 0   ;;  %v792_v3 = vld [vmem:[%s8375_s2] sm:$0xff]  ;;  %v793_v4 = vld [vmem:[%s8375_s2 + $0x8] sm:$0xff]  ;;  %v794_v5 = vld [vmem:[%s8375_s2 + $0x10] sm:$0xff] }
  0x1a   : > { %p384_p10 = scmp.lt.s32.totalorder %s4268_s30, 7  ;;  %534 = vmatprep.mubr.f32.mxu0 %v8386_v1  ;;  %695 = vmatprep.mubr.f32.mxu1 %v8386_v1  ;;  %v795_v6 = vld [vmem:[%s8375_s2 + $0x18] sm:$0xff]  ;;  %vm461_vm0 = vcmask 1042432   ;;  %v392_v11 = vld [vmem:[%s8374_s1] sm:$0xff]  ;;  %vm412_vm1 = vcmask 23552   ;;  %v797_v13 = vld [vmem:[%s8375_s2 + $0x28] sm:$0xff] }
  0x1b   : > { %4596 = vset.pattern.permute.xlu0 %v5177_v2  ;;  %4597 = vset.pattern.permute.xlu1 %v5177_v2  ;;  %v796_v12 = vld [vmem:[%s8375_s2 + $0x20] sm:$0xff]  ;;  %v393_v14 = vld [vmem:[%s8374_s1 + $0x8] sm:$0xff]  ;;  %v798_v15 = vld [vmem:[%s8375_s2 + $0x30] sm:$0xff]  ;;  %s380_s17 = sand.u32 1, %s5166_s20   ;;  %s4361_s23 = sshll.u32 %s5264_s10, 6 }
  0x1c   : > { %s8714_s30 = smov (!%p384_p10, %s4268_s30), 7  ;;  %802 = vperm.xlu0 %4596, %v792_v3   ;;  %812 = vperm.xlu1 %4597, %v794_v5   ;;  %v799_v16 = vld [vmem:[%s8375_s2 + $0x38] sm:$0xff]  ;;  %v394_v17 = vld [vmem:[%s8374_s1 + $0x10] sm:$0xff]  ;;  %v1424_v18 = vld [vmem:[%s8377_s4] sm:$0xff]  ;;  %s8331_s14 = scalar_lea.hbm %s8384_s11, %s4361_s23 }
  0x1d   : > { %s4269_s18 = sshll.u32 %s8714_s30, 2  ;;  %v1425_v19 = vld [vmem:[%s8377_s4 + $0x8] sm:$0xff]  ;;  %v395_v20 = vld [vmem:[%s8374_s1 + $0x18] sm:$0xff]  ;;  %v1426_v21 = vld [vmem:[%s8377_s4 + $0x10] sm:$0xff]  ;;  %s4190_s30 = scalar_lea.sflag [#allocation4], %s380_s17 }
  0x1e   : > { %s387_s26 = scalar_lea.vmem %s8373_s0, %s4269_s18  ;;  %v1427_v22 = vld [vmem:[%s8377_s4 + $0x18] sm:$0xff]  ;;  %v396_v23 = vld [vmem:[%s8374_s1 + $0x20] sm:$0xff]  ;;  %v1429_v25 = vld [vmem:[%s8377_s4 + $0x28] sm:$0xff]  ;;  %s4267_s18 = sshll.u32 %s380_s17, 2 }
  0x1f   : > { %v390_v7 = vld [vmem:[%s387_s26] sm:$0x77]  ;;  %v391_v8 = vld [vmem:[%s387_s26 + $0x8] sm:$0x77]  ;;  %v1430_v27 = vld [vmem:[%s8377_s4 + $0x30] sm:$0xff]  ;;  %s382_s25 = scalar_lea.vmem [#allocation3], %s4267_s18 }
  0x20   : > { %807 = vperm.xlu0 %4596, %v793_v4   ;;  %v410_v9 = vcombine.high %v390_v7, %v390_v7  ;;  %v411_v10 = vcombine.high %v391_v8, %v391_v8  ;;  %817 = vperm.xlu1 %4597, %v795_v6   ;;  %v1428_v24 = vld [vmem:[%s8377_s4 + $0x20] sm:$0xff]  ;;  %v397_v26 = vld [vmem:[%s8374_s1 + $0x28] sm:$0xff]  ;;  %v1431_v28 = vld [vmem:[%s8377_s4 + $0x38] sm:$0xff]  ;;  %s4204_s26 = sshll.u32 %s382_s25, 4  ;;  %s5179_s10 = smov [#allocation3]   ;;  %s8333_s26 = int_to_ptr.vmem [resolvable:$true] %s4204_s26 }
  0x21   : > { %v398_v29 = vld [vmem:[%s8374_s1 + $0x30] sm:$0xff]  ;;  %v2275_v30 = vld [vmem:[%s8379_s6] sm:$0xff]  ;;  %v2276_v31 = vld [vmem:[%s8379_s6 + $0x8] sm:$0xff]  ;;  %s5112_s15 = scalar_lea.vmem %s8333_s26, 64  ;;  %s5116_s27 = sshll.u32 %s5179_s10, 4  ;;  %s5117_s27 = int_to_ptr.vmem [resolvable:$false] %s5116_s27 }
  0x22   : > { %4270 = vmatprep.subr.msk.mxu0 %vm461_vm0, %v410_v9  ;;  %4288 = vmatprep.subr.msk.mxu1 %vm461_vm0, %v411_v10  ;;  %v399_v32 = vld [vmem:[%s8374_s1 + $0x38] sm:$0xff]  ;;  %v2277_v33 = vld [vmem:[%s8379_s6 + $0x10] sm:$0xff]  ;;  %v2279_v35 = vld [vmem:[%s8379_s6 + $0x20] sm:$0xff]  ;;  %p5113_p11 = scmp.ne.s32.totalorder %s8333_s26, %s5112_s15  ;;  %s5118_s16 = scalar_lea.vmem %s5117_s27, 128 }
  0x23   : > { %4271 = vmatpush1.msk.msra.mxu0 %vm461_vm0, %v390_v7  ;;  %4289 = vmatpush1.msk.msra.mxu1 %vm461_vm0, %v391_v8  ;;  %v2278_v34 = vld [vmem:[%s8379_s6 + $0x18] sm:$0xff]  ;;  %v2280_v36 = vld [vmem:[%s8379_s6 + $0x28] sm:$0xff]  ;;  %v2281_v37 = vld [vmem:[%s8379_s6 + $0x30] sm:$0xff]  ;;  %p5119_p0 = scmp.lt.s32.totalorder %s8333_s26, %s5117_s27  ;;  %p5120_p1 = scmp.lt.s32.totalorder %s5118_s16, %s5112_s15 }
  0x24   : > { %4272 = vmatmul.mubr.msk.f32.vlgmr.msra.gmra.mrb[0].mxu0 %vm412_vm1, %v392_v11  ;;  %4290 = vmatmul.mubr.msk.f32.vlgmr.msra.gmra.mrb[0].mxu1 %vm412_vm1, %v392_v11  ;;  %v2282_v38 = vld [vmem:[%s8379_s6 + $0x38] sm:$0xff]  ;;  %v3157_v39 = vld [vmem:[%s8381_s8] sm:$0xff]  ;;  %v3158_v40 = vld [vmem:[%s8381_s8 + $0x8] sm:$0xff]  ;;  %p5114_p12 = pnand %p5113_p11, %p5281_p5 }
  0x25   : > { %540 = vmatprep.mubr.f32.mxu0 %v8386_v1  ;;  %701 = vmatprep.mubr.f32.mxu1 %v8386_v1  ;;  %v3159_v41 = vld [vmem:[%s8381_s8 + $0x10] sm:$0xff]  ;;  %v3160_v42 = vld [vmem:[%s8381_s8 + $0x18] sm:$0xff]  ;;  %v3161_v43 = vld [vmem:[%s8381_s8 + $0x20] sm:$0xff]  ;;  %p5121_p2 = por %p5120_p1, %p5119_p0 }
  0x26   : > { %822 = vperm.xlu0 %4596, %v796_v12   ;;  %827 = vperm.xlu1 %4597, %v797_v13   ;;  %v3162_v44 = vld [vmem:[%s8381_s8 + $0x28] sm:$0xff]  ;;  %v3163_v45 = vld [vmem:[%s8381_s8 + $0x30] sm:$0xff]  ;;  %v3164_v46 = vld [vmem:[%s8381_s8 + $0x38] sm:$0xff]  ;;  %p5115_p13 = pneg %p5114_p12 }
  0x27   : > { %v4000_v47 = vld [vmem:[#allocation2] sm:$0x1] }
  0x28   : > { %4273 = vmatmul.mubr.msk.f32.gmra.mrb[2].mxu0 %vm412_vm1, %v393_v14  ;;  %4291 = vmatmul.mubr.msk.f32.gmra.mrb[2].mxu1 %vm412_vm1, %v393_v14  ;;  %p5122_p3 = pnand %p5121_p2, %p5115_p13 }
  0x29   : > { %546 = vmatprep.mubr.f32.mxu0 %v8386_v1  ;;  %707 = vmatprep.mubr.f32.mxu1 %v8386_v1 }
  0x2a   : > { %832 = vperm.xlu0 %4596, %v798_v15   ;;  %837 = vperm.xlu1 %4597, %v799_v16  }
  0x2c   : > { %4274 = vmatmul.mubr.msk.f32.gmra.mrb[4].mxu0 %vm412_vm1, %v394_v17  ;;  %4292 = vmatmul.mubr.msk.f32.gmra.mrb[4].mxu1 %vm412_vm1, %v394_v17 }
  0x2d   : > { %552 = vmatprep.mubr.f32.mxu0 %v8386_v1  ;;  %713 = vmatprep.mubr.f32.mxu1 %v8386_v1 }
  0x2e   : > { %1434 = vperm.xlu0 %4596, %v1424_v18   ;;  %1439 = vperm.xlu1 %4597, %v1425_v19  }
  0x30   : > { %4275 = vmatmul.mubr.msk.f32.gmra.mrb[6].mxu0 %vm412_vm1, %v395_v20  ;;  %4293 = vmatmul.mubr.msk.f32.gmra.mrb[6].mxu1 %vm412_vm1, %v395_v20 }
  0x31   : > { %558 = vmatprep.mubr.f32.mxu0 %v8386_v1  ;;  %719 = vmatprep.mubr.f32.mxu1 %v8386_v1 }
  0x32   : > { %1444 = vperm.xlu0 %4596, %v1426_v21   ;;  %1449 = vperm.xlu1 %4597, %v1427_v22  }
  0x34   : > { %4276 = vmatmul.mubr.msk.f32.gmra.mrb[8].mxu0 %vm412_vm1, %v396_v23  ;;  %4294 = vmatmul.mubr.msk.f32.gmra.mrb[8].mxu1 %vm412_vm1, %v396_v23 }
  0x35   : > { %564 = vmatprep.mubr.f32.mxu0 %v8386_v1  ;;  %725 = vmatprep.mubr.f32.mxu1 %v8386_v1 }
  0x36   : > { %1454 = vperm.xlu0 %4596, %v1428_v24   ;;  %1459 = vperm.xlu1 %4597, %v1429_v25  }
  0x38   : > { %4277 = vmatmul.mubr.msk.f32.gmra.mrb[10].mxu0 %vm412_vm1, %v397_v26  ;;  %4295 = vmatmul.mubr.msk.f32.gmra.mrb[10].mxu1 %vm412_vm1, %v397_v26 }
  0x39   : > { %570 = vmatprep.mubr.f32.mxu0 %v8386_v1  ;;  %731 = vmatprep.mubr.f32.mxu1 %v8386_v1 }
  0x3a   : > { %1464 = vperm.xlu0 %4596, %v1430_v27   ;;  %1469 = vperm.xlu1 %4597, %v1431_v28  }
  0x3c   : > { %4278 = vmatmul.mubr.msk.f32.gmra.mrb[12].mxu0 %vm412_vm1, %v398_v29  ;;  %4296 = vmatmul.mubr.msk.f32.gmra.mrb[12].mxu1 %vm412_vm1, %v398_v29 }
  0x3d   : > { %576 = vmatprep.mubr.f32.mxu0 %v8386_v1  ;;  %737 = vmatprep.mubr.f32.mxu1 %v8386_v1 }
  0x3e   : > { %2285 = vperm.xlu0 %4596, %v2275_v30   ;;  %2290 = vperm.xlu1 %4597, %v2276_v31  }
  0x40   : > { %4279 = vmatmul.mubr.msk.f32.gmra.mrb[14].mxu0 %vm412_vm1, %v399_v32  ;;  %4297 = vmatmul.mubr.msk.f32.gmra.mrb[14].mxu1 %vm412_vm1, %v399_v32 }
  0x41   : > { %582 = vmatprep.mubr.f32.mxu0 %v8386_v1  ;;  %743 = vmatprep.mubr.f32.mxu1 %v8386_v1 }
  0x42   : > { %2295 = vperm.xlu0 %4596, %v2277_v33   ;;  %2300 = vperm.xlu1 %4597, %v2278_v34  }
  0x46   : > { %2305 = vperm.xlu0 %4596, %v2279_v35   ;;  %2310 = vperm.xlu1 %4597, %v2280_v36  }
  0x4a   : > { %2315 = vperm.xlu0 %4596, %v2281_v37   ;;  %2320 = vperm.xlu1 %4597, %v2282_v38  }
  0x4e   : > { %3167 = vperm.xlu0 %4596, %v3157_v39   ;;  %3172 = vperm.xlu1 %4597, %v3158_v40  }
  0x52   : > { %3177 = vperm.xlu0 %4596, %v3159_v41   ;;  %3182 = vperm.xlu1 %4597, %v3160_v42  }
  0x56   : > { %3187 = vperm.xlu0 %4596, %v3161_v43   ;;  %3192 = vperm.xlu1 %4597, %v3162_v44   ;;  %v400_v43 = vld [vmem:[%s8374_s1 + $0x40] sm:$0xff] }
  0x57   : > { %4280 = vmatmul.mubr.msk.f32.gmra.mrb[16].mxu0 %vm412_vm1, %v400_v43  ;;  %4298 = vmatmul.mubr.msk.f32.gmra.mrb[16].mxu1 %vm412_vm1, %v400_v43 }
  0x58   : > { %588 = vmatprep.mubr.f32.mxu0 %v8386_v1  ;;  %749 = vmatprep.mubr.f32.mxu1 %v8386_v1 }
  0x5a   : > { %3197 = vperm.xlu0 %4596, %v3163_v45   ;;  %3202 = vperm.xlu1 %4597, %v3164_v46  }
  0x5e   : > { %4003 = vperm.xlu0 %4596, %v4000_v47  }
  0x9b   : > { %v803_v48 = vpop.permute.xlu0 %802  ;;  %v5471_v20 = vpop.permute.xlu1 %812 }
  0x9f   : > { %v808_v57 = vpop.permute.xlu0 %807 }
  0xf7   : > { %v536_v49 = vpop.f32.mrb[0].mxu0  ;;  %v697_v50 = vpop.f32.mrb[0].mxu1 }
  0xf8   : > { %v5449_v51 = vadd.f32 %v803_v48, %v536_v49  ;;  %v5451_v52 = vadd.f32 %v803_v48, %v697_v50  ;;  %v538_v53 = vpop.f32.mrb[1].mxu0  ;;  %v699_v54 = vpop.f32.mrb[1].mxu1  ;;  %v401_v50 = vld [vmem:[%s8374_s1 + $0x48] sm:$0xff] }
  0xf9   : > { %v5453_v55 = vadd.f32 %v803_v48, %v538_v53  ;;  %v5455_v56 = vadd.f32 %v803_v48, %v699_v54  ;;  %4281 = vmatmul.mubr.msk.f32.gmra.mrb[18].mxu0 %vm412_vm1, %v401_v50  ;;  %4299 = vmatmul.mubr.msk.f32.gmra.mrb[18].mxu1 %vm412_vm1, %v401_v50 }
  0xfa   : > { %v872_v58 = vmul.f32 100.0, %v5449_v51  ;;  %v874_v59 = vmul.f32 100.0, %v5451_v52  ;;  %594 = vmatprep.mubr.f32.mxu0 %v8386_v1  ;;  %755 = vmatprep.mubr.f32.mxu1 %v8386_v1 }
  0xfb   : > { %v873_v60 = vmul.f32 100.0, %v5453_v55  ;;  %v875_v61 = vmul.f32 100.0, %v5455_v56  ;;  %v542_v62 = vpop.f32.mrb[2].mxu0  ;;  %v703_v63 = vpop.f32.mrb[2].mxu1 }
  0xfc   : > { %v936_v0 = vand.u32 2147483647, %v872_v58  ;;  %v938_v2 = vand.u32 2147483647, %v874_v59  ;;  %v5461_v3 = vadd.f32 %v808_v57, %v542_v62  ;;  %v5463_v4 = vadd.f32 %v808_v57, %v703_v63  ;;  %v544_v5 = vpop.f32.mrb[3].mxu0  ;;  %v705_v6 = vpop.f32.mrb[3].mxu1 }
  0xfd   : > { %v937_v7 = vand.u32 2147483647, %v873_v60  ;;  %v5466_v11 = vadd.f32 %v808_v57, %v544_v5  ;;  %v939_v12 = vand.u32 2147483647, %v875_v61  ;;  %v5469_v14 = vadd.f32 %v808_v57, %v705_v6 }
  0xfe   : > { %v968_v8 = vsub.f32 0.0, %v936_v0  ;;  %v970_v9 = vsub.f32 0.0, %v938_v2  ;;  %v876_v10 = vmul.f32 100.0, %v5461_v3  ;;  %v878_v13 = vmul.f32 100.0, %v5463_v4 }
  0xff   : > { %v548_v15 = vpop.f32.mrb[4].mxu0  ;;  %v709_v16 = vpop.f32.mrb[4].mxu1  ;;  %v969_v21 = vsub.f32 0.0, %v937_v7  ;;  %v877_v24 = vmul.f32 100.0, %v5466_v11  ;;  %v971_v28 = vsub.f32 0.0, %v939_v12  ;;  %v879_v30 = vmul.f32 100.0, %v5469_v14 }
 0x100   : > { %v1000_v17 = vmul.f32 1.442695, %v968_v8  ;;  %v1004_v18 = vmul.f32 1.442695, %v970_v9  ;;  %v940_v19 = vand.u32 2147483647, %v876_v10  ;;  %v5475_v25 = vadd.f32 %v5471_v20, %v548_v15 }
 0x101   : > { %v942_v22 = vand.u32 2147483647, %v878_v13  ;;  %v550_v26 = vpop.f32.mrb[5].mxu0  ;;  %v5477_v27 = vpop.f32.mrb[5].mxu1  ;;  %v941_v34 = vand.u32 2147483647, %v877_v24  ;;  %v5487_v38 = vadd.f32 %v5471_v20, %v709_v16 }
 0x102   : > { %4600 = vpow2.f32 %v1000_v17  ;;  %v972_v23 = vsub.f32 0.0, %v940_v19  ;;  %v1002_v36 = vmul.f32 1.442695, %v969_v21  ;;  %v943_v41 = vand.u32 2147483647, %v879_v30  ;;  %v402_v9 = vld [vmem:[%s8374_s1 + $0x50] sm:$0xff] }
 0x103   : > { %4602 = vpow2.f32 %v1004_v18  ;;  %v974_v29 = vsub.f32 0.0, %v942_v22  ;;  %v5480_v31 = vpop.f32.mrb[6].mxu0  ;;  %v5482_v32 = vpop.f32.mrb[6].mxu1  ;;  %v973_v40 = vsub.f32 0.0, %v941_v34  ;;  %v880_v42 = vmul.f32 100.0, %v5475_v25  ;;  %4282 = vmatmul.mubr.msk.f32.gmra.mrb[20].mxu0 %vm412_vm1, %v402_v9  ;;  %4300 = vmatmul.mubr.msk.f32.gmra.mrb[20].mxu1 %vm412_vm1, %v402_v9 }
 0x104   : > { %v1008_v33 = vmul.f32 1.442695, %v972_v23  ;;  %v5484_v35 = vpop.f32.mrb[7].mxu0  ;;  %v5489_v39 = vpop.f32.mrb[7].mxu1  ;;  %v1006_v44 = vmul.f32 1.442695, %v971_v28  ;;  %v5527_v2 = vadd.f32 %v5471_v20, %v550_v26  ;;  %600 = vmatprep.mubr.f32.mxu0 %v8386_v1  ;;  %761 = vmatprep.mubr.f32.mxu1 %v8386_v1  ;;  %v5556_v24 = vadd.f32 %v5471_v20, %v5477_v27 }
 0x105   : > { %v1012_v37 = vmul.f32 1.442695, %v974_v29  ;;  %v882_v48 = vmul.f32 100.0, %v5487_v38  ;;  %v1010_v53 = vmul.f32 1.442695, %v973_v40  ;;  %v975_v54 = vsub.f32 0.0, %v943_v41  ;;  %v5563_v29 = vpop.permute.xlu1 %817 }
 0x106   : > { %4604 = vpow2.f32 %v1008_v33  ;;  %v944_v57 = vand.u32 2147483647, %v880_v42  ;;  %8403 = vst [vmem:[#allocation7_spill] sm:$0xff] %v5556_v24  ;;  %v403_v26 = vld [vmem:[%s8374_s1 + $0x58] sm:$0xff]  ;;  %v5567_v34 = vmul.f32 100.0, %v5527_v2  ;;  %v5586_v50 = vadd.f32 %v5563_v29, %v5480_v31  ;;  %v404_v31 = vld [vmem:[%s8374_s1 + $0x60] sm:$0xff] }
 0x107   : > { %v5495_v45 = vpop.f32.mrb[8].mxu0  ;;  %v5497_v46 = vpop.f32.mrb[8].mxu1  ;;  %4606 = vpow2.f32 %v1012_v37  ;;  %v946_v0 = vand.u32 2147483647, %v882_v48  ;;  %v1014_v7 = vmul.f32 1.442695, %v975_v54  ;;  %4283 = vmatmul.mubr.msk.f32.gmra.mrb[22].mxu0 %vm412_vm1, %v403_v26  ;;  %4301 = vmatmul.mubr.msk.f32.gmra.mrb[22].mxu1 %vm412_vm1, %v403_v26 }
 0x108   : > { %v5501_v47 = vpop.f32.mrb[9].mxu0  ;;  %v5506_v49 = vpop.f32.mrb[9].mxu1  ;;  %4608 = vpow2.f32 %v1002_v36  ;;  %v976_v8 = vsub.f32 0.0, %v944_v57  ;;  %606 = vmatprep.mubr.f32.mxu0 %v8386_v1  ;;  %767 = vmatprep.mubr.f32.mxu1 %v8386_v1  ;;  %v945_v9 = vand.u32 2147483647, %v5567_v34 }
 0x109   : > { %4610 = vpow2.f32 %v1006_v44  ;;  %v978_v23 = vsub.f32 0.0, %v946_v0  ;;  %v5596_v0 = vmul.f32 100.0, %v5556_v24 }
 0x10a   : > { %4612 = vpow2.f32 %v1010_v53  ;;  %v1016_v33 = vmul.f32 1.442695, %v976_v8  ;;  %v977_v24 = vsub.f32 0.0, %v945_v9  ;;  %v407_v9 = vld [vmem:[%s8374_s1 + $0x78] sm:$0xff] }
 0x10b   : > { %v5511_v58 = vpop.f32.mrb[10].mxu0  ;;  %v5513_v59 = vpop.f32.mrb[10].mxu1  ;;  %4284 = vmatmul.mubr.msk.f32.gmra.mrb[24].mxu0 %vm412_vm1, %v404_v31  ;;  %4302 = vmatmul.mubr.msk.f32.gmra.mrb[24].mxu1 %vm412_vm1, %v404_v31 }
 0x10c   : > { %v5517_v60 = vpop.eup %4600  ;;  %v5519_v61 = vpop.f32.mrb[11].mxu0  ;;  %612 = vmatprep.mubr.f32.mxu0 %v8386_v1  ;;  %773 = vmatprep.mubr.f32.mxu1 %v8386_v1 }
 0x10d   : > { %v5523_v62 = vpop.eup %4602  ;;  %v1064_v63 = vadd.f32 1.0, %v5517_v60  ;;  %v5529_v5 = vpop.f32.mrb[11].mxu1  ;;  %v1067_v43 = vmul.f32 -0.5, %v5517_v60 }
 0x10e   : > { %v1082_v6 = vadd.f32 1.0, %v5523_v62  ;;  %v1085_v8 = vmul.f32 -0.5, %v5523_v62  ;;  %v1088_v26 = vand.u32 2147483647, %v5523_v62 }
 0x10f   : > { %4614 = vlog2.f32 %v1064_v63  ;;  %v5535_v10 = vpop.f32.mrb[12].mxu0  ;;  %v5537_v12 = vpop.f32.mrb[12].mxu1  ;;  %v1020_v63 = vmul.f32 1.442695, %v978_v23  ;;  %v1068_v44 = vadd.f32 1.0, %v1067_v43  ;;  %v5623_v43 = vmul.f32 100.0, %v5586_v50 }
 0x110   : > { %v5541_v13 = vpop.eup %4604  ;;  %4616 = vlog2.f32 %v1082_v6  ;;  %v5546_v18 = vpop.f32.mrb[13].mxu0  ;;  %v1086_v34 = vadd.f32 1.0, %v1085_v8  ;;  %vm5632_vm3 = vcmp.lt.f32.partialorder %v1088_v26, 0.0004427343  ;;  %v406_v26 = vld [vmem:[%s8374_s1 + $0x70] sm:$0xff] }
 0x111   : > { %v5548_v19 = vpop.f32.mrb[13].mxu1  ;;  %v5561_v28 = vpop.eup %4606  ;;  %4618 = vpow2.f32 %v1014_v7  ;;  %v1100_v36 = vadd.f32 1.0, %v5541_v13  ;;  %v1070_v7 = vand.u32 2147483647, %v5517_v60  ;;  %v1069_v8 = vmul.f32 %v5517_v60, %v1068_v44 }
 0x112   : > { %v5579_v42 = vpop.eup %4608  ;;  %v1118_v57 = vadd.f32 1.0, %v5561_v28  ;;  %v1121_v16 = vmul.f32 -0.5, %v5561_v28 }
 0x113   : > { %v5573_v40 = vpop.f32.mrb[14].mxu0  ;;  %v5575_v41 = vpop.f32.mrb[14].mxu1  ;;  %4620 = vlog2.f32 %v1100_v36  ;;  %v1073_v23 = vadd.f32 1.0, %v5579_v42  ;;  %v1076_v36 = vmul.f32 -0.5, %v5579_v42  ;;  %vm5628_vm2 = vcmp.lt.f32.partialorder %v1070_v7, 0.0004427343 }
 0x114   : > { %v5588_v53 = vpop.f32.mrb[15].mxu0  ;;  %v5592_v54 = vpop.eup %4610  ;;  %4622 = vpow2.f32 %v1016_v33  ;;  %v1103_v33 = vmul.f32 -0.5, %v5541_v13 }
 0x115   : > { %8404 = vst [vmem:[#allocation8_spill] sm:$0xff] %v5588_v53  ;;  %v5598_v6 = vpop.f32.mrb[15].mxu1  ;;  %4624 = vlog2.f32 %v1118_v57  ;;  %v5611_v48 = vpop.eup %4612  ;;  %v1094_v37 = vmul.f32 -0.5, %v5592_v54  ;;  %v405_v57 = vld [vmem:[%s8374_s1 + $0x68] sm:$0xff]  ;;  %v1091_v30 = vadd.f32 1.0, %v5592_v54  ;;  %v1077_v31 = vadd.f32 1.0, %v1076_v36 }
 0x116   : > { %8405 = vst [vmem:[#allocation9_spill] sm:$0xff] %v5598_v6  ;;  %4626 = vpow2.f32 %v1020_v63  ;;  %4285 = vmatmul.mubr.msk.f32.gmra.mrb[26].mxu0 %vm412_vm1, %v405_v57  ;;  %4303 = vmatmul.mubr.msk.f32.gmra.mrb[26].mxu1 %vm412_vm1, %v405_v57  ;;  %v1104_v7 = vadd.f32 1.0, %v1103_v33  ;;  %v1106_v36 = vand.u32 2147483647, %v5541_v13  ;;  %v1109_v57 = vadd.f32 1.0, %v5611_v48 }
 0x117   : > { %4628 = vlog2.f32 %v1073_v23  ;;  %v1095_v15 = vadd.f32 1.0, %v1094_v37  ;;  %618 = vmatprep.mubr.f32.mxu0 %v8386_v1  ;;  %779 = vmatprep.mubr.f32.mxu1 %v8386_v1  ;;  %v1079_v23 = vand.u32 2147483647, %v5579_v42  ;;  %v1122_v37 = vadd.f32 1.0, %v1121_v16 }
 0x118   : > { %4630 = vlog2.f32 %v1091_v30  ;;  %v5653_v33 = vmul.f32 %v5579_v42, %v1077_v31  ;;  %v1097_v1 = vand.u32 2147483647, %v5592_v54  ;;  %v1124_v6 = vand.u32 2147483647, %v5561_v28 }
 0x119   : > { %v4615_v27 = vpop.eup %4614  ;;  %v5665_v16 = vmul.f32 %v5592_v54, %v1095_v15  ;;  %v1105_v30 = vmul.f32 %v5541_v13, %v1104_v7  ;;  %v8410_v42 = vmov 0.0   ;;  %vm1107_vm4 = vcmp.lt.f32.partialorder %v1106_v36, 0.0004427343 }
 0x11a   : > { %v4617_v21 = vpop.eup %4616  ;;  %v1066_v17 = vmul.f32 0.6931472, %v4615_v27  ;;  %4286 = vmatmul.mubr.msk.f32.gmra.mrb[28].mxu0 %vm412_vm1, %v406_v26  ;;  %4304 = vmatmul.mubr.msk.f32.gmra.mrb[28].mxu1 %vm412_vm1, %v406_v26  ;;  %4632 = vlog2.f32 %v1109_v57  ;;  %v1123_v54 = vmul.f32 %v5561_v28, %v1122_v37  ;;  %vm5677_vm5 = vcmp.lt.f32.partialorder %v1079_v23, 0.0004427343 }
 0x11b   : > { %v5638_v27 = vpop.eup %4618  ;;  %v1084_v20 = vmul.f32 0.6931472, %v4617_v21  ;;  %v1087_v21 = vmul.f32 %v5523_v62, %v1086_v34  ;;  %624 = vmatprep.mubr.f32.mxu0 %v8410_v42  ;;  %785 = vmatprep.mubr.f32.mxu1 %v8410_v42  ;;  %vm1125_vm6 = vcmp.lt.f32.partialorder %v1124_v6, 0.0004427343  ;;  %v1115_v57 = vand.u32 2147483647, %v5611_v48 }
 0x11c   : > { %v1072_v60 = vsel %vm5628_vm2, %v1069_v8, %v1066_v17  ;;  %v1127_v53 = vadd.f32 1.0, %v5638_v27  ;;  %v1018_v8 = vmul.f32 1.442695, %v977_v24  ;;  %v8413_v23 = vmax.f32 %v5449_v51, 0.0 }
 0x11d   : > { %v4621_v44 = vpop.eup %4620  ;;  %v1090_v62 = vsel %vm5632_vm3, %v1087_v21, %v1084_v20  ;;  %v1352_v31 = vmul.f32 0.01, %v1072_v60  ;;  %v1112_v20 = vmul.f32 -0.5, %v5611_v48  ;;  %vm5697_vm7 = vcmp.lt.f32.partialorder %v1097_v1, 0.0004427343 }
 0x11e   : > { %v5660_v22 = vpop.eup %4622  ;;  %v1102_v17 = vmul.f32 0.6931472, %v4621_v44  ;;  %v1354_v7 = vmul.f32 0.01, %v1090_v62  ;;  %4634 = vlog2.f32 %v1127_v53  ;;  %4287 = vmatmul.mubr.msk.f32.gmra.mrb[30].mxu0 %vm412_vm1, %v407_v9  ;;  %4305 = vmatmul.mubr.msk.f32.gmra.mrb[30].mxu1 %vm412_vm1, %v407_v9  ;;  %v8414_v53 = vmax.f32 %v5461_v3, 0.0 }
 0x11f   : > { %v4625_v34 = vpop.eup %4624  ;;  %v1136_v28 = vadd.f32 1.0, %v5660_v22  ;;  %4636 = vpow2.f32 %v1018_v8  ;;  %1561 = vmatprep.mubr.f32.mxu0 %v8410_v42  ;;  %1674 = vmatprep.mubr.f32.mxu1 %v8410_v42  ;;  %v5689_v60 = vadd.f32 %v1352_v31, %v8413_v23  ;;  %v8415_v44 = vand.u32 2147483647, %v5596_v0 }
 0x120   : > { %v1108_v63 = vsel %vm1107_vm4, %v1105_v30, %v1102_v17  ;;  %v1120_v15 = vmul.f32 0.6931472, %v4625_v34  ;;  %v5675_v13 = vpop.eup %4626  ;;  %v1113_v30 = vadd.f32 1.0, %v1112_v20  ;;  %v1130_v9 = vmul.f32 -0.5, %v5638_v27 }
 0x121   : > { %v1356_v21 = vmul.f32 0.01, %v1108_v63  ;;  %v4629_v24 = vpop.eup %4628  ;;  %v979_v62 = vsub.f32 0.0, %v8415_v44  ;;  %v1154_v34 = vadd.f32 1.0, %v5675_v13  ;;  %v948_v51 = vand.u32 2147483647, %v5623_v43 }
 0x122   : > { %v1126_v36 = vsel %vm1125_vm6, %v1123_v54, %v1120_v15  ;;  %v8418_v31 = vmax.f32 %v5451_v52, 0.0  ;;  %v8419_v0 = vmax.f32 %v5463_v4, 0.0  ;;  %v1133_v15 = vand.u32 2147483647, %v5638_v27  ;;  %v4631_v20 = vpop.eup %4630 }
 0x123   : > { %v5693_v6 = vadd.f32 %v1356_v21, %v8414_v53  ;;  %v1358_v37 = vmul.f32 0.01, %v1126_v36  ;;  %v1075_v54 = vmul.f32 0.6931472, %v4629_v24  ;;  %4638 = vlog2.f32 %v1136_v28 }
 0x124   : > { %v5706_v3 = vadd.f32 %v1354_v7, %v8418_v31  ;;  %v1139_v8 = vmul.f32 -0.5, %v5660_v22  ;;  %v980_v21 = vsub.f32 0.0, %v948_v51  ;;  %vm5718_vm8 = vcmp.lt.f32.partialorder %v1115_v57, 0.0004427343  ;;  %v4633_v57 = vpop.eup %4632 }
 0x125   : > { %v5712_v1 = vadd.f32 %v1358_v37, %v8419_v0  ;;  %v1022_v7 = vmul.f32 1.442695, %v979_v62  ;;  %v5724_v4 = vadd.f32 %v5563_v29, %v5482_v32  ;;  %v5728_v36 = vadd.f32 %v5563_v29, %v5484_v35  ;;  %v823_v62 = vpop.permute.xlu0 %822 }
 0x126   : > { %v1131_v28 = vadd.f32 1.0, %v1130_v9  ;;  %4640 = vlog2.f32 %v1154_v34  ;;  %v1024_v24 = vmul.f32 1.442695, %v980_v21  ;;  %v5732_v23 = vadd.f32 %v5563_v29, %v5489_v39 }
 0x127   : > { %v1093_v53 = vmul.f32 0.6931472, %v4631_v20  ;;  %v1142_v37 = vand.u32 2147483647, %v5660_v22  ;;  %v886_v44 = vmul.f32 100.0, %v5724_v4  ;;  %v885_v32 = vmul.f32 100.0, %v5728_v36 }
 0x128   : > { %v1081_v35 = vsel %vm5677_vm5, %v5653_v33, %v1075_v54  ;;  %v1140_v9 = vadd.f32 1.0, %v1139_v8  ;;  %4642 = vpow2.f32 %v1024_v24  ;;  %v887_v34 = vmul.f32 100.0, %v5732_v23  ;;  %v4635_v51 = vpop.eup %4634 }
 0x129   : > { %4644 = vpow2.f32 %v1022_v7  ;;  %v950_v39 = vand.u32 2147483647, %v886_v44  ;;  %v949_v29 = vand.u32 2147483647, %v885_v32  ;;  %v5742_v31 = vadd.f32 %v823_v62, %v5495_v45  ;;  %v5744_v0 = vpop.eup %4636 }
 0x12a   : > { %v1111_v20 = vmul.f32 0.6931472, %v4633_v57  ;;  %v1114_v21 = vmul.f32 %v5611_v48, %v1113_v30  ;;  %vm5747_vm9 = vcmp.lt.f32.partialorder %v1133_v15, 0.0004427343  ;;  %v951_v33 = vand.u32 2147483647, %v887_v34 }
 0x12b   : > { %v1353_v26 = vmul.f32 0.01, %v1081_v35  ;;  %v1099_v54 = vsel %vm5697_vm7, %v5665_v16, %v1093_v53  ;;  %v1157_v8 = vmul.f32 -0.5, %v5675_v13  ;;  %v5756_v45 = vadd.f32 %v823_v62, %v5497_v46 }
 0x12c   : > { %v982_v7 = vsub.f32 0.0, %v950_v39  ;;  %v981_v24 = vsub.f32 0.0, %v949_v29  ;;  %v983_v57 = vsub.f32 0.0, %v951_v33  ;;  %v888_v48 = vmul.f32 100.0, %v5742_v31 }
 0x12d   : > { %v1132_v30 = vmul.f32 %v5638_v27, %v1131_v28  ;;  %v1141_v15 = vmul.f32 %v5660_v22, %v1140_v9  ;;  %vm5761_vm10 = vcmp.lt.f32.partialorder %v1142_v37, 0.0004427343  ;;  %v1145_v16 = vadd.f32 1.0, %v5744_v0  ;;  %v4639_v17 = vpop.eup %4638 }
 0x12e   : > { %v1117_v46 = vsel %vm5718_vm8, %v1114_v21, %v1111_v20  ;;  %v1129_v53 = vmul.f32 0.6931472, %v4635_v51  ;;  %v1028_v32 = vmul.f32 1.442695, %v982_v7  ;;  %v5769_v35 = vadd.f32 %v823_v62, %v5501_v47 }
 0x12f   : > { %v8426_v34 = vmax.f32 %v5453_v55, 0.0  ;;  %v1355_v22 = vmul.f32 0.01, %v1099_v54  ;;  %v1158_v28 = vadd.f32 1.0, %v1157_v8  ;;  %v1026_v37 = vmul.f32 1.442695, %v981_v24 }
 0x130   : > { %v4641_v9 = vpop.eup %4640  ;;  %4646 = vpow2.f32 %v1028_v32  ;;  %v1030_v39 = vmul.f32 1.442695, %v983_v57  ;;  %v952_v29 = vand.u32 2147483647, %v888_v48  ;;  %v890_v33 = vmul.f32 100.0, %v5756_v45 }
 0x131   : > { %v5773_v27 = vadd.f32 %v1353_v26, %v8426_v34  ;;  %v1357_v43 = vmul.f32 0.01, %v1117_v46  ;;  %v1138_v20 = vmul.f32 0.6931472, %v4639_v17  ;;  %v1160_v51 = vand.u32 2147483647, %v5675_v13 }
 0x132   : > { %4648 = vlog2.f32 %v1145_v16  ;;  %v5777_v47 = vpop.eup %4642  ;;  %v1135_v55 = vsel %vm5747_vm9, %v1132_v30, %v1129_v53  ;;  %v984_v21 = vsub.f32 0.0, %v952_v29  ;;  %v954_v26 = vand.u32 2147483647, %v890_v33 }
 0x133   : > { %v889_v54 = vmul.f32 100.0, %v5769_v35  ;;  %v5782_v8 = vpop.eup %4644  ;;  %v1156_v7 = vmul.f32 0.6931472, %v4641_v9  ;;  %v1159_v24 = vmul.f32 %v5675_v13, %v1158_v28  ;;  %v1172_v57 = vadd.f32 1.0, %v5777_v47 }
 0x134   : > { %4650 = vpow2.f32 %v1026_v37  ;;  %v1032_v48 = vmul.f32 1.442695, %v984_v21  ;;  %v986_v16 = vsub.f32 0.0, %v954_v26  ;;  %v5787_v17 = vadd.f32 %v823_v62, %v5506_v49 }
 0x135   : > { %4652 = vpow2.f32 %v1030_v39  ;;  %v1359_v52 = vmul.f32 0.01, %v1135_v55  ;;  %v1144_v30 = vsel %vm5761_vm10, %v1141_v15, %v1138_v20  ;;  %v953_v46 = vand.u32 2147483647, %v889_v54  ;;  %v5809_v39 = vpop.permute.xlu1 %827 }
 0x136   : > { %4654 = vlog2.f32 %v1172_v57  ;;  %v8427_v53 = vmax.f32 %v5455_v56, 0.0  ;;  %vm5795_vm11 = vcmp.lt.f32.partialorder %v1160_v51, 0.0004427343  ;;  %v1163_v34 = vadd.f32 1.0, %v5782_v8 }
 0x137   : > { %4656 = vpow2.f32 %v1032_v48  ;;  %v1162_v49 = vsel %vm5795_vm11, %v1159_v24, %v1156_v7  ;;  %v1148_v62 = vmul.f32 -0.5, %v5744_v0  ;;  %v1036_v44 = vmul.f32 1.442695, %v986_v16 }
 0x138   : > { %v5793_v32 = vadd.f32 %v1355_v22, %v8427_v53  ;;  %v985_v15 = vsub.f32 0.0, %v953_v46  ;;  %v8430_v28 = vmax.f32 %v5466_v11, 0.0  ;;  %v1360_v56 = vmul.f32 0.01, %v1144_v30 }
 0x139   : > { %v1175_v22 = vmul.f32 -0.5, %v5777_v47  ;;  %v891_v9 = vmul.f32 100.0, %v5787_v17  ;;  %v8431_v29 = vmax.f32 %v5469_v14, 0.0  ;;  %v1151_v20 = vand.u32 2147483647, %v5744_v0 }
 0x13a   : > { %v5805_v37 = vadd.f32 %v1357_v43, %v8430_v28  ;;  %v918_v51 = vmax.f32 %v5724_v4, 0.0  ;;  %v1034_v55 = vmul.f32 1.442695, %v985_v15  ;;  %v5817_v21 = vpop.eup %4646  ;;  %v1362_v11 = vmul.f32 0.01, %v1162_v49 }
 0x13b   : > { %v5813_v33 = vadd.f32 %v1359_v52, %v8431_v29  ;;  %4658 = vlog2.f32 %v1163_v34  ;;  %v5822_v26 = vadd.f32 %v5809_v39, %v5511_v58  ;;  %v1149_v7 = vadd.f32 1.0, %v1148_v62 }
 0x13c   : > { %v4649_v54 = vpop.eup %4648  ;;  %v1166_v14 = vmul.f32 -0.5, %v5782_v8  ;;  %v1190_v24 = vadd.f32 1.0, %v5817_v21  ;;  %4660 = vpow2.f32 %v1036_v44  ;;  %v8432_v57 = vmax.f32 %v5475_v25, 0.0 }
 0x13d   : > { %v1176_v16 = vadd.f32 1.0, %v1175_v22  ;;  %4662 = vpow2.f32 %v1034_v55  ;;  %v955_v52 = vand.u32 2147483647, %v891_v9  ;;  %vm5832_vm12 = vcmp.lt.f32.partialorder %v1151_v20, 0.0004427343 }
 0x13e   : > { %v5828_v48 = vadd.f32 %v1360_v56, %v8432_v57  ;;  %v5830_v30 = vpop.eup %4650  ;;  %v1178_v58 = vand.u32 2147483647, %v5777_v47  ;;  %4664 = vlog2.f32 %v1190_v24  ;;  %v8435_v25 = vmax.f32 %v5487_v38, 0.0 }
 0x13f   : > { %v5838_v13 = vpop.eup %4652  ;;  %v1147_v49 = vmul.f32 0.6931472, %v4649_v54  ;;  %v1169_v62 = vand.u32 2147483647, %v5782_v8  ;;  %v892_v44 = vmul.f32 100.0, %v5822_v26  ;;  %v1150_v28 = vmul.f32 %v5744_v0, %v1149_v7 }
 0x140   : > { %v5842_v34 = vadd.f32 %v1362_v11, %v8435_v25  ;;  %v4655_v15 = vpop.eup %4654  ;;  %v1167_v56 = vadd.f32 1.0, %v1166_v14  ;;  %v1193_v22 = vmul.f32 -0.5, %v5817_v21  ;;  %v920_v9 = vmax.f32 %v5742_v31, 0.0 }
 0x141   : > { %v5849_v29 = vpop.eup %4656  ;;  %v1174_v20 = vmul.f32 0.6931472, %v4655_v15  ;;  %v1177_v38 = vmul.f32 %v5777_v47, %v1176_v16  ;;  %v987_v55 = vsub.f32 0.0, %v955_v52  ;;  %v5854_v11 = vadd.f32 %v5809_v39, %v5513_v59 }
 0x142   : > { %vm1179_vm13 = vcmp.lt.f32.partialorder %v1178_v58, 0.0004427343  ;;  %v1181_v54 = vadd.f32 1.0, %v5830_v30  ;;  %v5860_v7 = vadd.f32 %v5809_v39, %v5519_v61  ;;  %v1153_v14 = vsel %vm5832_vm12, %v1150_v28, %v1147_v49 }
 0x143   : > { %vm5864_vm14 = vcmp.lt.f32.partialorder %v1169_v62, 0.0004427343  ;;  %v1180_v47 = vsel %vm1179_vm13, %v1177_v38, %v1174_v20  ;;  %v1208_v59 = vadd.f32 1.0, %v5849_v29  ;;  %v956_v57 = vand.u32 2147483647, %v892_v44 }
 0x144   : > { %v1168_v16 = vmul.f32 %v5782_v8, %v1167_v56  ;;  %v1364_v52 = vmul.f32 0.01, %v1180_v47  ;;  %v1194_v58 = vadd.f32 1.0, %v1193_v22  ;;  %v1199_v25 = vadd.f32 1.0, %v5838_v13 }
 0x145   : > { %v4659_v15 = vpop.eup %4658  ;;  %v1038_v63 = vmul.f32 1.442695, %v987_v55  ;;  %v894_v49 = vmul.f32 100.0, %v5854_v11  ;;  %v1361_v28 = vmul.f32 0.01, %v1153_v14  ;;  %v8438_v20 = vmax.f32 %v5586_v50, 0.0 }
 0x146   : > { %v5874_v62 = vpop.eup %4660  ;;  %v1196_v8 = vand.u32 2147483647, %v5817_v21  ;;  %4666 = vlog2.f32 %v1181_v54  ;;  %v988_v22 = vsub.f32 0.0, %v956_v57  ;;  %v893_v55 = vmul.f32 100.0, %v5860_v7 }
 0x147   : > { %v5878_v44 = vadd.f32 %v1364_v52, %v8438_v20  ;;  %v5881_v56 = vpop.eup %4662  ;;  %4668 = vlog2.f32 %v1208_v59  ;;  %v1165_v61 = vmul.f32 0.6931472, %v4659_v15  ;;  %v1195_v50 = vmul.f32 %v5817_v21, %v1194_v58 }
 0x148   : > { %v4665_v47 = vpop.eup %4664  ;;  %4670 = vlog2.f32 %v1199_v25  ;;  %v1226_v20 = vadd.f32 1.0, %v5874_v62  ;;  %v1040_v54 = vmul.f32 1.442695, %v988_v22  ;;  %v8439_v59 = vmax.f32 %v5527_v2, 0.0 }
 0x149   : > { %v1192_v52 = vmul.f32 0.6931472, %v4665_v47  ;;  %4672 = vpow2.f32 %v1038_v63  ;;  %vm1197_vm15 = vcmp.lt.f32.partialorder %v1196_v8, 0.0004427343  ;;  %v1184_v53 = vmul.f32 -0.5, %v5830_v30 }
 0x14a   : > { %v5891_v57 = vadd.f32 %v1361_v28, %v8439_v59  ;;  %v958_v43 = vand.u32 2147483647, %v894_v49  ;;  %v1217_v38 = vadd.f32 1.0, %v5881_v56  ;;  %4674 = vpow2.f32 %v1040_v54 }
 0x14b   : > { %v1198_v15 = vsel %vm1197_vm15, %v1195_v50, %v1192_v52  ;;  %v957_v14 = vand.u32 2147483647, %v893_v55  ;;  %v1171_v21 = vsel %vm5864_vm14, %v1168_v16, %v1165_v61  ;;  %v1202_v63 = vmul.f32 -0.5, %v5838_v13  ;;  %v5908_v61 = vpop.permute.xlu0 %832 }
 0x14c   : > { %v1366_v58 = vmul.f32 0.01, %v1198_v15  ;;  %v990_v25 = vsub.f32 0.0, %v958_v43  ;;  %v1211_v2 = vmul.f32 -0.5, %v5849_v29  ;;  %4676 = vlog2.f32 %v1226_v20 }
 0x14d   : > { %v989_v28 = vsub.f32 0.0, %v957_v14  ;;  %v5901_v8 = vadd.f32 %v5809_v39, %v5529_v5  ;;  %v1185_v22 = vadd.f32 1.0, %v1184_v53  ;;  %v1187_v24 = vand.u32 2147483647, %v5830_v30 }
 0x14e   : > { %v5905_v49 = vadd.f32 %v1366_v58, %v918_v51  ;;  %v1044_v16 = vmul.f32 1.442695, %v990_v25  ;;  %v1229_v43 = vmul.f32 -0.5, %v5874_v62  ;;  %4678 = vlog2.f32 %v1217_v38 }
 0x14f   : > { %v1220_v55 = vmul.f32 -0.5, %v5881_v56  ;;  %v1042_v47 = vmul.f32 1.442695, %v989_v28  ;;  %v895_v4 = vmul.f32 100.0, %v5901_v8  ;;  %v5917_v39 = vadd.f32 %v5908_v61, %v5535_v10 }
 0x150   : > { %v4667_v14 = vpop.eup %4666  ;;  %4680 = vpow2.f32 %v1044_v16  ;;  %v5919_v53 = vmul.f32 0.01, %v1171_v21  ;;  %v1203_v50 = vadd.f32 1.0, %v1202_v63  ;;  %v1205_v38 = vand.u32 2147483647, %v5838_v13 }
 0x151   : > { %v4669_v51 = vpop.eup %4668  ;;  %v1212_v52 = vadd.f32 1.0, %v1211_v2  ;;  %vm5922_vm0 = vcmp.lt.f32.partialorder %v1187_v24, 0.0004427343  ;;  %v1214_v59 = vand.u32 2147483647, %v5849_v29  ;;  %4682 = vpow2.f32 %v1042_v47 }
 0x152   : > { %v4671_v20 = vpop.eup %4670  ;;  %v1232_v15 = vand.u32 2147483647, %v5874_v62  ;;  %v1183_v10 = vmul.f32 0.6931472, %v4667_v14  ;;  %v1186_v21 = vmul.f32 %v5830_v30, %v1185_v22  ;;  %v1230_v25 = vadd.f32 1.0, %v1229_v43 }
 0x153   : > { %v5928_v58 = vpop.eup %4672  ;;  %v1223_v63 = vand.u32 2147483647, %v5881_v56  ;;  %v1210_v28 = vmul.f32 0.6931472, %v4669_v51  ;;  %v1221_v2 = vadd.f32 1.0, %v1220_v55  ;;  %v896_v24 = vmul.f32 100.0, %v5917_v39 }
 0x154   : > { %v959_v16 = vand.u32 2147483647, %v895_v4  ;;  %v5933_v5 = vpop.eup %4674  ;;  %v1204_v0 = vmul.f32 %v5838_v13, %v1203_v50  ;;  %vm5936_vm1 = vcmp.lt.f32.partialorder %v1205_v38, 0.0004427343  ;;  %v1213_v47 = vmul.f32 %v5849_v29, %v1212_v52 }
 0x155   : > { %v5943_v30 = vadd.f32 %v5908_v61, %v5537_v12  ;;  %v1201_v22 = vmul.f32 0.6931472, %v4671_v20  ;;  %v1235_v43 = vadd.f32 1.0, %v5928_v58  ;;  %v1244_v55 = vadd.f32 1.0, %v5933_v5 }
 0x156   : > { %v991_v14 = vsub.f32 0.0, %v959_v16  ;;  %v4677_v4 = vpop.eup %4676  ;;  %vm5947_vm2 = vcmp.lt.f32.partialorder %v1214_v59, 0.0004427343  ;;  %v1231_v13 = vmul.f32 %v5874_v62, %v1230_v25  ;;  %vm5952_vm3 = vcmp.lt.f32.partialorder %v1232_v15, 0.0004427343 }
 0x157   : > { %v960_v29 = vand.u32 2147483647, %v896_v24  ;;  %v1189_v12 = vsel %vm5922_vm0, %v1186_v21, %v1183_v10  ;;  %v1216_v38 = vsel %vm5947_vm2, %v1213_v47, %v1210_v28  ;;  %v1222_v52 = vmul.f32 %v5881_v56, %v1221_v2 }
 0x158   : > { %vm5961_vm4 = vcmp.lt.f32.partialorder %v1223_v63, 0.0004427343  ;;  %4684 = vlog2.f32 %v1244_v55  ;;  %v4679_v59 = vpop.eup %4678  ;;  %v1247_v62 = vmul.f32 -0.5, %v5933_v5  ;;  %v1046_v15 = vmul.f32 1.442695, %v991_v14 }
 0x159   : > { %v992_v25 = vsub.f32 0.0, %v960_v29  ;;  %v898_v16 = vmul.f32 100.0, %v5943_v30  ;;  %v1207_v54 = vsel %vm5936_vm1, %v1204_v0, %v1201_v22  ;;  %v1228_v10 = vmul.f32 0.6931472, %v4677_v4 }
 0x15a   : > { %v5967_v24 = vpop.eup %4680  ;;  %4686 = vlog2.f32 %v1235_v43  ;;  %v5973_v56 = vadd.f32 %v5908_v61, %v5546_v18  ;;  %v1368_v21 = vmul.f32 0.01, %v1216_v38  ;;  %v1238_v63 = vmul.f32 -0.5, %v5928_v58 }
 0x15b   : > { %v1262_v28 = vadd.f32 1.0, %v5967_v24  ;;  %4688 = vpow2.f32 %v1046_v15  ;;  %v5977_v2 = vpop.eup %4682  ;;  %v1219_v47 = vmul.f32 0.6931472, %v4679_v59  ;;  %v962_v55 = vand.u32 2147483647, %v898_v16 }
 0x15c   : > { %v897_v14 = vmul.f32 100.0, %v5973_v56  ;;  %v5982_v0 = vadd.f32 %v5908_v61, %v5548_v19  ;;  %v1248_v46 = vadd.f32 1.0, %v1247_v62  ;;  %v1253_v18 = vadd.f32 1.0, %v5977_v2 }
 0x15d   : > { %4690 = vlog2.f32 %v1262_v28  ;;  %v1048_v22 = vmul.f32 1.442695, %v992_v25  ;;  %v5985_v43 = vmul.f32 0.01, %v1189_v12  ;;  %v5987_v4 = vmul.f32 0.01, %v1207_v54  ;;  %v5999_v25 = vpop.permute.xlu1 %837 }
 0x15e   : > { %8450 = vst [vmem:[#allocation10_spill] sm:$0xff] %v5982_v0  ;;  %v1234_v51 = vsel %vm5952_vm3, %v1231_v13, %v1228_v10  ;;  %v1241_v29 = vand.u32 2147483647, %v5928_v58  ;;  %v1265_v38 = vmul.f32 -0.5, %v5967_v24  ;;  %4692 = vlog2.f32 %v1253_v18 }
 0x15f   : > { %v994_v59 = vsub.f32 0.0, %v962_v55  ;;  %v961_v19 = vand.u32 2147483647, %v897_v14  ;;  %v5995_v61 = vadd.f32 %v1368_v21, %v920_v9  ;;  %v1239_v62 = vadd.f32 1.0, %v1238_v63 }
 0x160   : > { %v1250_v12 = vand.u32 2147483647, %v5933_v5  ;;  %v899_v15 = vmul.f32 100.0, %v5982_v0  ;;  %v1370_v50 = vmul.f32 0.01, %v1234_v51  ;;  %v1225_v13 = vsel %vm5961_vm4, %v1222_v52, %v1219_v47 }
 0x161   : > { %v1249_v16 = vmul.f32 %v5933_v5, %v1248_v46  ;;  %4694 = vpow2.f32 %v1048_v22  ;;  %v1256_v10 = vmul.f32 -0.5, %v5977_v2  ;;  %v1052_v31 = vmul.f32 1.442695, %v994_v59 }
 0x162   : > { %v4685_v54 = vpop.eup %4684  ;;  %v6007_v9 = vadd.f32 %v5999_v25, %v5573_v40  ;;  %v6011_v21 = vadd.f32 %v5999_v25, %v5575_v41  ;;  %v1266_v28 = vadd.f32 1.0, %v1265_v38  ;;  %v993_v55 = vsub.f32 0.0, %v961_v19 }
 0x163   : > { %v1246_v63 = vmul.f32 0.6931472, %v4685_v54  ;;  %v963_v20 = vand.u32 2147483647, %v899_v15  ;;  %v1240_v5 = vmul.f32 %v5928_v58, %v1239_v62  ;;  %vm6014_vm5 = vcmp.lt.f32.partialorder %v1241_v29, 0.0004427343 }
 0x164   : > { %v4687_v52 = vpop.eup %4686  ;;  %vm1251_vm6 = vcmp.lt.f32.partialorder %v1250_v12, 0.0004427343  ;;  %v900_v14 = vmul.f32 100.0, %v6007_v9  ;;  %v902_v40 = vmul.f32 100.0, %v6011_v21  ;;  %v1369_v41 = vmul.f32 0.01, %v1225_v13 }
 0x165   : > { %v6020_v46 = vpop.eup %4688  ;;  %v1252_v18 = vsel %vm1251_vm6, %v1249_v16, %v1246_v63  ;;  %v1268_v22 = vand.u32 2147483647, %v5967_v24  ;;  %v1259_v51 = vand.u32 2147483647, %v5977_v2  ;;  %v1257_v59 = vadd.f32 1.0, %v1256_v10 }
 0x166   : > { %v1372_v38 = vmul.f32 0.01, %v1252_v18  ;;  %v1271_v58 = vadd.f32 1.0, %v6020_v46  ;;  %4696 = vpow2.f32 %v1052_v31  ;;  %v1267_v19 = vmul.f32 %v5967_v24, %v1266_v28  ;;  %v8456_v31 = vld [vmem:[#allocation8_spill] sm:$0xff] }
 0x167   : > { %v4691_v29 = vpop.eup %4690  ;;  %v1050_v62 = vmul.f32 1.442695, %v993_v55  ;;  %v995_v12 = vsub.f32 0.0, %v963_v20  ;;  %v964_v15 = vand.u32 2147483647, %v900_v14  ;;  %v8453_v54 = vmax.f32 %v5822_v26, 0.0 }
 0x168   : > { %v1264_v13 = vmul.f32 0.6931472, %v4691_v29  ;;  %4698 = vlog2.f32 %v1271_v58  ;;  %v966_v16 = vand.u32 2147483647, %v902_v40  ;;  %v4693_v63 = vpop.eup %4692  ;;  %v1237_v0 = vmul.f32 0.6931472, %v4687_v52 }
 0x169   : > { %v6028_v42 = vadd.f32 %v1372_v38, %v8453_v54  ;;  %vm1269_vm7 = vcmp.lt.f32.partialorder %v1268_v22, 0.0004427343  ;;  %vm6030_vm8 = vcmp.lt.f32.partialorder %v1259_v51, 0.0004427343  ;;  %v6036_v24 = vadd.f32 %v5999_v25, %v8456_v31 }
 0x16a   : > { %v1270_v26 = vsel %vm1269_vm7, %v1267_v19, %v1264_v13  ;;  %v1255_v55 = vmul.f32 0.6931472, %v4693_v63  ;;  %v1258_v20 = vmul.f32 %v5977_v2, %v1257_v59  ;;  %v8457_v52 = vmax.f32 %v5756_v45, 0.0  ;;  %v8459_v63 = vld [vmem:[#allocation9_spill] sm:$0xff] }
 0x16b   : > { %v4372_v28 = vpack.c.bf16 %v6028_v42, %v5995_v61  ;;  %v6041_v14 = vpop.eup %4694  ;;  %v1374_v18 = vmul.f32 0.01, %v1270_v26  ;;  %v1274_v22 = vmul.f32 -0.5, %v6020_v46  ;;  %v1054_v51 = vmul.f32 1.442695, %v995_v12 }
 0x16c   : > { %v6045_v40 = vadd.f32 %v1370_v50, %v8457_v52  ;;  %v1261_v38 = vsel %vm6030_vm8, %v1258_v20, %v1255_v55  ;;  %4700 = vpow2.f32 %v1050_v62  ;;  %v996_v58 = vsub.f32 0.0, %v964_v15  ;;  %v8460_v15 = vld [vmem:[#allocation7_spill] sm:$0xff] }
 0x16d   : > { %v998_v29 = vsub.f32 0.0, %v966_v16  ;;  %v1243_v19 = vsel %vm6014_vm5, %v1240_v5, %v1237_v0  ;;  %v8458_v2 = vmax.f32 %v5854_v11, 0.0  ;;  %v1277_v45 = vand.u32 2147483647, %v6020_v46 }
 0x16e   : > { %v901_v50 = vmul.f32 100.0, %v6036_v24  ;;  %v1373_v54 = vmul.f32 0.01, %v1261_v38  ;;  %v1280_v12 = vadd.f32 1.0, %v6041_v14  ;;  %v1056_v13 = vmul.f32 1.442695, %v996_v58 }
 0x16f   : > { %v6054_v59 = vadd.f32 %v1374_v18, %v8458_v2  ;;  %v6061_v62 = vadd.f32 %v5999_v25, %v8459_v63  ;;  %v1275_v0 = vadd.f32 1.0, %v1274_v22  ;;  %4702 = vpow2.f32 %v1054_v51 }
 0x170   : > { %v1060_v11 = vmul.f32 1.442695, %v998_v29  ;;  %v6065_v5 = vpop.eup %4696  ;;  %v8461_v16 = vmax.f32 %v8460_v15, 0.0  ;;  %v8462_v31 = vmax.f32 %v5728_v36, 0.0  ;;  %v8463_v55 = vmax.f32 %v5732_v23, 0.0 }
 0x171   : > { %v4388_v47 = vpack.c.bf16 %v6054_v59, %v6045_v40  ;;  %v925_v20 = vmax.f32 %v5860_v7, 0.0  ;;  %v8464_v52 = vmax.f32 %v5769_v35, 0.0  ;;  %v1371_v22 = vmul.f32 0.01, %v1243_v19 }
 0x172   : > { %v1395_v10 = vadd.f32 %v5919_v53, %v8461_v16  ;;  %v1397_v26 = vadd.f32 %v5985_v43, %v8462_v31  ;;  %v1399_v25 = vadd.f32 %v5987_v4, %v8463_v55  ;;  %4704 = vpow2.f32 %v1056_v13  ;;  %v4699_v38 = vpop.eup %4698 }
 0x173   : > { %v1401_v18 = vadd.f32 %v1369_v41, %v8464_v52  ;;  %v965_v51 = vand.u32 2147483647, %v901_v50  ;;  %v1405_v58 = vadd.f32 %v1373_v54, %v925_v20  ;;  %vm6079_vm9 = vcmp.lt.f32.partialorder %v1277_v45, 0.0004427343 }
 0x174   : > { %4706 = vlog2.f32 %v1280_v12  ;;  %v903_v36 = vmul.f32 100.0, %v6061_v62  ;;  %v1273_v23 = vmul.f32 0.6931472, %v4699_v38  ;;  %v1276_v43 = vmul.f32 %v6020_v46, %v1275_v0 }
 0x175   : > { %v1298_v7 = vadd.f32 1.0, %v6065_v5  ;;  %4708 = vpow2.f32 %v1060_v11  ;;  %v997_v35 = vsub.f32 0.0, %v965_v51  ;;  %v4362_v41 = vpack.c.bf16 %v5805_v37, %v5773_v27 }
 0x176   : > { %v967_v4 = vand.u32 2147483647, %v903_v36  ;;  %v4378_v29 = vpack.c.bf16 %v5813_v33, %v5793_v32  ;;  %v923_v19 = vmax.f32 %v5787_v17, 0.0  ;;  %v1279_v2 = vsel %vm6079_vm9, %v1276_v43, %v1273_v23  ;;  %v6094_v46 = vpop.eup %4700 }
 0x177   : > { %v4366_v45 = vpack.c.bf16 %v1397_v26, %v5891_v57  ;;  %v4382_v50 = vpack.c.bf16 %v1399_v25, %v1395_v10  ;;  %v927_v54 = vmax.f32 %v5901_v8, 0.0  ;;  %v1375_v12 = vmul.f32 0.01, %v1279_v2  ;;  %4363 = vmatprep.subr.bf16.mxu0 %v4362_v41 }
 0x178   : > { %v1058_v13 = vmul.f32 1.442695, %v997_v35  ;;  %4379 = vmatprep.subr.bf16.mxu1 %v4378_v29  ;;  %v4370_v27 = vpack.c.bf16 %v1405_v58, %v1401_v18  ;;  %4710 = vlog2.f32 %v1298_v7  ;;  %v999_v37 = vsub.f32 0.0, %v967_v4 }
 0x179   : > { %v8467_v17 = vpack.c.bf16 %v5693_v6, %v5689_v60  ;;  %v8468_v32 = vpack.c.bf16 %v5712_v1, %v5706_v3  ;;  %v1403_v33 = vadd.f32 %v1371_v22, %v923_v19  ;;  %v1407_v57 = vadd.f32 %v1375_v12, %v927_v54  ;;  %v6103_v8 = vpop.eup %4702 }
 0x17a   : > { %4712 = vpow2.f32 %v1058_v13  ;;  %v1289_v63 = vadd.f32 1.0, %v6094_v46  ;;  %v1062_v0 = vmul.f32 1.442695, %v999_v37  ;;  %v1283_v16 = vmul.f32 -0.5, %v6041_v14 }
 0x17b   : > { %4365 = vmatpush1.bf16.msra.mxu0 %v8467_v17  ;;  %4381 = vmatpush1.bf16.msra.mxu1 %v8468_v32  ;;  %v4386_v11 = vpack.c.bf16 %v1407_v57, %v1403_v33  ;;  %v8469_v60 = vpack.c.bf16 %v5878_v44, %v5828_v48  ;;  %v8470_v6 = vpack.c.bf16 %v5905_v49, %v5842_v34  ;;  %v1307_v1 = vadd.f32 1.0, %v6103_v8 }
 0x17c   : > { %4367 = vmatprep.subr.bf16.mxu0 %v4366_v45  ;;  %4383 = vmatprep.subr.bf16.mxu1 %v4382_v50  ;;  %v4705_v15 = vpop.eup %4704  ;;  %4714 = vpow2.f32 %v1062_v0  ;;  %v1301_v26 = vmul.f32 -0.5, %v6065_v5  ;;  %v1284_v55 = vadd.f32 1.0, %v1283_v16  ;;  %v1286_v34 = vand.u32 2147483647, %v6041_v14 }
 0x17d   : > { %v1316_v10 = vadd.f32 1.0, %v4705_v15  ;;  %4716 = vlog2.f32 %v1289_v63  ;;  %v1319_v25 = vmul.f32 -0.5, %v4705_v15  ;;  %v1292_v18 = vmul.f32 -0.5, %v6094_v46 }
 0x17e   : > { %v4707_v3 = vpop.eup %4706  ;;  %v1302_v52 = vadd.f32 1.0, %v1301_v26  ;;  %v1285_v22 = vmul.f32 %v6041_v14, %v1284_v55  ;;  %v1304_v42 = vand.u32 2147483647, %v6065_v5  ;;  %v928_v40 = vmax.f32 %v5917_v39, 0.0 }
 0x17f   : > { %4369 = vmatpush1.bf16.msra.mxu0 %v8469_v60  ;;  %4385 = vmatpush1.bf16.msra.mxu1 %v8470_v6  ;;  %v6114_v31 = vpop.eup %4708  ;;  %4718 = vlog2.f32 %v1316_v10  ;;  %v1282_v49 = vmul.f32 0.6931472, %v4707_v3  ;;  %vm6133_vm10 = vcmp.lt.f32.partialorder %v1286_v34, 0.0004427343  ;;  %v932_v14 = vmax.f32 %v6007_v9, 0.0 }
 0x180   : > { %4371 = vmatprep.subr.bf16.mxu0 %v4370_v27  ;;  %4387 = vmatprep.subr.bf16.mxu1 %v4386_v11  ;;  %v1334_v48 = vadd.f32 1.0, %v6114_v31  ;;  %4720 = vlog2.f32 %v1307_v1  ;;  %v1337_v61 = vmul.f32 -0.5, %v6114_v31  ;;  %v1320_v58 = vadd.f32 1.0, %v1319_v25 }
 0x181   : > { %v1288_v38 = vsel %vm6133_vm10, %v1285_v22, %v1282_v49  ;;  %v1303_v36 = vmul.f32 %v6065_v5, %v1302_v52  ;;  %v1293_v23 = vadd.f32 1.0, %v1292_v18  ;;  %v1322_v39 = vand.u32 2147483647, %v4705_v15 }
 0x182   : > { %v4711_v44 = vpop.eup %4710  ;;  %4722 = vlog2.f32 %v1334_v48  ;;  %v934_v43 = vmax.f32 %v6011_v21, 0.0  ;;  %vm6145_vm11 = vcmp.lt.f32.partialorder %v1304_v42, 0.0004427343  ;;  %v1338_v4 = vadd.f32 1.0, %v1337_v61 }
 0x183   : > { %4373 = vmatpush1.bf16.msra.mxu0 %v4372_v28  ;;  %4389 = vmatpush1.bf16.msra.mxu1 %v4388_v47  ;;  %v930_v47 = vmax.f32 %v5943_v30, 0.0  ;;  %v1300_v51 = vmul.f32 0.6931472, %v4711_v44  ;;  %v1310_v30 = vmul.f32 -0.5, %v6103_v8  ;;  %v1376_v29 = vmul.f32 0.01, %v1288_v38 }
 0x184   : > { %v6125_v20 = vpop.eup %4712  ;;  %v1295_v5 = vand.u32 2147483647, %v6094_v46  ;;  %v1321_v45 = vmul.f32 %v4705_v15, %v1320_v58  ;;  %v1340_v50 = vand.u32 2147483647, %v6114_v31  ;;  %v1294_v13 = vmul.f32 %v6094_v46, %v1293_v23 }
 0x185   : > { %v1325_v28 = vadd.f32 1.0, %v6125_v20  ;;  %v1306_v19 = vsel %vm6145_vm11, %v1303_v36, %v1300_v51  ;;  %v1328_v2 = vmul.f32 -0.5, %v6125_v20  ;;  %v1313_v27 = vand.u32 2147483647, %v6103_v8 }
 0x186   : > { %v6141_v53 = vpop.eup %4714  ;;  %vm1323_vm12 = vcmp.lt.f32.partialorder %v1322_v39, 0.0004427343  ;;  %v1378_v17 = vmul.f32 0.01, %v1306_v19  ;;  %v1311_v32 = vadd.f32 1.0, %v1310_v30  ;;  %v1339_v57 = vmul.f32 %v6114_v31, %v1338_v4  ;;  %v8479_v39 = vld [vmem:[#allocation10_spill] sm:$0xff] }
 0x187   : > { %4724 = vlog2.f32 %v1325_v28  ;;  %v4717_v7 = vpop.eup %4716  ;;  %v1343_v9 = vadd.f32 1.0, %v6141_v53  ;;  %v1329_v11 = vadd.f32 1.0, %v1328_v2  ;;  %v1346_v15 = vmul.f32 -0.5, %v6141_v53  ;;  %v1420_v19 = vld [vmem:[%s8376_s3 + $0x20] sm:$0xff]  ;;  %v1422_v2 = vld [vmem:[%s8376_s3 + $0x30] sm:$0xff] }
 0x188   : > { %v1291_v12 = vmul.f32 0.6931472, %v4717_v7  ;;  %v1408_v16 = vadd.f32 %v1376_v29, %v928_v40  ;;  %vm6160_vm13 = vcmp.lt.f32.partialorder %v1295_v5, 0.0004427343  ;;  %vm1341_vm14 = vcmp.lt.f32.partialorder %v1340_v50, 0.0004427343 }
 0x189   : > { %v4719_v41 = vpop.eup %4718  ;;  %4726 = vlog2.f32 %v1343_v9  ;;  %v1331_v46 = vand.u32 2147483647, %v6125_v20  ;;  %v1410_v26 = vadd.f32 %v1378_v17, %v930_v47  ;;  %v1312_v55 = vmul.f32 %v6103_v8, %v1311_v32  ;;  %v1419_v29 = vld [vmem:[%s8376_s3 + $0x18] sm:$0xff]  ;;  %v1421_v5 = vld [vmem:[%s8376_s3 + $0x28] sm:$0xff] }
 0x18a   : > { %v1318_v21 = vmul.f32 0.6931472, %v4719_v41  ;;  %v4721_v54 = vpop.eup %4720  ;;  %v1297_v6 = vsel %vm6160_vm13, %v1294_v13, %v1291_v12  ;;  %vm6168_vm15 = vcmp.lt.f32.partialorder %v1313_v27, 0.0004427343  ;;  %v1330_v25 = vmul.f32 %v6125_v20, %v1329_v11  ;;  %v1418_v41 = vld [vmem:[%s8376_s3 + $0x10] sm:$0xff]  ;;  %v1440_v27 = vpop.permute.xlu1 %1439 }
 0x18b   : > { %v1309_v3 = vmul.f32 0.6931472, %v4721_v54  ;;  %v1347_v52 = vadd.f32 1.0, %v1346_v15  ;;  %v1377_v18 = vmul.f32 0.01, %v1297_v6  ;;  %v929_v40 = vmax.f32 %v5973_v56, 0.0 }
 0x18c   : > { %v4723_v37 = vpop.eup %4722  ;;  %v1324_v33 = vsel %vm1323_vm12, %v1321_v45, %v1318_v21  ;;  %vm1332_vm0 = vcmp.lt.f32.partialorder %v1331_v46, 0.0004427343  ;;  %v1349_v42 = vand.u32 2147483647, %v6141_v53  ;;  %v933_v47 = vmax.f32 %v6036_v24, 0.0  ;;  %v1416_v24 = vld [vmem:[%s8376_s3] sm:$0xff]  ;;  %v1435_v45 = vpop.permute.xlu0 %1434 }
 0x18d   : > { %v1380_v63 = vmul.f32 0.01, %v1324_v33  ;;  %v1336_v0 = vmul.f32 0.6931472, %v4723_v37  ;;  %v1315_v61 = vsel %vm6168_vm15, %v1312_v55, %v1309_v3  ;;  %v1348_v20 = vmul.f32 %v6141_v53, %v1347_v52  ;;  %v1423_v21 = vld [vmem:[%s8376_s3 + $0x38] sm:$0xff] }
 0x18e   : > { %v1379_v58 = vmul.f32 0.01, %v1315_v61  ;;  %vm1350_vm1 = vcmp.lt.f32.partialorder %v1349_v42, 0.0004427343  ;;  %v935_v7 = vmax.f32 %v6061_v62, 0.0  ;;  %vm1472_vm2 = vcmask 523264  }
 0x18f   : > { %v1412_v1 = vadd.f32 %v1380_v63, %v932_v14  ;;  %v1342_v10 = vsel %vm1341_vm14, %v1339_v57, %v1336_v0  ;;  %v1409_v14 = vadd.f32 %v1377_v18, %v929_v40  ;;  %v8480_v9 = vmov 0.0   ;;  %v1417_v62 = vld [vmem:[%s8376_s3 + $0x8] sm:$0xff] }
 0x190   : > { %v1382_v34 = vmul.f32 0.01, %v1342_v10 }
 0x191   : > { %v4725_v31 = vpop.eup %4724  ;;  %v4376_v44 = vpack.c.bf16 %v1412_v1, %v1408_v16 }
 0x192   : > { %v1327_v49 = vmul.f32 0.6931472, %v4725_v31  ;;  %v1414_v22 = vadd.f32 %v1382_v34, %v934_v43  ;;  %v931_v43 = vmax.f32 %v8479_v39, 0.0 }
 0x193   : > { %v4727_v8 = vpop.eup %4726 }
 0x194   : > { %v1333_v28 = vsel %vm1332_vm0, %v1330_v25, %v1327_v49  ;;  %v4392_v59 = vpack.c.bf16 %v1414_v22, %v1410_v26  ;;  %v1345_v38 = vmul.f32 0.6931472, %v4727_v8  ;;  %v1411_v4 = vadd.f32 %v1379_v58, %v931_v43 }
 0x195   : > { %v1381_v51 = vmul.f32 0.01, %v1333_v28 }
 0x196   : > { %v1351_v23 = vsel %vm1350_vm1, %v1348_v20, %v1345_v38 }
 0x197   : > { %v1413_v36 = vadd.f32 %v1381_v51, %v933_v47  ;;  %v1383_v35 = vmul.f32 0.01, %v1351_v23 }
 0x199   : > { %v4374_v30 = vpack.c.bf16 %v1413_v36, %v1409_v14  ;;  %v1415_v56 = vadd.f32 %v1383_v35, %v935_v7 }
 0x19b   : > { %4375 = vmatprep.subr.bf16.mxu0 %v4374_v30  ;;  %v4390_v53 = vpack.c.bf16 %v1415_v56, %v1411_v4  ;;  %v1445_v30 = vpop.permute.xlu0 %1444 }
 0x19c   : > { %4377 = vmatpush1.bf16.msra.mxu0 %v4376_v44 }
 0x19d   : > { %4391 = vmatprep.subr.bf16.mxu1 %v4390_v53 }
 0x19e   : > { %4393 = vmatpush1.bf16.msra.mxu1 %v4392_v59 }
 0x19f   : > { %4306 = vmatmul.mubr.msk.f32.vlgmr.msra.gmra.mrb[32].mxu0 %vm1472_vm2, %v1416_v24 }
 0x1a0   : > { %1567 = vmatprep.mubr.f32.mxu0 %v8480_v9 }
 0x1a1   : > { %4314 = vmatmul.mubr.msk.f32.vlgmr.msra.gmra.mrb[32].mxu1 %vm1472_vm2, %v1416_v24 }
 0x1a2   : > { %1680 = vmatprep.mubr.f32.mxu1 %v8480_v9 }
 0x1a3   : > { %4307 = vmatmul.mubr.msk.f32.gmra.mrb[34].mxu0 %vm1472_vm2, %v1417_v62 }
 0x1a4   : > { %1573 = vmatprep.mubr.f32.mxu0 %v8480_v9 }
 0x1a5   : > { %4315 = vmatmul.mubr.msk.f32.gmra.mrb[34].mxu1 %vm1472_vm2, %v1417_v62 }
 0x1a6   : > { %1686 = vmatprep.mubr.f32.mxu1 %v8480_v9 }
 0x1a7   : > { %4308 = vmatmul.mubr.msk.f32.gmra.mrb[36].mxu0 %vm1472_vm2, %v1418_v41 }
 0x1a8   : > { %1579 = vmatprep.mubr.f32.mxu0 %v8480_v9 }
 0x1a9   : > { %4316 = vmatmul.mubr.msk.f32.gmra.mrb[36].mxu1 %vm1472_vm2, %v1418_v41 }
 0x1aa   : > { %1692 = vmatprep.mubr.f32.mxu1 %v8480_v9 }
 0x1ab   : > { %4309 = vmatmul.mubr.msk.f32.gmra.mrb[38].mxu0 %vm1472_vm2, %v1419_v29 }
 0x1ac   : > { %1585 = vmatprep.mubr.f32.mxu0 %v8480_v9 }
 0x1ad   : > { %4317 = vmatmul.mubr.msk.f32.gmra.mrb[38].mxu1 %vm1472_vm2, %v1419_v29 }
 0x1ae   : > { %1698 = vmatprep.mubr.f32.mxu1 %v8480_v9 }
 0x1af   : > { %4310 = vmatmul.mubr.msk.f32.gmra.mrb[40].mxu0 %vm1472_vm2, %v1420_v19 }
 0x1b0   : > { %1591 = vmatprep.mubr.f32.mxu0 %v8480_v9 }
 0x1b1   : > { %4318 = vmatmul.mubr.msk.f32.gmra.mrb[40].mxu1 %vm1472_vm2, %v1420_v19 }
 0x1b2   : > { %1704 = vmatprep.mubr.f32.mxu1 %v8480_v9 }
 0x1b3   : > { %4311 = vmatmul.mubr.msk.f32.gmra.mrb[42].mxu0 %vm1472_vm2, %v1421_v5 }
 0x1b4   : > { %1597 = vmatprep.mubr.f32.mxu0 %v8480_v9 }
 0x1b5   : > { %4319 = vmatmul.mubr.msk.f32.gmra.mrb[42].mxu1 %vm1472_vm2, %v1421_v5 }
 0x1b6   : > { %1710 = vmatprep.mubr.f32.mxu1 %v8480_v9 }
 0x1b7   : > { %4312 = vmatmul.mubr.msk.f32.gmra.mrb[44].mxu0 %vm1472_vm2, %v1422_v2 }
 0x1b8   : > { %1603 = vmatprep.mubr.f32.mxu0 %v8480_v9 }
 0x1b9   : > { %4320 = vmatmul.mubr.msk.f32.gmra.mrb[44].mxu1 %vm1472_vm2, %v1422_v2 }
 0x1ba   : > { %1716 = vmatprep.mubr.f32.mxu1 %v8480_v9 }
 0x1bb   : > { %4313 = vmatmul.mubr.msk.f32.gmra.mrb[46].mxu0 %vm1472_vm2, %v1423_v21 }
 0x1bc   : > { %2411 = vmatprep.mubr.f32.mxu0 %v8480_v9 }
 0x1bd   : > { %4321 = vmatmul.mubr.msk.f32.gmra.mrb[46].mxu1 %vm1472_vm2, %v1423_v21 }
 0x1be   : > { %2524 = vmatprep.mubr.f32.mxu1 %v8480_v9 }
 0x272   : > { %v1563_v50 = vpop.f32.mrb[32].mxu0 }
 0x273   : > { %v6237_v54 = vadd.f32 %v1563_v50, %v1435_v45  ;;  %v1565_v12 = vpop.f32.mrb[33].mxu0 }
 0x274   : > { %v6239_v13 = vadd.f32 %v1565_v12, %v1435_v45  ;;  %v1676_v17 = vpop.f32.mrb[32].mxu1 }
 0x275   : > { %v1723_v37 = vmul.f32 100.0, %v6237_v54  ;;  %v6243_v63 = vadd.f32 %v1676_v17, %v1435_v45  ;;  %v1678_v0 = vpop.f32.mrb[33].mxu1 }
 0x276   : > { %v1724_v32 = vmul.f32 100.0, %v6239_v13  ;;  %v1569_v33 = vpop.f32.mrb[34].mxu0  ;;  %v6247_v16 = vadd.f32 %v1678_v0, %v1435_v45 }
 0x277   : > { %v1787_v57 = vand.u32 2147483647, %v1723_v37  ;;  %v6245_v11 = vadd.f32 %v1569_v33, %v1440_v27  ;;  %v1571_v15 = vpop.f32.mrb[35].mxu0  ;;  %v1725_v6 = vmul.f32 100.0, %v6243_v63 }
 0x278   : > { %v6249_v60 = vadd.f32 %v1571_v15, %v1440_v27  ;;  %v1788_v1 = vand.u32 2147483647, %v1724_v32  ;;  %v1726_v10 = vmul.f32 100.0, %v6247_v16  ;;  %v1682_v31 = vpop.f32.mrb[34].mxu1 }
 0x279   : > { %v1819_v46 = vsub.f32 0.0, %v1787_v57  ;;  %v1727_v3 = vmul.f32 100.0, %v6245_v11  ;;  %v1789_v48 = vand.u32 2147483647, %v1725_v6  ;;  %v6254_v44 = vadd.f32 %v1682_v31, %v1440_v27  ;;  %v1684_v42 = vpop.f32.mrb[35].mxu1 }
 0x27a   : > { %v1575_v26 = vpop.f32.mrb[36].mxu0  ;;  %v1790_v49 = vand.u32 2147483647, %v1726_v10  ;;  %v1728_v25 = vmul.f32 100.0, %v6249_v60  ;;  %v1820_v28 = vsub.f32 0.0, %v1788_v1  ;;  %v6260_v20 = vadd.f32 %v1684_v42, %v1440_v27 }
 0x27b   : > { %v1851_v55 = vmul.f32 1.442695, %v1819_v46  ;;  %v1791_v34 = vand.u32 2147483647, %v1727_v3  ;;  %v1821_v52 = vsub.f32 0.0, %v1789_v48  ;;  %v1729_v22 = vmul.f32 100.0, %v6254_v44 }
 0x27c   : > { %v1577_v61 = vpop.f32.mrb[37].mxu0  ;;  %v1792_v8 = vand.u32 2147483647, %v1728_v25  ;;  %v1688_v40 = vpop.f32.mrb[36].mxu1  ;;  %v1822_v14 = vsub.f32 0.0, %v1790_v49  ;;  %v1730_v39 = vmul.f32 100.0, %v6260_v20  ;;  %v6271_v62 = vadd.f32 %v1575_v26, %v1445_v30 }
 0x27d   : > { %4728 = vpow2.f32 %v1851_v55  ;;  %v1823_v18 = vsub.f32 0.0, %v1791_v34  ;;  %v1855_v47 = vmul.f32 1.442695, %v1821_v52  ;;  %v1793_v38 = vand.u32 2147483647, %v1729_v22  ;;  %v1690_v58 = vpop.f32.mrb[37].mxu1 }
 0x27e   : > { %v6258_v59 = vpop.f32.mrb[38].mxu0  ;;  %v1853_v43 = vmul.f32 1.442695, %v1820_v28  ;;  %v1824_v56 = vsub.f32 0.0, %v1792_v8  ;;  %v1857_v53 = vmul.f32 1.442695, %v1822_v14  ;;  %v6275_v19 = vadd.f32 %v1688_v40, %v1445_v30 }
 0x27f   : > { %v1859_v51 = vmul.f32 1.442695, %v1823_v18  ;;  %v6262_v36 = vpop.f32.mrb[39].mxu0  ;;  %4730 = vpow2.f32 %v1855_v47  ;;  %v1825_v23 = vsub.f32 0.0, %v1793_v38  ;;  %v1794_v29 = vand.u32 2147483647, %v1730_v39  ;;  %v6330_v39 = vpop.permute.xlu1 %1449 }
 0x280   : > { %v6265_v7 = vpop.f32.mrb[38].mxu1  ;;  %v1861_v45 = vmul.f32 1.442695, %v1824_v56  ;;  %v1731_v27 = vmul.f32 100.0, %v6271_v62  ;;  %v1733_v32 = vmul.f32 100.0, %v6275_v19  ;;  %v6314_v22 = vadd.f32 %v1577_v61, %v1445_v30 }
 0x281   : > { %4732 = vpow2.f32 %v1859_v51  ;;  %v1863_v4 = vmul.f32 1.442695, %v1825_v23  ;;  %v6269_v24 = vpop.f32.mrb[39].mxu1  ;;  %v1826_v37 = vsub.f32 0.0, %v1794_v29  ;;  %v6323_v51 = vadd.f32 %v1690_v58, %v1445_v30 }
 0x282   : > { %v6267_v35 = vpop.f32.mrb[40].mxu0  ;;  %v1795_v46 = vand.u32 2147483647, %v1731_v27  ;;  %v1797_v55 = vand.u32 2147483647, %v1733_v32  ;;  %v1732_v29 = vmul.f32 100.0, %v6314_v22 }
 0x283   : > { %v6273_v41 = vpop.f32.mrb[41].mxu0  ;;  %4734 = vpow2.f32 %v1863_v4  ;;  %v1865_v1 = vmul.f32 1.442695, %v1826_v37 }
 0x284   : > { %4736 = vpow2.f32 %v1853_v43  ;;  %v6277_v5 = vpop.f32.mrb[40].mxu1  ;;  %v1827_v47 = vsub.f32 0.0, %v1795_v46  ;;  %v1829_v56 = vsub.f32 0.0, %v1797_v55  ;;  %v1734_v46 = vmul.f32 100.0, %v6323_v51 }
 0x285   : > { %v6283_v50 = vpop.f32.mrb[41].mxu1  ;;  %4738 = vpow2.f32 %v1857_v53  ;;  %v1796_v31 = vand.u32 2147483647, %v1732_v29 }
 0x286   : > { %v6279_v2 = vpop.f32.mrb[42].mxu0  ;;  %v1871_v52 = vmul.f32 1.442695, %v1829_v56  ;;  %v1798_v29 = vand.u32 2147483647, %v1734_v46 }
 0x287   : > { %v6281_v21 = vpop.eup %4728  ;;  %v6287_v17 = vpop.f32.mrb[43].mxu0 }
 0x288   : > { %v1915_v12 = vadd.f32 1.0, %v6281_v21  ;;  %v6290_v33 = vpop.f32.mrb[42].mxu1  ;;  %v1918_v25 = vmul.f32 -0.5, %v6281_v21  ;;  %v1921_v38 = vand.u32 2147483647, %v6281_v21 }
 0x289   : > { %v6292_v57 = vpop.eup %4730  ;;  %v6294_v0 = vpop.f32.mrb[43].mxu1 }
 0x28a   : > { %4740 = vlog2.f32 %v1915_v12  ;;  %v1933_v15 = vadd.f32 1.0, %v6292_v57  ;;  %v6297_v6 = vpop.f32.mrb[44].mxu0  ;;  %v1936_v14 = vmul.f32 -0.5, %v6292_v57  ;;  %v1919_v58 = vadd.f32 1.0, %v1918_v25 }
 0x28b   : > { %4742 = vpow2.f32 %v1861_v45  ;;  %v6299_v3 = vpop.eup %4732  ;;  %v6301_v10 = vpop.f32.mrb[45].mxu0  ;;  %v6340_v45 = vadd.f32 %v6258_v59, %v6330_v39  ;;  %v1939_v37 = vand.u32 2147483647, %v6292_v57  ;;  %vm6349_vm3 = vcmp.lt.f32.partialorder %v1921_v38, 0.0004427343 }
 0x28c   : > { %4744 = vlog2.f32 %v1933_v15  ;;  %v1951_v26 = vadd.f32 1.0, %v6299_v3  ;;  %v6305_v48 = vpop.f32.mrb[44].mxu1  ;;  %v1954_v43 = vmul.f32 -0.5, %v6299_v3  ;;  %v1867_v15 = vmul.f32 1.442695, %v1827_v47 }
 0x28d   : > { %v6309_v49 = vpop.eup %4734  ;;  %v6316_v42 = vpop.f32.mrb[45].mxu1  ;;  %v1937_v25 = vadd.f32 1.0, %v1936_v14  ;;  %v1957_v4 = vand.u32 2147483647, %v6299_v3  ;;  %v1920_v47 = vmul.f32 %v6281_v21, %v1919_v58  ;;  %vm6358_vm4 = vcmp.lt.f32.partialorder %v1939_v37, 0.0004427343 }
 0x28e   : > { %v6307_v34 = vpop.f32.mrb[46].mxu0  ;;  %v6320_v8 = vpop.eup %4736  ;;  %4746 = vlog2.f32 %v1951_v26  ;;  %v1969_v40 = vadd.f32 1.0, %v6309_v49  ;;  %v1972_v32 = vmul.f32 -0.5, %v6309_v49  ;;  %v1955_v18 = vadd.f32 1.0, %v1954_v43 }
 0x28f   : > { %v6318_v28 = vpop.f32.mrb[47].mxu0  ;;  %4748 = vpow2.f32 %v1865_v1  ;;  %v6328_v61 = vpop.eup %4738  ;;  %v1924_v30 = vadd.f32 1.0, %v6320_v8  ;;  %v1975_v23 = vand.u32 2147483647, %v6309_v49  ;;  %v1938_v56 = vmul.f32 %v6292_v57, %v1937_v25 }
 0x290   : > { %4750 = vlog2.f32 %v1969_v40  ;;  %v6334_v53 = vpop.f32.mrb[46].mxu1  ;;  %v1942_v59 = vadd.f32 1.0, %v6328_v61  ;;  %v1927_v40 = vmul.f32 -0.5, %v6320_v8  ;;  %v1973_v14 = vadd.f32 1.0, %v1972_v32 }
 0x291   : > { %v6342_v12 = vpop.f32.mrb[47].mxu1  ;;  %4752 = vlog2.f32 %v1924_v30  ;;  %v1956_v58 = vmul.f32 %v6299_v3, %v1955_v18  ;;  %vm6367_vm5 = vcmp.lt.f32.partialorder %v1957_v4, 0.0004427343  ;;  %v1735_v37 = vmul.f32 100.0, %v6340_v45 }
 0x292   : > { %8481 = vst [vmem:[#allocation8_spill] sm:$0xff] %v6342_v12  ;;  %4754 = vpow2.f32 %v1867_v15  ;;  %vm6376_vm6 = vcmp.lt.f32.partialorder %v1975_v23, 0.0004427343  ;;  %v1828_v57 = vsub.f32 0.0, %v1796_v31  ;;  %v1974_v18 = vmul.f32 %v6309_v49, %v1973_v14 }
 0x293   : > { %4756 = vlog2.f32 %v1942_v59  ;;  %v6383_v4 = vadd.f32 %v6265_v7, %v6330_v39  ;;  %v1945_v31 = vmul.f32 -0.5, %v6328_v61  ;;  %v8490_v7 = vmax.f32 %v6237_v54, 0.0 }
 0x294   : > { %v4741_v27 = vpop.eup %4740  ;;  %v1869_v49 = vmul.f32 1.442695, %v1828_v57  ;;  %v8492_v54 = vmax.f32 %v6243_v63, 0.0 }
 0x295   : > { %v6347_v1 = vpop.eup %4742  ;;  %v1917_v26 = vmul.f32 0.6931472, %v4741_v27  ;;  %v1737_v30 = vmul.f32 100.0, %v6383_v4 }
 0x296   : > { %v4745_v27 = vpop.eup %4744  ;;  %v1960_v9 = vadd.f32 1.0, %v6347_v1 }
 0x297   : > { %v1923_v43 = vsel %vm6349_vm3, %v1920_v47, %v1917_v26  ;;  %v1935_v12 = vmul.f32 0.6931472, %v4745_v27  ;;  %v1799_v47 = vand.u32 2147483647, %v1735_v37  ;;  %v1930_v37 = vand.u32 2147483647, %v6320_v8 }
 0x298   : > { %v4747_v21 = vpop.eup %4746  ;;  %v2203_v3 = vmul.f32 0.01, %v1923_v43  ;;  %4758 = vlog2.f32 %v1960_v9 }
 0x299   : > { %v6372_v32 = vpop.eup %4748  ;;  %v1941_v15 = vsel %vm6358_vm4, %v1938_v56, %v1935_v12  ;;  %v1953_v26 = vmul.f32 0.6931472, %v4747_v21  ;;  %v1830_v12 = vsub.f32 0.0, %v1798_v29  ;;  %4760 = vpow2.f32 %v1871_v52 }
 0x29a   : > { %v4751_v25 = vpop.eup %4750  ;;  %v2205_v23 = vmul.f32 0.01, %v1941_v15  ;;  %v1978_v38 = vadd.f32 1.0, %v6372_v32  ;;  %v1831_v14 = vsub.f32 0.0, %v1799_v47  ;;  %v6393_v43 = vadd.f32 %v2203_v3, %v8490_v7 }
 0x29b   : > { %v1959_v46 = vsel %vm6367_vm5, %v1956_v58, %v1953_v26  ;;  %v1971_v59 = vmul.f32 0.6931472, %v4751_v25  ;;  %v8491_v56 = vmax.f32 %v6245_v11, 0.0  ;;  %v4753_v29 = vpop.eup %4752  ;;  %v1928_v52 = vadd.f32 1.0, %v1927_v40 }
 0x29c   : > { %v2207_v27 = vmul.f32 0.01, %v1959_v46  ;;  %v1963_v15 = vmul.f32 -0.5, %v6347_v1  ;;  %v1873_v26 = vmul.f32 1.442695, %v1830_v12  ;;  %v6402_v55 = vpop.eup %4754  ;;  %v6406_v57 = vadd.f32 %v2205_v23, %v8492_v54 }
 0x29d   : > { %v1977_v9 = vsel %vm6376_vm6, %v1974_v18, %v1971_v59  ;;  %v8493_v25 = vmax.f32 %v6254_v44, 0.0  ;;  %4762 = vlog2.f32 %v1978_v38  ;;  %v4757_v40 = vpop.eup %4756  ;;  %v1758_v18 = vmax.f32 %v6247_v16, 0.0 }
 0x29e   : > { %v6397_v21 = vadd.f32 %v2207_v27, %v8491_v56  ;;  %v2209_v58 = vmul.f32 0.01, %v1977_v9  ;;  %v1946_v46 = vadd.f32 1.0, %v1945_v31  ;;  %v1948_v59 = vand.u32 2147483647, %v6328_v61 }
 0x29f   : > { %v1875_v12 = vmul.f32 1.442695, %v1831_v14  ;;  %v1760_v47 = vmax.f32 %v6249_v60, 0.0  ;;  %4764 = vpow2.f32 %v1869_v49  ;;  %v1801_v23 = vand.u32 2147483647, %v1737_v30 }
 0x2a0   : > { %v6412_v3 = vadd.f32 %v2209_v58, %v8493_v25  ;;  %v1926_v27 = vmul.f32 0.6931472, %v4753_v29  ;;  %v1762_v44 = vmax.f32 %v6260_v20, 0.0  ;;  %v1987_v9 = vadd.f32 1.0, %v6402_v55 }
 0x2a1   : > { %4766 = vpow2.f32 %v1873_v26  ;;  %v1929_v7 = vmul.f32 %v6320_v8, %v1928_v52  ;;  %vm6422_vm7 = vcmp.lt.f32.partialorder %v1930_v37, 0.0004427343  ;;  %v1964_v14 = vadd.f32 1.0, %v1963_v15  ;;  %v1455_v15 = vpop.permute.xlu0 %1454 }
 0x2a2   : > { %v4759_v38 = vpop.eup %4758  ;;  %v1763_v56 = vmax.f32 %v6271_v62, 0.0  ;;  %v1944_v58 = vmul.f32 0.6931472, %v4757_v40  ;;  %v1947_v49 = vmul.f32 %v6328_v61, %v1946_v46  ;;  %vm6428_vm8 = vcmp.lt.f32.partialorder %v1948_v59, 0.0004427343 }
 0x2a3   : > { %4768 = vpow2.f32 %v1875_v12  ;;  %v6432_v29 = vpop.eup %4760  ;;  %v1966_v26 = vand.u32 2147483647, %v6347_v1  ;;  %v1981_v8 = vmul.f32 -0.5, %v6372_v32  ;;  %v1984_v52 = vand.u32 2147483647, %v6372_v32 }
 0x2a4   : > { %v1833_v37 = vsub.f32 0.0, %v1801_v23  ;;  %v1932_v54 = vsel %vm6422_vm7, %v1929_v7, %v1926_v27  ;;  %v1962_v25 = vmul.f32 0.6931472, %v4759_v38  ;;  %4770 = vlog2.f32 %v1987_v9 }
 0x2a5   : > { %v6441_v61 = vadd.f32 %v6262_v36, %v6330_v39  ;;  %v1965_v40 = vmul.f32 %v6347_v1, %v1964_v14  ;;  %v6445_v59 = vadd.f32 %v6267_v35, %v1455_v15  ;;  %v6448_v12 = vadd.f32 %v6277_v5, %v1455_v15 }
 0x2a6   : > { %v1879_v46 = vmul.f32 1.442695, %v1833_v37  ;;  %v1950_v23 = vsel %vm6428_vm8, %v1947_v49, %v1944_v58  ;;  %v2005_v27 = vadd.f32 1.0, %v6432_v29  ;;  %v6456_v36 = vadd.f32 %v6269_v24, %v6330_v39 }
 0x2a7   : > { %v1736_v9 = vmul.f32 100.0, %v6441_v61  ;;  %v4763_v38 = vpop.eup %4762  ;;  %v2204_v1 = vmul.f32 0.01, %v1932_v54  ;;  %vm6458_vm9 = vcmp.lt.f32.partialorder %v1966_v26, 0.0004427343  ;;  %v1982_v35 = vadd.f32 1.0, %v1981_v8 }
 0x2a8   : > { %4772 = vpow2.f32 %v1879_v46  ;;  %v1968_v5 = vsel %vm6458_vm9, %v1965_v40, %v1962_v25  ;;  %v2206_v24 = vmul.f32 0.01, %v1950_v23  ;;  %v1739_v30 = vmul.f32 100.0, %v6445_v59 }
 0x2a9   : > { %v1800_v58 = vand.u32 2147483647, %v1736_v9  ;;  %v6466_v49 = vpop.eup %4764  ;;  %v1741_v26 = vmul.f32 100.0, %v6448_v12  ;;  %v1980_v8 = vmul.f32 0.6931472, %v4763_v38  ;;  %4774 = vlog2.f32 %v2005_v27 }
 0x2aa   : > { %vm6473_vm10 = vcmp.lt.f32.partialorder %v1984_v52, 0.0004427343  ;;  %v1738_v25 = vmul.f32 100.0, %v6456_v36  ;;  %v8502_v40 = vmax.f32 %v6239_v13, 0.0  ;;  %v2208_v23 = vmul.f32 0.01, %v1968_v5 }
 0x2ab   : > { %v6471_v37 = vpop.eup %4766  ;;  %v1983_v9 = vmul.f32 %v6372_v32, %v1982_v35  ;;  %v1832_v7 = vsub.f32 0.0, %v1800_v58  ;;  %v1990_v14 = vmul.f32 -0.5, %v6402_v55  ;;  %v1996_v52 = vadd.f32 1.0, %v6466_v49 }
 0x2ac   : > { %v6480_v46 = vadd.f32 %v2204_v1, %v8502_v40  ;;  %v1767_v38 = vmax.f32 %v6340_v45, 0.0  ;;  %v1803_v63 = vand.u32 2147483647, %v1739_v30  ;;  %v6490_v27 = vadd.f32 %v2206_v24, %v1758_v18 }
 0x2ad   : > { %v6483_v39 = vpop.eup %4768  ;;  %v2014_v13 = vadd.f32 1.0, %v6471_v37  ;;  %v1805_v5 = vand.u32 2147483647, %v1741_v26  ;;  %v1986_v35 = vsel %vm6473_vm10, %v1983_v9, %v1980_v8  ;;  %v1993_v58 = vand.u32 2147483647, %v6402_v55 }
 0x2ae   : > { %v2023_v1 = vadd.f32 1.0, %v6483_v39  ;;  %v4771_v32 = vpop.eup %4770  ;;  %v1802_v11 = vand.u32 2147483647, %v1738_v25  ;;  %v6500_v30 = vadd.f32 %v2208_v23, %v1760_v47  ;;  %v1877_v16 = vmul.f32 1.442695, %v1832_v7 }
 0x2af   : > { %v6503_v18 = vadd.f32 %v6273_v41, %v1455_v15  ;;  %v1991_v24 = vadd.f32 1.0, %v1990_v14  ;;  %v2008_v26 = vmul.f32 -0.5, %v6432_v29  ;;  %v1835_v54 = vsub.f32 0.0, %v1803_v63 }
 0x2b0   : > { %4776 = vlog2.f32 %v2023_v1  ;;  %v1989_v9 = vmul.f32 0.6931472, %v4771_v32  ;;  %v1837_v40 = vsub.f32 0.0, %v1805_v5  ;;  %v6509_v25 = vadd.f32 %v6283_v50, %v1455_v15  ;;  %v6522_v32 = vpop.permute.xlu1 %1459 }
 0x2b1   : > { %4778 = vlog2.f32 %v1996_v52  ;;  %v2026_v60 = vmul.f32 -0.5, %v6483_v39  ;;  %v1834_v23 = vsub.f32 0.0, %v1802_v11  ;;  %v1883_v41 = vmul.f32 1.442695, %v1835_v54 }
 0x2b2   : > { %v6506_v8 = vpop.eup %4772  ;;  %4780 = vlog2.f32 %v2014_v13  ;;  %v2210_v7 = vmul.f32 0.01, %v1986_v35  ;;  %vm6513_vm11 = vcmp.lt.f32.partialorder %v1993_v58, 0.0004427343  ;;  %v1740_v63 = vmul.f32 100.0, %v6503_v18 }
 0x2b3   : > { %v2041_v47 = vadd.f32 1.0, %v6506_v8  ;;  %4782 = vpow2.f32 %v1877_v16  ;;  %v4775_v52 = vpop.eup %4774  ;;  %v1992_v13 = vmul.f32 %v6402_v55, %v1991_v24  ;;  %v1999_v50 = vmul.f32 -0.5, %v6466_v49 }
 0x2b4   : > { %v1887_v15 = vmul.f32 1.442695, %v1837_v40  ;;  %v2009_v1 = vadd.f32 1.0, %v2008_v26  ;;  %v2011_v5 = vand.u32 2147483647, %v6432_v29  ;;  %v1742_v11 = vmul.f32 100.0, %v6509_v25 }
 0x2b5   : > { %4784 = vlog2.f32 %v2041_v47  ;;  %v1995_v35 = vsel %vm6513_vm11, %v1992_v13, %v1989_v9  ;;  %v2027_v58 = vadd.f32 1.0, %v2026_v60  ;;  %v1881_v16 = vmul.f32 1.442695, %v1834_v23 }
 0x2b6   : > { %4786 = vpow2.f32 %v1883_v41  ;;  %v1804_v54 = vand.u32 2147483647, %v1740_v63  ;;  %v2007_v31 = vmul.f32 0.6931472, %v4775_v52  ;;  %v2029_v55 = vand.u32 2147483647, %v6483_v39 }
 0x2b7   : > { %v2044_v24 = vmul.f32 -0.5, %v6506_v8  ;;  %v6530_v40 = vadd.f32 %v6279_v2, %v6522_v32  ;;  %v6534_v26 = vadd.f32 %v2210_v7, %v1762_v44  ;;  %v2000_v47 = vadd.f32 1.0, %v1999_v50 }
 0x2b8   : > { %v2002_v41 = vand.u32 2147483647, %v6466_v49  ;;  %4788 = vpow2.f32 %v1887_v15  ;;  %v2211_v60 = vmul.f32 0.01, %v1995_v35  ;;  %v2010_v23 = vmul.f32 %v6432_v29, %v2009_v1 }
 0x2b9   : > { %vm6538_vm12 = vcmp.lt.f32.partialorder %v2011_v5, 0.0004427343  ;;  %v1806_v63 = vand.u32 2147483647, %v1742_v11  ;;  %v2028_v13 = vmul.f32 %v6483_v39, %v2027_v58  ;;  %4790 = vpow2.f32 %v1881_v16 }
 0x2ba   : > { %v4777_v9 = vpop.eup %4776  ;;  %v1836_v20 = vsub.f32 0.0, %v1804_v54  ;;  %v2013_v7 = vsel %vm6538_vm12, %v2010_v23, %v2007_v31  ;;  %vm2030_vm13 = vcmp.lt.f32.partialorder %v2029_v55, 0.0004427343  ;;  %v2045_v50 = vadd.f32 1.0, %v2044_v24 }
 0x2bb   : > { %v4779_v52 = vpop.eup %4778  ;;  %v2025_v2 = vmul.f32 0.6931472, %v4777_v9  ;;  %v1743_v15 = vmul.f32 100.0, %v6530_v40  ;;  %v6547_v29 = vmul.f32 %v6466_v49, %v2000_v47  ;;  %v2047_v5 = vand.u32 2147483647, %v6506_v8 }
 0x2bc   : > { %v4781_v44 = vpop.eup %4780  ;;  %v6552_v11 = vadd.f32 %v6290_v33, %v6522_v32  ;;  %v2017_v35 = vmul.f32 -0.5, %v6471_v37  ;;  %v2020_v31 = vand.u32 2147483647, %v6471_v37  ;;  %v1838_v16 = vsub.f32 0.0, %v1806_v63 }
 0x2bd   : > { %v2031_v1 = vsel %vm2030_vm13, %v2028_v13, %v2025_v2  ;;  %v6554_v39 = vpop.eup %4782  ;;  %v6560_v49 = vadd.f32 %v2211_v60, %v1763_v56  ;;  %v2213_v55 = vmul.f32 0.01, %v2013_v7  ;;  %vm6562_vm14 = vcmp.lt.f32.partialorder %v2002_v41, 0.0004427343 }
 0x2be   : > { %v2215_v58 = vmul.f32 0.01, %v2031_v1  ;;  %v1885_v47 = vmul.f32 1.442695, %v1836_v20  ;;  %v2046_v63 = vmul.f32 %v6506_v8, %v2045_v50  ;;  %v1807_v62 = vand.u32 2147483647, %v1743_v15 }
 0x2bf   : > { %v4785_v54 = vpop.eup %4784  ;;  %vm2048_vm15 = vcmp.lt.f32.partialorder %v2047_v5, 0.0004427343  ;;  %v2032_v56 = vadd.f32 1.0, %v6554_v39  ;;  %v1745_v41 = vmul.f32 100.0, %v6552_v11  ;;  %v6578_v60 = vadd.f32 %v6287_v17, %v6522_v32 }
 0x2c0   : > { %v6567_v9 = vpop.eup %4786  ;;  %v6571_v23 = vadd.f32 %v2215_v58, %v1767_v38  ;;  %v2043_v14 = vmul.f32 0.6931472, %v4785_v54  ;;  %v2018_v2 = vadd.f32 1.0, %v2017_v35  ;;  %v1889_v38 = vmul.f32 1.442695, %v1838_v16 }
 0x2c1   : > { %vm6584_vm0 = vcmp.lt.f32.partialorder %v2020_v31, 0.0004427343  ;;  %v2059_v50 = vadd.f32 1.0, %v6567_v9  ;;  %4792 = vpow2.f32 %v1885_v47  ;;  %v8511_v15 = vmax.f32 %v6275_v19, 0.0 }
 0x2c2   : > { %v2049_v45 = vsel %vm2048_vm15, %v2046_v63, %v2043_v14  ;;  %v6582_v20 = vpop.eup %4788  ;;  %v1998_v1 = vmul.f32 0.6931472, %v4779_v52  ;;  %v2016_v5 = vmul.f32 0.6931472, %v4781_v44  ;;  %v1839_v35 = vsub.f32 0.0, %v1807_v62 }
 0x2c3   : > { %v2217_v7 = vmul.f32 0.01, %v2049_v45  ;;  %v6591_v17 = vadd.f32 %v2213_v55, %v8511_v15  ;;  %v6593_v58 = vpop.eup %4790  ;;  %v8512_v16 = vmax.f32 %v6383_v4, 0.0  ;;  %4794 = vlog2.f32 %v2032_v56 }
 0x2c4   : > { %v1809_v31 = vand.u32 2147483647, %v1745_v41  ;;  %v1744_v14 = vmul.f32 100.0, %v6578_v60  ;;  %v2019_v63 = vmul.f32 %v6471_v37, %v2018_v2  ;;  %v2077_v47 = vadd.f32 1.0, %v6582_v20 }
 0x2c5   : > { %v6597_v54 = vadd.f32 %v2217_v7, %v8512_v16  ;;  %4796 = vpow2.f32 %v1889_v38  ;;  %v1891_v19 = vmul.f32 1.442695, %v1839_v35  ;;  %v6606_v4 = vadd.f32 %v6294_v0, %v6522_v32  ;;  %v6617_v38 = vpop.permute.xlu0 %1464 }
 0x2c6   : > { %4798 = vlog2.f32 %v2059_v50  ;;  %v1841_v44 = vsub.f32 0.0, %v1809_v31  ;;  %v2004_v55 = vsel %vm6562_vm14, %v6547_v29, %v1998_v1  ;;  %v2035_v62 = vmul.f32 -0.5, %v6554_v39 }
 0x2c7   : > { %v2050_v37 = vadd.f32 1.0, %v6593_v58  ;;  %4800 = vpow2.f32 %v1891_v19  ;;  %v2022_v56 = vsel %vm6584_vm0, %v2019_v63, %v2016_v5  ;;  %v1808_v45 = vand.u32 2147483647, %v1744_v14 }
 0x2c8   : > { %v2038_v0 = vand.u32 2147483647, %v6554_v39  ;;  %v2053_v32 = vmul.f32 -0.5, %v6593_v58  ;;  %4802 = vlog2.f32 %v2077_v47  ;;  %v1895_v29 = vmul.f32 1.442695, %v1841_v44 }
 0x2c9   : > { %v6621_v24 = vmul.f32 0.01, %v2004_v55  ;;  %v1746_v8 = vmul.f32 100.0, %v6606_v4  ;;  %v6627_v50 = vadd.f32 %v6297_v6, %v6617_v38  ;;  %v2036_v15 = vadd.f32 1.0, %v2035_v62 }
 0x2ca   : > { %4804 = vlog2.f32 %v2050_v37  ;;  %v2062_v1 = vmul.f32 -0.5, %v6567_v9  ;;  %v6633_v16 = vmul.f32 0.01, %v2022_v56  ;;  %v2080_v31 = vmul.f32 -0.5, %v6582_v20 }
 0x2cb   : > { %8513 = vst [vmem:[#allocation9_spill] sm:$0xff] %v6627_v50  ;;  %v6631_v35 = vpop.eup %4792  ;;  %v1840_v63 = vsub.f32 0.0, %v1808_v45  ;;  %vm6637_vm1 = vcmp.lt.f32.partialorder %v2038_v0, 0.0004427343  ;;  %v2054_v6 = vadd.f32 1.0, %v2053_v32  ;;  %4806 = vpow2.f32 %v1895_v29 }
 0x2cc   : > { %v2065_v19 = vand.u32 2147483647, %v6567_v9  ;;  %v1810_v37 = vand.u32 2147483647, %v1746_v8  ;;  %v1747_v56 = vmul.f32 100.0, %v6627_v50  ;;  %v2037_v13 = vmul.f32 %v6554_v39, %v2036_v15 }
 0x2cd   : > { %v4795_v44 = vpop.eup %4794  ;;  %v1893_v62 = vmul.f32 1.442695, %v1840_v63  ;;  %v2056_v45 = vand.u32 2147483647, %v6593_v58  ;;  %v2063_v0 = vadd.f32 1.0, %v2062_v1  ;;  %v2068_v14 = vadd.f32 1.0, %v6631_v35 }
 0x2ce   : > { %v2081_v5 = vadd.f32 1.0, %v2080_v31  ;;  %v1842_v29 = vsub.f32 0.0, %v1810_v37  ;;  %v6651_v41 = vadd.f32 %v6305_v48, %v6617_v38  ;;  %v6656_v63 = vmul.f32 %v6593_v58, %v2054_v6 }
 0x2cf   : > { %v6644_v52 = vpop.eup %4796  ;;  %4808 = vpow2.f32 %v1893_v62  ;;  %vm6658_vm3 = vcmp.lt.f32.partialorder %v2065_v19, 0.0004427343  ;;  %v2083_v15 = vand.u32 2147483647, %v6582_v20  ;;  %v2034_v31 = vmul.f32 0.6931472, %v4795_v44 }
 0x2d0   : > { %v4799_v32 = vpop.eup %4798  ;;  %8516 = vst [vmem:[#allocation7_spill] sm:$0xff] %v6651_v41  ;;  %v2086_v62 = vadd.f32 1.0, %v6644_v52  ;;  %v1811_v48 = vand.u32 2147483647, %v1747_v56  ;;  %vm6666_vm4 = vcmp.lt.f32.partialorder %v2056_v45, 0.0004427343  ;;  %v2064_v6 = vmul.f32 %v6567_v9, %v2063_v0 }
 0x2d1   : > { %v6653_v8 = vpop.eup %4800  ;;  %v2061_v58 = vmul.f32 0.6931472, %v4799_v32  ;;  %4810 = vlog2.f32 %v2068_v14  ;;  %v1897_v19 = vmul.f32 1.442695, %v1842_v29  ;;  %v2082_v7 = vmul.f32 %v6582_v20, %v2081_v5 }
 0x2d2   : > { %v2095_v37 = vadd.f32 1.0, %v6653_v8  ;;  %v4803_v33 = vpop.eup %4802  ;;  %v1749_v44 = vmul.f32 100.0, %v6651_v41  ;;  %v6675_v1 = vadd.f32 %v6301_v10, %v6617_v38  ;;  %vm6677_vm5 = vcmp.lt.f32.partialorder %v2083_v15, 0.0004427343 }
 0x2d3   : > { %v2071_v32 = vmul.f32 -0.5, %v6631_v35  ;;  %v2089_v9 = vmul.f32 -0.5, %v6644_v52  ;;  %v2040_v20 = vsel %vm6637_vm1, %v2037_v13, %v2034_v31  ;;  %v2079_v5 = vmul.f32 0.6931472, %v4803_v33 }
 0x2d4   : > { %4812 = vlog2.f32 %v2095_v37  ;;  %8521 = vst [vmem:[#allocation10_spill] sm:$0xff] %v6675_v1  ;;  %v4805_v56 = vpop.eup %4804  ;;  %v1843_v14 = vsub.f32 0.0, %v1811_v48  ;;  %v2067_v10 = vsel %vm6658_vm3, %v2064_v6, %v2061_v58  ;;  %v2074_v29 = vand.u32 2147483647, %v6631_v35 }
 0x2d5   : > { %4814 = vpow2.f32 %v1897_v19  ;;  %v6685_v0 = vpop.eup %4806  ;;  %v2098_v15 = vmul.f32 -0.5, %v6653_v8  ;;  %v1748_v37 = vmul.f32 100.0, %v6675_v1  ;;  %v6692_v2 = vmul.f32 0.6931472, %v4805_v56 }
 0x2d6   : > { %4816 = vlog2.f32 %v2086_v62  ;;  %v2113_v19 = vadd.f32 1.0, %v6685_v0  ;;  %v1813_v33 = vand.u32 2147483647, %v1749_v44  ;;  %v6696_v47 = vmul.f32 0.01, %v2040_v20 }
 0x2d7   : > { %v2072_v31 = vadd.f32 1.0, %v2071_v32  ;;  %v2090_v62 = vadd.f32 1.0, %v2089_v9  ;;  %v6700_v39 = vadd.f32 %v6316_v42, %v6617_v38  ;;  %v2219_v58 = vmul.f32 0.01, %v2067_v10 }
 0x2d8   : > { %v2085_v6 = vsel %vm6677_vm5, %v2082_v7, %v2079_v5  ;;  %4818 = vlog2.f32 %v2113_v19  ;;  %v1899_v56 = vmul.f32 1.442695, %v1843_v14  ;;  %v2099_v1 = vadd.f32 1.0, %v2098_v15  ;;  %v6714_v7 = vpop.permute.xlu1 %1469 }
 0x2d9   : > { %8524 = vst [vmem:[#allocation11_spill] sm:$0xff] %v6700_v39  ;;  %v6702_v48 = vpop.eup %4808  ;;  %v2101_v13 = vand.u32 2147483647, %v6653_v8  ;;  %v1812_v20 = vand.u32 2147483647, %v1748_v37  ;;  %v2116_v32 = vmul.f32 -0.5, %v6685_v0  ;;  %v6717_v14 = vmul.f32 %v6631_v35, %v2072_v31 }
 0x2da   : > { %v2104_v44 = vadd.f32 1.0, %v6702_v48  ;;  %v2092_v38 = vand.u32 2147483647, %v6644_v52  ;;  %v1845_v9 = vsub.f32 0.0, %v1813_v33  ;;  %v2221_v5 = vmul.f32 0.01, %v2085_v6 }
 0x2db   : > { %v4811_v45 = vpop.eup %4810  ;;  %v1750_v10 = vmul.f32 100.0, %v6700_v39  ;;  %v8525_v37 = vmax.f32 %v6445_v59, 0.0  ;;  %v6725_v42 = vmul.f32 %v6644_v52, %v2090_v62  ;;  %v6729_v33 = vadd.f32 %v6307_v34, %v6714_v7 }
 0x2dc   : > { %4820 = vlog2.f32 %v2104_v44  ;;  %v2100_v31 = vmul.f32 %v6653_v8, %v2099_v1  ;;  %vm2102_vm6 = vcmp.lt.f32.partialorder %v2101_v13, 0.0004427343  ;;  %v1844_v44 = vsub.f32 0.0, %v1812_v20 }
 0x2dd   : > { %v6722_v19 = vadd.f32 %v2219_v58, %v8525_v37  ;;  %4822 = vpow2.f32 %v1899_v56  ;;  %v2117_v41 = vadd.f32 1.0, %v2116_v32  ;;  %v2107_v59 = vmul.f32 -0.5, %v6702_v48 }
 0x2de   : > { %v4813_v15 = vpop.eup %4812  ;;  %v1903_v52 = vmul.f32 1.442695, %v1845_v9  ;;  %v8526_v62 = vmax.f32 %v6448_v12, 0.0  ;;  %v2119_v37 = vand.u32 2147483647, %v6685_v0  ;;  %v1751_v12 = vmul.f32 100.0, %v6729_v33 }
 0x2df   : > { %v6731_v6 = vpop.eup %4814  ;;  %v2097_v35 = vmul.f32 0.6931472, %v4813_v15  ;;  %v1814_v50 = vand.u32 2147483647, %v1750_v10  ;;  %vm6741_vm7 = vcmp.lt.f32.partialorder %v2074_v29, 0.0004427343  ;;  %v4410_v55 = vpack.c.bf16 %v6534_v26, %v6490_v27 }
 0x2e0   : > { %v4817_v39 = vpop.eup %4816  ;;  %v2122_v58 = vadd.f32 1.0, %v6731_v6  ;;  %v6738_v56 = vadd.f32 %v2221_v5, %v8526_v62  ;;  %vm6745_vm8 = vcmp.lt.f32.partialorder %v2092_v38, 0.0004427343  ;;  %v2110_v13 = vand.u32 2147483647, %v6702_v48 }
 0x2e1   : > { %v2103_v34 = vsel %vm2102_vm6, %v2100_v31, %v2097_v35  ;;  %v2070_v20 = vmul.f32 0.6931472, %v4811_v45  ;;  %v2088_v32 = vmul.f32 0.6931472, %v4817_v39  ;;  %v1901_v9 = vmul.f32 1.442695, %v1844_v44  ;;  %4411 = vmatprep.subr.bf16.mxu1 %v4410_v55 }
 0x2e2   : > { %v2223_v1 = vmul.f32 0.01, %v2103_v34  ;;  %4824 = vlog2.f32 %v2122_v58  ;;  %v6753_v5 = vadd.f32 %v6334_v53, %v6714_v7  ;;  %v4819_v29 = vpop.eup %4818  ;;  %v8531_v10 = vmax.f32 %v6530_v40, 0.0 }
 0x2e3   : > { %v2118_v35 = vmul.f32 %v6685_v0, %v2117_v41  ;;  %v2108_v31 = vadd.f32 1.0, %v2107_v59  ;;  %4826 = vpow2.f32 %v1903_v52  ;;  %v2115_v62 = vmul.f32 0.6931472, %v4819_v29 }
 0x2e4   : > { %v6757_v38 = vadd.f32 %v2223_v1, %v8531_v10  ;;  %v2125_v58 = vmul.f32 -0.5, %v6731_v6  ;;  %v1846_v34 = vsub.f32 0.0, %v1814_v50  ;;  %v6763_v39 = vadd.f32 %v6318_v28, %v6714_v7 }
 0x2e5   : > { %vm2120_vm9 = vcmp.lt.f32.partialorder %v2119_v37, 0.0004427343  ;;  %vm6767_vm10 = vcmp.lt.f32.partialorder %v2110_v13, 0.0004427343  ;;  %v1815_v45 = vand.u32 2147483647, %v1751_v12  ;;  %4828 = vpow2.f32 %v1901_v9 }
 0x2e6   : > { %v4821_v41 = vpop.eup %4820  ;;  %v2121_v0 = vsel %vm2120_vm9, %v2118_v35, %v2115_v62  ;;  %v2128_v44 = vand.u32 2147483647, %v6731_v6  ;;  %v1753_v50 = vmul.f32 100.0, %v6753_v5  ;;  %v2109_v1 = vmul.f32 %v6702_v48, %v2108_v31 }
 0x2e7   : > { %v6773_v59 = vpop.eup %4822  ;;  %v2225_v28 = vmul.f32 0.01, %v2121_v0  ;;  %v2106_v52 = vmul.f32 0.6931472, %v4821_v41  ;;  %v1847_v29 = vsub.f32 0.0, %v1815_v45  ;;  %v2126_v37 = vadd.f32 1.0, %v2125_v58 }
 0x2e8   : > { %v1905_v13 = vmul.f32 1.442695, %v1846_v34  ;;  %v1817_v10 = vand.u32 2147483647, %v1753_v50  ;;  %v1752_v53 = vmul.f32 100.0, %v6763_v39  ;;  %v8534_v12 = vmax.f32 %v6552_v11, 0.0 }
 0x2e9   : > { %v2112_v9 = vsel %vm6767_vm10, %v2109_v1, %v2106_v52  ;;  %v1907_v62 = vmul.f32 1.442695, %v1847_v29  ;;  %v4394_v0 = vpack.c.bf16 %v6500_v30, %v6480_v46  ;;  %v2076_v48 = vsel %vm6741_vm7, %v6717_v14, %v2070_v20  ;;  %v8535_v11 = vld [vmem:[#allocation8_spill] sm:$0xff] }
 0x2ea   : > { %v6779_v35 = vadd.f32 %v2225_v28, %v8534_v12  ;;  %v2094_v31 = vsel %vm6745_vm8, %v6725_v42, %v2088_v32  ;;  %v2131_v58 = vadd.f32 1.0, %v6773_v59  ;;  %v6794_v34 = vadd.f32 %v8535_v11, %v6714_v7 }
 0x2eb   : > { %4830 = vpow2.f32 %v1907_v62  ;;  %v1849_v46 = vsub.f32 0.0, %v1817_v10  ;;  %v1816_v30 = vand.u32 2147483647, %v1752_v53  ;;  %4395 = vmatprep.subr.bf16.mxu0 %v4394_v0  ;;  %v8536_v14 = vsel %vm6666_vm4, %v6656_v63, %v6692_v2 }
 0x2ec   : > { %v4825_v40 = vpop.eup %4824  ;;  %v4420_v45 = vpack.c.bf16 %v6779_v35, %v6738_v56  ;;  %v2218_v42 = vmul.f32 0.01, %v8536_v14  ;;  %v2224_v15 = vmul.f32 0.01, %v2112_v9  ;;  %v2127_v20 = vmul.f32 %v6731_v6, %v2126_v37 }
 0x2ed   : > { %v2124_v8 = vmul.f32 0.6931472, %v4825_v40  ;;  %v8537_v7 = vpack.c.bf16 %v6397_v21, %v6393_v43  ;;  %v6807_v32 = vpop.eup %4826  ;;  %vm2129_vm11 = vcmp.lt.f32.partialorder %v2128_v44, 0.0004427343  ;;  %4832 = vpow2.f32 %v1905_v13 }
 0x2ee   : > { %v1911_v53 = vmul.f32 1.442695, %v1849_v46  ;;  %v2220_v41 = vmul.f32 0.01, %v2076_v48  ;;  %v2222_v50 = vmul.f32 0.01, %v2094_v31  ;;  %4834 = vlog2.f32 %v2131_v58 }
 0x2ef   : > { %4397 = vmatpush1.bf16.msra.mxu0 %v8537_v7  ;;  %v2130_v2 = vsel %vm2129_vm11, %v2127_v20, %v2124_v8  ;;  %v1848_v63 = vsub.f32 0.0, %v1816_v30  ;;  %v1778_v28 = vmax.f32 %v6606_v4, 0.0  ;;  %v1754_v6 = vmul.f32 100.0, %v6794_v34  ;;  %v6813_v43 = vpop.eup %4828 }
 0x2f0   : > { %v2226_v52 = vmul.f32 0.01, %v2130_v2  ;;  %v8538_v21 = vmax.f32 %v6441_v61, 0.0  ;;  %v8539_v1 = vmax.f32 %v6456_v36, 0.0  ;;  %v8540_v26 = vmax.f32 %v6578_v60, 0.0  ;;  %v8549_v2 = vld [vmem:[#allocation9_spill] sm:$0xff] }
 0x2f1   : > { %4836 = vpow2.f32 %v1911_v53  ;;  %v8541_v4 = vpack.c.bf16 %v6412_v3, %v6406_v57  ;;  %v2149_v13 = vadd.f32 1.0, %v6807_v32  ;;  %v1909_v10 = vmul.f32 1.442695, %v1848_v63 }
 0x2f2   : > { %v2248_v44 = vadd.f32 %v6696_v47, %v8538_v21  ;;  %v2250_v27 = vadd.f32 %v2218_v42, %v8539_v1  ;;  %v2256_v29 = vadd.f32 %v2224_v15, %v8540_v26  ;;  %v2258_v37 = vadd.f32 %v2226_v52, %v1778_v28  ;;  %v8552_v52 = vld [vmem:[#allocation7_spill] sm:$0xff] }
 0x2f3   : > { %4413 = vmatpush1.bf16.msra.mxu1 %v8541_v4  ;;  %v8542_v12 = vmax.f32 %v6314_v22, 0.0  ;;  %v8543_v47 = vmax.f32 %v6323_v51, 0.0  ;;  %v8544_v60 = vmax.f32 %v6503_v18, 0.0  ;;  %v8545_v62 = vmax.f32 %v6509_v25, 0.0 }
 0x2f4   : > { %v2140_v57 = vadd.f32 1.0, %v6813_v43  ;;  %4838 = vpow2.f32 %v1909_v10  ;;  %v1818_v3 = vand.u32 2147483647, %v1754_v6  ;;  %v2134_v51 = vmul.f32 -0.5, %v6773_v59 }
 0x2f5   : > { %v2244_v61 = vadd.f32 %v6621_v24, %v8542_v12  ;;  %v2246_v36 = vadd.f32 %v6633_v16, %v8543_v47  ;;  %v2252_v9 = vadd.f32 %v2220_v41, %v8544_v60  ;;  %v2254_v0 = vadd.f32 %v2222_v50, %v8545_v62  ;;  %v4831_v11 = vpop.eup %4830 }
 0x2f6   : > { %4840 = vlog2.f32 %v2149_v13  ;;  %v1850_v24 = vsub.f32 0.0, %v1818_v3  ;;  %v2167_v16 = vadd.f32 1.0, %v4831_v11  ;;  %v8546_v40 = vpack.c.bf16 %v6571_v23, %v6560_v49 }
 0x2f7   : > { %v4398_v48 = vpack.c.bf16 %v2248_v44, %v2244_v61  ;;  %v4414_v31 = vpack.c.bf16 %v2250_v27, %v2246_v36  ;;  %v4402_v58 = vpack.c.bf16 %v2256_v29, %v2252_v9  ;;  %v4418_v22 = vpack.c.bf16 %v2258_v37, %v2254_v0  ;;  %v6838_v18 = vpop.eup %4832  ;;  %v8553_v44 = vld [vmem:[#allocation10_spill] sm:$0xff] }
 0x2f8   : > { %4842 = vlog2.f32 %v2140_v57  ;;  %v1913_v25 = vmul.f32 1.442695, %v1850_v24  ;;  %v8547_v46 = vpack.c.bf16 %v6597_v54, %v6591_v17  ;;  %v4835_v30 = vpop.eup %4834  ;;  %v2135_v42 = vadd.f32 1.0, %v2134_v51 }
 0x2f9   : > { %4399 = vmatprep.subr.bf16.mxu0 %v4398_v48  ;;  %4415 = vmatprep.subr.bf16.mxu1 %v4414_v31  ;;  %4844 = vlog2.f32 %v2167_v16  ;;  %v2158_v15 = vadd.f32 1.0, %v6838_v18  ;;  %v2137_v8 = vand.u32 2147483647, %v6773_v59  ;;  %v2152_v20 = vmul.f32 -0.5, %v6807_v32 }
 0x2fa   : > { %4401 = vmatpush1.bf16.msra.mxu0 %v8546_v40  ;;  %4417 = vmatpush1.bf16.msra.mxu1 %v8547_v46  ;;  %4846 = vpow2.f32 %v1913_v25  ;;  %v2170_v49 = vmul.f32 -0.5, %v4831_v11  ;;  %v8548_v17 = vpack.c.bf16 %v6757_v38, %v6722_v19  ;;  %v2133_v54 = vmul.f32 0.6931472, %v4835_v30 }
 0x2fb   : > { %4403 = vmatprep.subr.bf16.mxu0 %v4402_v58  ;;  %4419 = vmatprep.subr.bf16.mxu1 %v4418_v22  ;;  %v6846_v14 = vpop.eup %4836  ;;  %v2136_v53 = vmul.f32 %v6773_v59, %v2135_v42  ;;  %v2143_v55 = vmul.f32 -0.5, %v6813_v43  ;;  %v1779_v63 = vmax.f32 %v8549_v2, 0.0  ;;  %vm6864_vm12 = vcmp.lt.f32.partialorder %v2137_v8, 0.0004427343 }
 0x2fc   : > { %v2185_v23 = vadd.f32 1.0, %v6846_v14  ;;  %v2153_v56 = vadd.f32 1.0, %v2152_v20  ;;  %v2171_v38 = vadd.f32 1.0, %v2170_v49  ;;  %v2188_v59 = vmul.f32 -0.5, %v6846_v14 }
 0x2fd   : > { %v2139_v35 = vsel %vm6864_vm12, %v2136_v53, %v2133_v54  ;;  %v1781_v6 = vmax.f32 %v8552_v52, 0.0  ;;  %v2155_v21 = vand.u32 2147483647, %v6807_v32  ;;  %v1780_v1 = vmax.f32 %v8553_v44, 0.0 }
 0x2fe   : > { %4405 = vmatpush1.bf16.msra.mxu0 %v8548_v17  ;;  %4421 = vmatpush1.bf16.msra.mxu1 %v4420_v45  ;;  %v6858_v7 = vpop.eup %4838  ;;  %4848 = vlog2.f32 %v2185_v23  ;;  %v2173_v45 = vand.u32 2147483647, %v4831_v11  ;;  %v1783_v27 = vmax.f32 %v6729_v33, 0.0  ;;  %v2144_v4 = vadd.f32 1.0, %v2143_v55  ;;  %v2286_v33 = vpop.permute.xlu0 %2285 }
 0x2ff   : > { %4850 = vlog2.f32 %v2158_v15  ;;  %v2176_v41 = vadd.f32 1.0, %v6858_v7  ;;  %v2146_v37 = vand.u32 2147483647, %v6813_v43  ;;  %v2161_v13 = vmul.f32 -0.5, %v6838_v18 }
 0x300   : > { %v4841_v50 = vpop.eup %4840  ;;  %v2227_v12 = vmul.f32 0.01, %v2139_v35  ;;  %v2172_v47 = vmul.f32 %v4831_v11, %v2171_v38  ;;  %v2179_v36 = vmul.f32 -0.5, %v6858_v7  ;;  %v2154_v60 = vmul.f32 %v6807_v32, %v2153_v56 }
 0x301   : > { %4852 = vlog2.f32 %v2176_v41  ;;  %v2151_v29 = vmul.f32 0.6931472, %v4841_v50  ;;  %vm2174_vm13 = vcmp.lt.f32.partialorder %v2173_v45, 0.0004427343  ;;  %v2189_v9 = vadd.f32 1.0, %v2188_v59 }
 0x302   : > { %v4843_v28 = vpop.eup %4842  ;;  %vm6879_vm14 = vcmp.lt.f32.partialorder %v2155_v21, 0.0004427343  ;;  %v2191_v3 = vand.u32 2147483647, %v6846_v14  ;;  %vm6886_vm15 = vcmp.lt.f32.partialorder %v2146_v37, 0.0004427343  ;;  %v2259_v22 = vadd.f32 %v2227_v12, %v1779_v63 }
 0x303   : > { %v4845_v26 = vpop.eup %4844  ;;  %v2142_v0 = vmul.f32 0.6931472, %v4843_v28  ;;  %v2157_v48 = vsel %vm6879_vm14, %v2154_v60, %v2151_v29  ;;  %v2145_v11 = vmul.f32 %v6813_v43, %v2144_v4  ;;  %v2162_v24 = vadd.f32 1.0, %v2161_v13  ;;  %v2267_v37 = vld [vmem:[%s8378_s5] sm:$0xff]  ;;  %v2272_v60 = vld [vmem:[%s8378_s5 + $0x28] sm:$0xff] }
 0x304   : > { %v4847_v10 = vpop.eup %4846  ;;  %v2169_v61 = vmul.f32 0.6931472, %v4845_v26  ;;  %v2180_v51 = vadd.f32 1.0, %v2179_v36  ;;  %v2190_v46 = vmul.f32 %v6846_v14, %v2189_v9  ;;  %v2182_v30 = vand.u32 2147483647, %v6858_v7  ;;  %v2271_v36 = vld [vmem:[%s8378_s5 + $0x20] sm:$0xff] }
 0x305   : > { %v2194_v62 = vadd.f32 1.0, %v4847_v10  ;;  %v2229_v42 = vmul.f32 0.01, %v2157_v48  ;;  %v2148_v15 = vsel %vm6886_vm15, %v2145_v11, %v2142_v0  ;;  %vm2192_vm0 = vcmp.lt.f32.partialorder %v2191_v3, 0.0004427343  ;;  %v2273_v9 = vld [vmem:[%s8378_s5 + $0x30] sm:$0xff] }
 0x306   : > { %v2175_v57 = vsel %vm2174_vm13, %v2172_v47, %v2169_v61  ;;  %v2197_v8 = vmul.f32 -0.5, %v4847_v10  ;;  %v2164_v49 = vand.u32 2147483647, %v6838_v18  ;;  %v1785_v43 = vmax.f32 %v6753_v5, 0.0  ;;  %v2268_v61 = vld [vmem:[%s8378_s5 + $0x8] sm:$0xff]  ;;  %v2270_v47 = vld [vmem:[%s8378_s5 + $0x18] sm:$0xff] }
 0x307   : > { %v2231_v58 = vmul.f32 0.01, %v2175_v57  ;;  %4854 = vlog2.f32 %v2194_v62  ;;  %v2181_v14 = vmul.f32 %v6858_v7, %v2180_v51  ;;  %v2228_v41 = vmul.f32 0.01, %v2148_v15  ;;  %v2274_v62 = vld [vmem:[%s8378_s5 + $0x38] sm:$0xff] }
 0x308   : > { %v4849_v32 = vpop.eup %4848  ;;  %v2163_v50 = vmul.f32 %v6838_v18, %v2162_v24  ;;  %v1784_v2 = vmax.f32 %v6763_v39, 0.0  ;;  %vm2183_vm1 = vcmp.lt.f32.partialorder %v2182_v30, 0.0004427343  ;;  %v2261_v63 = vadd.f32 %v2229_v42, %v1781_v6  ;;  %v8558_v39 = vld [vmem:[#allocation11_spill] sm:$0xff] }
 0x309   : > { %v4851_v16 = vpop.eup %4850  ;;  %v2263_v25 = vadd.f32 %v2231_v58, %v1783_v27  ;;  %v2187_v40 = vmul.f32 0.6931472, %v4849_v32  ;;  %v2198_v38 = vadd.f32 1.0, %v2197_v8  ;;  %vm2165_vm3 = vcmp.lt.f32.partialorder %v2164_v49, 0.0004427343  ;;  %v2291_v58 = vpop.permute.xlu1 %2290 }
 0x30a   : > { %v2160_v54 = vmul.f32 0.6931472, %v4851_v16  ;;  %v2200_v45 = vand.u32 2147483647, %v4847_v10  ;;  %v2260_v52 = vadd.f32 %v2228_v41, %v1780_v1  ;;  %v1782_v29 = vmax.f32 %v8558_v39, 0.0 }
 0x30b   : > { %v4853_v20 = vpop.eup %4852  ;;  %v4408_v23 = vpack.c.bf16 %v2263_v25, %v2259_v22  ;;  %v2193_v17 = vsel %vm2192_vm0, %v2190_v46, %v2187_v40  ;;  %v2199_v7 = vmul.f32 %v4847_v10, %v2198_v38  ;;  %v1786_v6 = vmax.f32 %v6794_v34, 0.0  ;;  %v2269_v34 = vld [vmem:[%s8378_s5 + $0x10] sm:$0xff] }
 0x30c   : > { %v2233_v53 = vmul.f32 0.01, %v2193_v17  ;;  %v2178_v55 = vmul.f32 0.6931472, %v4853_v20  ;;  %v2166_v5 = vsel %vm2165_vm3, %v2163_v50, %v2160_v54  ;;  %vm2201_vm4 = vcmp.lt.f32.partialorder %v2200_v45, 0.0004427343 }
 0x30d   : > { %v2230_v27 = vmul.f32 0.01, %v2166_v5  ;;  %v8559_v10 = vmov 0.0  }
 0x30e   : > { %v2265_v19 = vadd.f32 %v2233_v53, %v1785_v43  ;;  %v2184_v56 = vsel %vm2183_vm1, %v2181_v14, %v2178_v55 }
 0x30f   : > { %v2232_v35 = vmul.f32 0.01, %v2184_v56  ;;  %v2262_v13 = vadd.f32 %v2230_v27, %v1782_v29 }
 0x310   : > { %v4424_v59 = vpack.c.bf16 %v2265_v19, %v2261_v63  ;;  %v6978_v63 = vpop.permute.xlu0 %2295 }
 0x311   : > { %v4855_v28 = vpop.eup %4854  ;;  %v2264_v21 = vadd.f32 %v2232_v35, %v1784_v2 }
 0x312   : > { %v2196_v44 = vmul.f32 0.6931472, %v4855_v28 }
 0x313   : > { %v4406_v18 = vpack.c.bf16 %v2264_v21, %v2260_v52 }
 0x314   : > { %v2202_v26 = vsel %vm2201_vm4, %v2199_v7, %v2196_v44 }
 0x315   : > { %v2234_v4 = vmul.f32 0.01, %v2202_v26  ;;  %4407 = vmatprep.subr.bf16.mxu0 %v4406_v18 }
 0x316   : > { %4409 = vmatpush1.bf16.msra.mxu0 %v4408_v23 }
 0x317   : > { %v2266_v1 = vadd.f32 %v2234_v4, %v1786_v6 }
 0x319   : > { %v4422_v12 = vpack.c.bf16 %v2266_v1, %v2262_v13  ;;  %4322 = vmatmul.mubr.msk.f32.vlgmr.msra.gmra.mrb[16].mxu0 %vm1472_vm2, %v2267_v37 }
 0x31a   : > { %2417 = vmatprep.mubr.f32.mxu0 %v8559_v10 }
 0x31b   : > { %4423 = vmatprep.subr.bf16.mxu1 %v4422_v12 }
 0x31c   : > { %4425 = vmatpush1.bf16.msra.mxu1 %v4424_v59 }
 0x31d   : > { %4323 = vmatmul.mubr.msk.f32.gmra.mrb[18].mxu0 %vm1472_vm2, %v2268_v61 }
 0x31e   : > { %2423 = vmatprep.mubr.f32.mxu0 %v8559_v10 }
 0x31f   : > { %4330 = vmatmul.mubr.msk.f32.vlgmr.msra.gmra.mrb[16].mxu1 %vm1472_vm2, %v2267_v37 }
 0x320   : > { %2530 = vmatprep.mubr.f32.mxu1 %v8559_v10 }
 0x321   : > { %4324 = vmatmul.mubr.msk.f32.gmra.mrb[20].mxu0 %vm1472_vm2, %v2269_v34 }
 0x322   : > { %2429 = vmatprep.mubr.f32.mxu0 %v8559_v10 }
 0x323   : > { %4331 = vmatmul.mubr.msk.f32.gmra.mrb[18].mxu1 %vm1472_vm2, %v2268_v61 }
 0x324   : > { %2536 = vmatprep.mubr.f32.mxu1 %v8559_v10 }
 0x325   : > { %4325 = vmatmul.mubr.msk.f32.gmra.mrb[22].mxu0 %vm1472_vm2, %v2270_v47 }
 0x326   : > { %2435 = vmatprep.mubr.f32.mxu0 %v8559_v10 }
 0x327   : > { %4332 = vmatmul.mubr.msk.f32.gmra.mrb[20].mxu1 %vm1472_vm2, %v2269_v34 }
 0x328   : > { %2542 = vmatprep.mubr.f32.mxu1 %v8559_v10 }
 0x329   : > { %4326 = vmatmul.mubr.msk.f32.gmra.mrb[24].mxu0 %vm1472_vm2, %v2271_v36 }
 0x32a   : > { %2441 = vmatprep.mubr.f32.mxu0 %v8559_v10 }
 0x32b   : > { %4333 = vmatmul.mubr.msk.f32.gmra.mrb[22].mxu1 %vm1472_vm2, %v2270_v47 }
 0x32c   : > { %2548 = vmatprep.mubr.f32.mxu1 %v8559_v10 }
 0x32d   : > { %4327 = vmatmul.mubr.msk.f32.gmra.mrb[26].mxu0 %vm1472_vm2, %v2272_v60 }
 0x32e   : > { %2447 = vmatprep.mubr.f32.mxu0 %v8559_v10 }
 0x32f   : > { %4334 = vmatmul.mubr.msk.f32.gmra.mrb[24].mxu1 %vm1472_vm2, %v2271_v36 }
 0x330   : > { %2554 = vmatprep.mubr.f32.mxu1 %v8559_v10 }
 0x331   : > { %4328 = vmatmul.mubr.msk.f32.gmra.mrb[28].mxu0 %vm1472_vm2, %v2273_v9 }
 0x332   : > { %2453 = vmatprep.mubr.f32.mxu0 %v8559_v10 }
 0x333   : > { %4335 = vmatmul.mubr.msk.f32.gmra.mrb[26].mxu1 %vm1472_vm2, %v2272_v60 }
 0x334   : > { %2560 = vmatprep.mubr.f32.mxu1 %v8559_v10 }
 0x335   : > { %4329 = vmatmul.mubr.msk.f32.gmra.mrb[30].mxu0 %vm1472_vm2, %v2274_v62 }
 0x336   : > { %3293 = vmatprep.mubr.f32.mxu0 %v8559_v10 }
 0x337   : > { %4336 = vmatmul.mubr.msk.f32.gmra.mrb[28].mxu1 %vm1472_vm2, %v2273_v9 }
 0x338   : > { %2566 = vmatprep.mubr.f32.mxu1 %v8559_v10 }
 0x33b   : > { %4337 = vmatmul.mubr.msk.f32.gmra.mrb[30].mxu1 %vm1472_vm2, %v2274_v62 }
 0x33c   : > { %3406 = vmatprep.mubr.f32.mxu1 %v8559_v10 }
 0x3ec   : > { %v2413_v0 = vpop.f32.mrb[16].mxu0 }
 0x3ed   : > { %v6958_v57 = vadd.f32 %v2413_v0, %v2286_v33  ;;  %v2415_v3 = vpop.f32.mrb[17].mxu0 }
 0x3ee   : > { %v6960_v48 = vadd.f32 %v2415_v3, %v2286_v33 }
 0x3ef   : > { %v2605_v31 = vmul.f32 100.0, %v6958_v57 }
 0x3f0   : > { %v2606_v32 = vmul.f32 100.0, %v6960_v48  ;;  %v2419_v22 = vpop.f32.mrb[18].mxu0 }
 0x3f1   : > { %v2669_v11 = vand.u32 2147483647, %v2605_v31  ;;  %v6964_v24 = vadd.f32 %v2419_v22, %v2291_v58  ;;  %v2421_v51 = vpop.f32.mrb[19].mxu0 }
 0x3f2   : > { %v2526_v16 = vpop.f32.mrb[16].mxu1  ;;  %v6966_v25 = vadd.f32 %v2421_v51, %v2291_v58  ;;  %v2670_v15 = vand.u32 2147483647, %v2606_v32 }
 0x3f3   : > { %v2701_v40 = vsub.f32 0.0, %v2669_v11  ;;  %v6968_v46 = vadd.f32 %v2526_v16, %v2286_v33  ;;  %v2528_v30 = vpop.f32.mrb[17].mxu1  ;;  %v2609_v42 = vmul.f32 100.0, %v6964_v24 }
 0x3f4   : > { %v6971_v8 = vadd.f32 %v2528_v30, %v2286_v33  ;;  %v2425_v20 = vpop.f32.mrb[20].mxu0  ;;  %v2610_v53 = vmul.f32 100.0, %v6966_v25  ;;  %v2702_v19 = vsub.f32 0.0, %v2670_v15 }
 0x3f5   : > { %v2733_v49 = vmul.f32 1.442695, %v2701_v40  ;;  %v2607_v23 = vmul.f32 100.0, %v6968_v46  ;;  %v2673_v43 = vand.u32 2147483647, %v2609_v42  ;;  %v2427_v55 = vpop.f32.mrb[21].mxu0  ;;  %v6986_v59 = vadd.f32 %v2425_v20, %v6978_v63 }
 0x3f6   : > { %v2608_v17 = vmul.f32 100.0, %v6971_v8  ;;  %v2532_v54 = vpop.f32.mrb[18].mxu1  ;;  %v2674_v21 = vand.u32 2147483647, %v2610_v53  ;;  %v2735_v39 = vmul.f32 1.442695, %v2702_v19  ;;  %v7025_v20 = vadd.f32 %v2427_v55, %v6978_v63 }
 0x3f7   : > { %4856 = vpow2.f32 %v2733_v49  ;;  %v2671_v14 = vand.u32 2147483647, %v2607_v23  ;;  %v2705_v41 = vsub.f32 0.0, %v2673_v43  ;;  %v6976_v50 = vadd.f32 %v2532_v54, %v2291_v58  ;;  %v2534_v2 = vpop.f32.mrb[19].mxu1 }
 0x3f8   : > { %v6980_v56 = vadd.f32 %v2534_v2, %v2291_v58  ;;  %v6982_v38 = vpop.f32.mrb[22].mxu0  ;;  %v2672_v52 = vand.u32 2147483647, %v2608_v17  ;;  %v2613_v4 = vmul.f32 100.0, %v6986_v59  ;;  %v2706_v34 = vsub.f32 0.0, %v2674_v21 }
 0x3f9   : > { %v2703_v35 = vsub.f32 0.0, %v2671_v14  ;;  %v2741_v45 = vmul.f32 1.442695, %v2705_v41  ;;  %v2611_v5 = vmul.f32 100.0, %v6976_v50  ;;  %v6988_v28 = vpop.f32.mrb[23].mxu0  ;;  %v2614_v21 = vmul.f32 100.0, %v7025_v20 }
 0x3fa   : > { %v2612_v44 = vmul.f32 100.0, %v6980_v56  ;;  %v2538_v7 = vpop.f32.mrb[20].mxu1  ;;  %v2704_v13 = vsub.f32 0.0, %v2672_v52  ;;  %v2677_v62 = vand.u32 2147483647, %v2613_v4 }
 0x3fb   : > { %v2737_v27 = vmul.f32 1.442695, %v2703_v35  ;;  %4858 = vpow2.f32 %v2741_v45  ;;  %v2675_v18 = vand.u32 2147483647, %v2611_v5  ;;  %v6991_v26 = vpop.f32.mrb[21].mxu1  ;;  %v7007_v33 = vadd.f32 %v2538_v7, %v6978_v63 }
 0x3fc   : > { %v2676_v6 = vand.u32 2147483647, %v2612_v44  ;;  %v6994_v37 = vpop.f32.mrb[24].mxu0  ;;  %v2739_v31 = vmul.f32 1.442695, %v2704_v13  ;;  %v2709_v40 = vsub.f32 0.0, %v2677_v62 }
 0x3fd   : > { %4860 = vpow2.f32 %v2737_v27  ;;  %v2707_v29 = vsub.f32 0.0, %v2675_v18  ;;  %v6998_v12 = vpop.f32.mrb[25].mxu0  ;;  %v2743_v32 = vmul.f32 1.442695, %v2706_v34  ;;  %v2615_v30 = vmul.f32 100.0, %v7007_v33 }
 0x3fe   : > { %v6996_v1 = vpop.f32.mrb[22].mxu1  ;;  %4862 = vpow2.f32 %v2735_v39  ;;  %v2708_v9 = vsub.f32 0.0, %v2676_v6  ;;  %v2749_v2 = vmul.f32 1.442695, %v2709_v40  ;;  %v7065_v40 = vadd.f32 %v6991_v26, %v6978_v63 }
 0x3ff   : > { %v2745_v61 = vmul.f32 1.442695, %v2707_v29  ;;  %v7000_v47 = vpop.f32.mrb[23].mxu1  ;;  %v2679_v19 = vand.u32 2147483647, %v2615_v30 }
 0x400   : > { %v7002_v36 = vpop.f32.mrb[26].mxu0  ;;  %v2747_v16 = vmul.f32 1.442695, %v2708_v9 }
 0x401   : > { %v7004_v60 = vpop.eup %4856  ;;  %4864 = vpow2.f32 %v2745_v61  ;;  %v7009_v0 = vpop.f32.mrb[27].mxu0 }
 0x402   : > { %v2797_v3 = vadd.f32 1.0, %v7004_v60  ;;  %v7012_v58 = vpop.f32.mrb[24].mxu1  ;;  %v2800_v43 = vmul.f32 -0.5, %v7004_v60  ;;  %v2803_v18 = vand.u32 2147483647, %v7004_v60 }
 0x403   : > { %v7014_v22 = vpop.f32.mrb[25].mxu1 }
 0x404   : > { %4866 = vlog2.f32 %v2797_v3  ;;  %v7016_v11 = vpop.f32.mrb[28].mxu0  ;;  %v2801_v27 = vadd.f32 1.0, %v2800_v43  ;;  %v2711_v3 = vsub.f32 0.0, %v2679_v19  ;;  %vm7072_vm5 = vcmp.lt.f32.partialorder %v2803_v18, 0.0004427343 }
 0x405   : > { %v7018_v51 = vpop.eup %4858  ;;  %v7021_v42 = vpop.f32.mrb[29].mxu0  ;;  %4868 = vpow2.f32 %v2739_v31 }
 0x406   : > { %v2833_v15 = vadd.f32 1.0, %v7018_v51  ;;  %v7027_v49 = vpop.f32.mrb[26].mxu1  ;;  %4870 = vpow2.f32 %v2743_v32  ;;  %v2836_v29 = vmul.f32 -0.5, %v7018_v51  ;;  %v2839_v26 = vand.u32 2147483647, %v7018_v51 }
 0x407   : > { %v7029_v23 = vpop.eup %4860  ;;  %v7032_v17 = vpop.f32.mrb[27].mxu1  ;;  %v2753_v18 = vmul.f32 1.442695, %v2711_v3 }
 0x408   : > { %v2815_v53 = vadd.f32 1.0, %v7029_v23  ;;  %4872 = vlog2.f32 %v2833_v15  ;;  %v7037_v41 = vpop.f32.mrb[30].mxu0  ;;  %v7042_v45 = vpop.eup %4862  ;;  %v2818_v4 = vmul.f32 -0.5, %v7029_v23  ;;  %v2837_v19 = vadd.f32 1.0, %v2836_v29 }
 0x409   : > { %4874 = vpow2.f32 %v2747_v16  ;;  %v7040_v35 = vpop.f32.mrb[31].mxu0  ;;  %v2806_v32 = vadd.f32 1.0, %v7042_v45  ;;  %v2678_v16 = vand.u32 2147483647, %v2614_v21  ;;  %v7069_v15 = vpop.permute.xlu1 %2300  ;;  %v2821_v63 = vand.u32 2147483647, %v7029_v23 }
 0x40a   : > { %4876 = vlog2.f32 %v2815_v53  ;;  %v7047_v44 = vpop.f32.mrb[28].mxu1  ;;  %v2802_v53 = vmul.f32 %v7004_v60, %v2801_v27  ;;  %v2819_v21 = vadd.f32 1.0, %v2818_v4  ;;  %v7084_v9 = vadd.f32 %v6982_v38, %v7069_v15 }
 0x40b   : > { %v7049_v7 = vpop.eup %4864  ;;  %v7054_v6 = vpop.f32.mrb[29].mxu1  ;;  %4878 = vpow2.f32 %v2749_v2  ;;  %v2809_v4 = vmul.f32 -0.5, %v7042_v45  ;;  %v2812_v52 = vand.u32 2147483647, %v7042_v45  ;;  %v2710_v39 = vsub.f32 0.0, %v2678_v16 }
 0x40c   : > { %v2851_v61 = vadd.f32 1.0, %v7049_v7  ;;  %v2854_v27 = vmul.f32 -0.5, %v7049_v7  ;;  %v2838_v2 = vmul.f32 %v7018_v51, %v2837_v19  ;;  %v2820_v29 = vmul.f32 %v7029_v23, %v2819_v21 }
 0x40d   : > { %vm7100_vm6 = vcmp.lt.f32.partialorder %v2821_v63, 0.0004427343  ;;  %vm2840_vm7 = vcmp.lt.f32.partialorder %v2839_v26, 0.0004427343  ;;  %v2810_v54 = vadd.f32 1.0, %v2809_v4 }
 0x40e   : > { %v4867_v31 = vpop.eup %4866  ;;  %4880 = vlog2.f32 %v2851_v61  ;;  %v7067_v30 = vpop.f32.mrb[30].mxu1  ;;  %v2855_v55 = vadd.f32 1.0, %v2854_v27  ;;  %v8566_v27 = vmax.f32 %v6964_v24, 0.0  ;;  %v2751_v4 = vmul.f32 1.442695, %v2710_v39 }
 0x40f   : > { %v2799_v43 = vmul.f32 0.6931472, %v4867_v31  ;;  %v7076_v62 = vpop.f32.mrb[31].mxu1  ;;  %v7078_v61 = vpop.eup %4868  ;;  %4882 = vlog2.f32 %v2806_v32  ;;  %vm7130_vm9 = vcmp.lt.f32.partialorder %v2812_v52, 0.0004427343 }
 0x410   : > { %8562 = vst [vmem:[#allocation8_spill] sm:$0xff] %v7076_v62  ;;  %v7086_v31 = vpop.eup %4870  ;;  %v2824_v38 = vadd.f32 1.0, %v7078_v61  ;;  %4884 = vpow2.f32 %v2753_v18 }
 0x411   : > { %v2805_v60 = vsel %vm7072_vm5, %v2802_v53, %v2799_v43  ;;  %v2616_v43 = vmul.f32 100.0, %v7065_v40  ;;  %v2842_v51 = vadd.f32 1.0, %v7086_v31  ;;  %v2845_v24 = vmul.f32 -0.5, %v7086_v31 }
 0x412   : > { %v4873_v34 = vpop.eup %4872  ;;  %v3085_v3 = vmul.f32 0.01, %v2805_v60  ;;  %4886 = vlog2.f32 %v2824_v38 }
 0x413   : > { %v7094_v14 = vpop.eup %4874  ;;  %v2835_v13 = vmul.f32 0.6931472, %v4873_v34  ;;  %v2857_v34 = vand.u32 2147483647, %v7049_v7  ;;  %v2680_v63 = vand.u32 2147483647, %v2616_v43  ;;  %4888 = vlog2.f32 %v2842_v51 }
 0x414   : > { %v4877_v53 = vpop.eup %4876  ;;  %v2860_v21 = vadd.f32 1.0, %v7094_v14 }
 0x415   : > { %v2817_v5 = vmul.f32 0.6931472, %v4877_v53  ;;  %v2841_v16 = vsel %vm2840_vm7, %v2838_v2, %v2835_v13  ;;  %v7106_v19 = vpop.eup %4878  ;;  %v8565_v13 = vmax.f32 %v6958_v57, 0.0  ;;  %v2617_v2 = vmul.f32 100.0, %v7084_v9 }
 0x416   : > { %v3089_v10 = vmul.f32 0.01, %v2841_v16  ;;  %v2827_v53 = vmul.f32 -0.5, %v7078_v61  ;;  %vm2858_vm8 = vcmp.lt.f32.partialorder %v2857_v34, 0.0004427343  ;;  %4890 = vlog2.f32 %v2860_v21 }
 0x417   : > { %v2823_v23 = vsel %vm7100_vm6, %v2820_v29, %v2817_v5  ;;  %v7113_v60 = vadd.f32 %v3085_v3, %v8565_v13  ;;  %v2856_v5 = vmul.f32 %v7049_v7, %v2855_v55  ;;  %v2712_v29 = vsub.f32 0.0, %v2680_v63 }
 0x418   : > { %v4881_v26 = vpop.eup %4880  ;;  %v7117_v18 = vadd.f32 %v3089_v10, %v8566_v27  ;;  %v3087_v38 = vmul.f32 0.01, %v2823_v23  ;;  %v2869_v10 = vadd.f32 1.0, %v7106_v19  ;;  %4892 = vpow2.f32 %v2751_v4 }
 0x419   : > { %v2853_v32 = vmul.f32 0.6931472, %v4881_v26  ;;  %v4883_v39 = vpop.eup %4882  ;;  %v2681_v16 = vand.u32 2147483647, %v2617_v2  ;;  %v7128_v55 = vadd.f32 %v6996_v1, %v7069_v15  ;;  %v2830_v34 = vand.u32 2147483647, %v7078_v61 }
 0x41a   : > { %v2755_v51 = vmul.f32 1.442695, %v2712_v29  ;;  %v7137_v23 = vadd.f32 %v6988_v28, %v7069_v15  ;;  %v8569_v21 = vmax.f32 %v6968_v46, 0.0  ;;  %v2828_v26 = vadd.f32 1.0, %v2827_v53  ;;  %v7147_v27 = vpop.eup %4884 }
 0x41b   : > { %v2859_v57 = vsel %vm2858_vm8, %v2856_v5, %v2853_v32  ;;  %v8570_v13 = vmax.f32 %v6976_v50, 0.0  ;;  %v2713_v52 = vsub.f32 0.0, %v2681_v16  ;;  %v2808_v4 = vmul.f32 0.6931472, %v4883_v39 }
 0x41c   : > { %v3091_v3 = vmul.f32 0.01, %v2859_v57  ;;  %v7141_v63 = vadd.f32 %v3087_v38, %v8569_v21  ;;  %4894 = vlog2.f32 %v2869_v10  ;;  %v2619_v2 = vmul.f32 100.0, %v7128_v55  ;;  %v4887_v50 = vpop.eup %4886 }
 0x41d   : > { %v2618_v32 = vmul.f32 100.0, %v7137_v23  ;;  %v2811_v28 = vmul.f32 %v7042_v45, %v2810_v54  ;;  %v2846_v5 = vadd.f32 1.0, %v2845_v24  ;;  %v2848_v53 = vand.u32 2147483647, %v7086_v31  ;;  %v4889_v21 = vpop.eup %4888 }
 0x41e   : > { %v7145_v1 = vadd.f32 %v3091_v3, %v8570_v13  ;;  %v2863_v29 = vmul.f32 -0.5, %v7094_v14  ;;  %v2872_v38 = vmul.f32 -0.5, %v7106_v19  ;;  %v2887_v57 = vadd.f32 1.0, %v7147_v27 }
 0x41f   : > { %4896 = vpow2.f32 %v2755_v51  ;;  %v2757_v10 = vmul.f32 1.442695, %v2713_v52  ;;  %v2683_v39 = vand.u32 2147483647, %v2619_v2  ;;  %v2682_v3 = vand.u32 2147483647, %v2618_v32 }
 0x420   : > { %v2814_v54 = vsel %vm7130_vm9, %v2811_v28, %v2808_v4  ;;  %v2829_v45 = vmul.f32 %v7078_v61, %v2828_v26  ;;  %vm7161_vm10 = vcmp.lt.f32.partialorder %v2830_v34, 0.0004427343  ;;  %v7167_v16 = vadd.f32 %v7000_v47, %v7069_v15  ;;  %v4891_v7 = vpop.eup %4890  ;;  %v2306_v47 = vpop.permute.xlu0 %2305 }
 0x421   : > { %v2826_v13 = vmul.f32 0.6931472, %v4887_v50  ;;  %vm7169_vm11 = vcmp.lt.f32.partialorder %v2848_v53, 0.0004427343  ;;  %v2866_v52 = vand.u32 2147483647, %v7094_v14  ;;  %4898 = vpow2.f32 %v2757_v10 }
 0x422   : > { %v2847_v61 = vmul.f32 %v7086_v31, %v2846_v5  ;;  %v2864_v34 = vadd.f32 1.0, %v2863_v29  ;;  %v2715_v26 = vsub.f32 0.0, %v2683_v39  ;;  %v2620_v4 = vmul.f32 100.0, %v7167_v16  ;;  %v7176_v2 = vpop.eup %4892 }
 0x423   : > { %v3086_v15 = vmul.f32 0.01, %v2814_v54  ;;  %v2873_v32 = vadd.f32 1.0, %v2872_v38  ;;  %4900 = vlog2.f32 %v2887_v57  ;;  %v2714_v28 = vsub.f32 0.0, %v2682_v3 }
 0x424   : > { %v2844_v53 = vmul.f32 0.6931472, %v4889_v21  ;;  %v2761_v50 = vmul.f32 1.442695, %v2715_v26  ;;  %v2684_v46 = vand.u32 2147483647, %v2620_v4  ;;  %v7179_v43 = vadd.f32 %v6994_v37, %v2306_v47 }
 0x425   : > { %v2832_v31 = vsel %vm7161_vm10, %v2829_v45, %v2826_v13  ;;  %v2862_v5 = vmul.f32 0.6931472, %v4891_v7  ;;  %vm7183_vm12 = vcmp.lt.f32.partialorder %v2866_v52, 0.0004427343  ;;  %v2875_v10 = vand.u32 2147483647, %v7106_v19 }
 0x426   : > { %v4895_v39 = vpop.eup %4894  ;;  %v2878_v38 = vadd.f32 1.0, %v7176_v2  ;;  %4902 = vpow2.f32 %v2761_v50  ;;  %v2716_v57 = vsub.f32 0.0, %v2684_v46  ;;  %v2621_v3 = vmul.f32 100.0, %v7179_v43 }
 0x427   : > { %v8577_v37 = vmax.f32 %v6960_v48, 0.0  ;;  %v2865_v45 = vmul.f32 %v7094_v14, %v2864_v34  ;;  %v2759_v24 = vmul.f32 1.442695, %v2714_v28  ;;  %v7196_v21 = vadd.f32 %v7012_v58, %v2306_v47 }
 0x428   : > { %v3088_v52 = vmul.f32 0.01, %v2832_v31  ;;  %v2850_v7 = vsel %vm7169_vm11, %v2847_v61, %v2844_v53  ;;  %v2874_v46 = vmul.f32 %v7106_v19, %v2873_v32  ;;  %v2685_v26 = vand.u32 2147483647, %v2621_v3 }
 0x429   : > { %v7192_v54 = vadd.f32 %v3086_v15, %v8577_v37  ;;  %v7198_v13 = vpop.eup %4896  ;;  %v2868_v48 = vsel %vm7183_vm12, %v2865_v45, %v2862_v5  ;;  %v2871_v4 = vmul.f32 0.6931472, %v4895_v39  ;;  %v2890_v15 = vmul.f32 -0.5, %v7147_v27 }
 0x42a   : > { %v2763_v14 = vmul.f32 1.442695, %v2716_v57  ;;  %vm7206_vm13 = vcmp.lt.f32.partialorder %v2875_v10, 0.0004427343  ;;  %4904 = vlog2.f32 %v2878_v38  ;;  %v2717_v58 = vsub.f32 0.0, %v2685_v26  ;;  %v7237_v26 = vpop.permute.xlu1 %2310 }
 0x42b   : > { %v2623_v28 = vmul.f32 100.0, %v7196_v21  ;;  %v7211_v51 = vpop.eup %4898  ;;  %v3090_v61 = vmul.f32 0.01, %v2850_v7  ;;  %v2896_v32 = vadd.f32 1.0, %v7198_v13  ;;  %4906 = vpow2.f32 %v2759_v24 }
 0x42c   : > { %v8580_v53 = vmax.f32 %v6971_v8, 0.0  ;;  %v3092_v31 = vmul.f32 0.01, %v2868_v48  ;;  %v2905_v29 = vadd.f32 1.0, %v7211_v51  ;;  %v2877_v39 = vsel %vm7206_vm13, %v2874_v46, %v2871_v4 }
 0x42d   : > { %v4901_v10 = vpop.eup %4900  ;;  %v2891_v38 = vadd.f32 1.0, %v2890_v15  ;;  %4908 = vpow2.f32 %v2763_v14  ;;  %v7224_v57 = vadd.f32 %v6998_v12, %v2306_v47  ;;  %v2765_v3 = vmul.f32 1.442695, %v2717_v58 }
 0x42e   : > { %v7217_v50 = vadd.f32 %v3088_v52, %v8580_v53  ;;  %4910 = vlog2.f32 %v2905_v29  ;;  %v2687_v37 = vand.u32 2147483647, %v2623_v28  ;;  %v7227_v8 = vadd.f32 %v7014_v22, %v2306_v47 }
 0x42f   : > { %v8581_v45 = vmax.f32 %v6966_v25, 0.0  ;;  %v2893_v52 = vand.u32 2147483647, %v7147_v27  ;;  %v2881_v7 = vmul.f32 -0.5, %v7176_v2  ;;  %4912 = vlog2.f32 %v2896_v32 }
 0x430   : > { %v7235_v46 = vpop.eup %4902  ;;  %v3093_v12 = vmul.f32 0.01, %v2877_v39  ;;  %v2889_v48 = vmul.f32 0.6931472, %v4901_v10  ;;  %v2899_v4 = vmul.f32 -0.5, %v7198_v13  ;;  %v2908_v47 = vmul.f32 -0.5, %v7211_v51 }
 0x431   : > { %v7231_v24 = vadd.f32 %v3090_v61, %v8581_v45  ;;  %v2923_v25 = vadd.f32 1.0, %v7235_v46  ;;  %v2622_v15 = vmul.f32 100.0, %v7224_v57  ;;  %v7246_v14 = vadd.f32 %v7002_v36, %v7237_v26 }
 0x432   : > { %v2892_v34 = vmul.f32 %v7147_v27, %v2891_v38  ;;  %4914 = vpow2.f32 %v2765_v3  ;;  %v2719_v58 = vsub.f32 0.0, %v2687_v37  ;;  %v2624_v28 = vmul.f32 100.0, %v7227_v8 }
 0x433   : > { %vm7250_vm14 = vcmp.lt.f32.partialorder %v2893_v52, 0.0004427343  ;;  %v2882_v32 = vadd.f32 1.0, %v2881_v7  ;;  %v2884_v53 = vand.u32 2147483647, %v7176_v2  ;;  %4916 = vlog2.f32 %v2923_v25 }
 0x434   : > { %v4905_v29 = vpop.eup %4904  ;;  %v8584_v10 = vmax.f32 %v6980_v56, 0.0  ;;  %v2895_v36 = vsel %vm7250_vm14, %v2892_v34, %v2889_v48  ;;  %v2900_v27 = vadd.f32 1.0, %v2899_v4  ;;  %v2902_v38 = vand.u32 2147483647, %v7198_v13 }
 0x435   : > { %v7262_v3 = vpop.eup %4906  ;;  %v2909_v37 = vadd.f32 1.0, %v2908_v47  ;;  %v2911_v45 = vand.u32 2147483647, %v7211_v51  ;;  %v2686_v52 = vand.u32 2147483647, %v2622_v15  ;;  %v2625_v7 = vmul.f32 100.0, %v7246_v14 }
 0x436   : > { %v7257_v39 = vadd.f32 %v3092_v31, %v8584_v10  ;;  %v2926_v25 = vmul.f32 -0.5, %v7235_v46  ;;  %v2769_v31 = vmul.f32 1.442695, %v2719_v58  ;;  %v2688_v10 = vand.u32 2147483647, %v2624_v28 }
 0x437   : > { %v7268_v19 = vpop.eup %4908  ;;  %v8585_v48 = vmax.f32 %v6986_v59, 0.0  ;;  %v3095_v34 = vmul.f32 0.01, %v2895_v36  ;;  %v2883_v47 = vmul.f32 %v7176_v2, %v2882_v32  ;;  %vm7275_vm15 = vcmp.lt.f32.partialorder %v2884_v53, 0.0004427343 }
 0x438   : > { %v4911_v15 = vpop.eup %4910  ;;  %v2880_v22 = vmul.f32 0.6931472, %v4905_v29  ;;  %v2901_v5 = vmul.f32 %v7198_v13, %v2900_v27  ;;  %vm7280_vm0 = vcmp.lt.f32.partialorder %v2902_v38, 0.0004427343  ;;  %v2929_v28 = vand.u32 2147483647, %v7235_v46 }
 0x439   : > { %v7272_v4 = vadd.f32 %v3093_v12, %v8585_v48  ;;  %v2914_v59 = vadd.f32 1.0, %v7262_v3  ;;  %v4913_v12 = vpop.eup %4912  ;;  %v2907_v36 = vmul.f32 0.6931472, %v4911_v15  ;;  %v2910_v2 = vmul.f32 %v7211_v51, %v2909_v37 }
 0x43a   : > { %v2718_v32 = vsub.f32 0.0, %v2686_v52  ;;  %v2689_v53 = vand.u32 2147483647, %v2625_v7  ;;  %vm2912_vm1 = vcmp.lt.f32.partialorder %v2911_v45, 0.0004427343  ;;  %v2927_v48 = vadd.f32 1.0, %v2926_v25 }
 0x43b   : > { %4918 = vpow2.f32 %v2769_v31  ;;  %v2720_v29 = vsub.f32 0.0, %v2688_v10  ;;  %v2913_v56 = vsel %vm2912_vm1, %v2910_v2, %v2907_v36  ;;  %v2932_v13 = vadd.f32 1.0, %v7268_v19 }
 0x43c   : > { %v2721_v27 = vsub.f32 0.0, %v2689_v53  ;;  %v7290_v38 = vadd.f32 %v7027_v49, %v7237_v26  ;;  %v7292_v62 = vpop.eup %4914  ;;  %v2886_v15 = vsel %vm7275_vm15, %v2883_v47, %v2880_v22  ;;  %v2898_v51 = vmul.f32 0.6931472, %v4913_v12 }
 0x43d   : > { %v3097_v37 = vmul.f32 0.01, %v2913_v56  ;;  %4920 = vlog2.f32 %v2914_v59  ;;  %v4917_v45 = vpop.eup %4916  ;;  %vm7296_vm3 = vcmp.lt.f32.partialorder %v2929_v28, 0.0004427343  ;;  %v2767_v7 = vmul.f32 1.442695, %v2718_v32 }
 0x43e   : > { %v2773_v25 = vmul.f32 1.442695, %v2721_v27  ;;  %v7302_v31 = vadd.f32 %v7009_v0, %v7237_v26  ;;  %v8592_v49 = vmax.f32 %v7084_v9, 0.0  ;;  %v2925_v61 = vmul.f32 0.6931472, %v4917_v45 }
 0x43f   : > { %v2928_v22 = vmul.f32 %v7235_v46, %v2927_v48  ;;  %v2627_v56 = vmul.f32 100.0, %v7290_v38  ;;  %v2917_v47 = vmul.f32 -0.5, %v7262_v3  ;;  %4922 = vlog2.f32 %v2932_v13 }
 0x440   : > { %v7306_v10 = vadd.f32 %v3097_v37, %v8592_v49  ;;  %v2941_v28 = vadd.f32 1.0, %v7292_v62  ;;  %v2771_v59 = vmul.f32 1.442695, %v2720_v29  ;;  %4924 = vpow2.f32 %v2773_v25 }
 0x441   : > { %v2931_v0 = vsel %vm7296_vm3, %v2928_v22, %v2925_v61  ;;  %v2691_v9 = vand.u32 2147483647, %v2627_v56  ;;  %v2904_v36 = vsel %vm7280_vm0, %v2901_v5, %v2898_v51  ;;  %4926 = vpow2.f32 %v2767_v7 }
 0x442   : > { %v3099_v46 = vmul.f32 0.01, %v2931_v0  ;;  %v2626_v2 = vmul.f32 100.0, %v7302_v31  ;;  %v8593_v32 = vmax.f32 %v7007_v33, 0.0  ;;  %v2935_v29 = vmul.f32 -0.5, %v7268_v19 }
 0x443   : > { %v2653_v13 = vmax.f32 %v7179_v43, 0.0  ;;  %v3094_v27 = vmul.f32 0.01, %v2886_v15  ;;  %v8594_v37 = vmax.f32 %v7128_v55, 0.0  ;;  %v2920_v5 = vand.u32 2147483647, %v7262_v3 }
 0x444   : > { %v7321_v53 = vadd.f32 %v3095_v34, %v8593_v32  ;;  %4928 = vlog2.f32 %v2941_v28  ;;  %v3096_v51 = vmul.f32 0.01, %v2904_v36  ;;  %v2918_v33 = vadd.f32 1.0, %v2917_v47  ;;  %v2316_v32 = vpop.permute.xlu0 %2315 }
 0x445   : > { %v7328_v45 = vadd.f32 %v3099_v46, %v8594_v37  ;;  %v7331_v58 = vpop.eup %4918  ;;  %4930 = vpow2.f32 %v2771_v59  ;;  %v2723_v34 = vsub.f32 0.0, %v2691_v9  ;;  %v2690_v25 = vand.u32 2147483647, %v2626_v2 }
 0x446   : > { %v7338_v55 = vadd.f32 %v7032_v17, %v7237_v26  ;;  %v2936_v49 = vadd.f32 1.0, %v2935_v29  ;;  %v2938_v61 = vand.u32 2147483647, %v7268_v19  ;;  %v8595_v47 = vmax.f32 %v7025_v20, 0.0 }
 0x447   : > { %v4921_v15 = vpop.eup %4920  ;;  %vm7347_vm4 = vcmp.lt.f32.partialorder %v2920_v5, 0.0004427343  ;;  %v2944_v0 = vmul.f32 -0.5, %v7292_v62  ;;  %v2947_v17 = vand.u32 2147483647, %v7292_v62  ;;  %v8598_v26 = vmax.f32 %v7065_v40, 0.0 }
 0x448   : > { %v7345_v28 = vadd.f32 %v3094_v27, %v8595_v47  ;;  %v2919_v36 = vmul.f32 %v7262_v3, %v2918_v33  ;;  %v2959_v46 = vadd.f32 1.0, %v7331_v58  ;;  %v2777_v2 = vmul.f32 1.442695, %v2723_v34 }
 0x449   : > { %v7355_v9 = vadd.f32 %v3096_v51, %v8598_v26  ;;  %v4923_v20 = vpop.eup %4922  ;;  %v2916_v29 = vmul.f32 0.6931472, %v4921_v15  ;;  %v2962_v27 = vmul.f32 -0.5, %v7331_v58  ;;  %v2722_v37 = vsub.f32 0.0, %v2690_v25  ;;  %v7420_v25 = vpop.permute.xlu1 %2320 }
 0x44a   : > { %v2628_v5 = vmul.f32 100.0, %v7338_v55  ;;  %v7361_v47 = vpop.eup %4924  ;;  %v2937_v52 = vmul.f32 %v7268_v19, %v2936_v49  ;;  %vm7364_vm5 = vcmp.lt.f32.partialorder %v2938_v61, 0.0004427343  ;;  %v2657_v3 = vmax.f32 %v7246_v14, 0.0 }
 0x44b   : > { %v7370_v51 = vadd.f32 %v7016_v11, %v2316_v32  ;;  %v7372_v33 = vpop.eup %4926  ;;  %v2945_v34 = vadd.f32 1.0, %v2944_v0  ;;  %vm7374_vm6 = vcmp.lt.f32.partialorder %v2947_v17, 0.0004427343  ;;  %v2977_v15 = vadd.f32 1.0, %v7361_v47 }
 0x44c   : > { %4932 = vpow2.f32 %v2777_v2  ;;  %v2934_v19 = vmul.f32 0.6931472, %v4923_v20  ;;  %v2775_v49 = vmul.f32 1.442695, %v2722_v37  ;;  %v2692_v61 = vand.u32 2147483647, %v2628_v5 }
 0x44d   : > { %4934 = vlog2.f32 %v2959_v46  ;;  %v2922_v12 = vsel %vm7347_vm4, %v2919_v36, %v2916_v29  ;;  %v2963_v11 = vadd.f32 1.0, %v2962_v27  ;;  %v2965_v56 = vand.u32 2147483647, %v7331_v58 }
 0x44e   : > { %v4929_v26 = vpop.eup %4928  ;;  %4936 = vlog2.f32 %v2977_v15  ;;  %v2950_v17 = vadd.f32 1.0, %v7372_v33  ;;  %v2724_v22 = vsub.f32 0.0, %v2692_v61  ;;  %v2629_v2 = vmul.f32 100.0, %v7370_v51 }
 0x44f   : > { %v7382_v0 = vpop.eup %4930  ;;  %4938 = vpow2.f32 %v2775_v49  ;;  %v2953_v46 = vmul.f32 -0.5, %v7372_v33  ;;  %v2980_v20 = vmul.f32 -0.5, %v7361_v47  ;;  %v7389_v37 = vadd.f32 %v7047_v44, %v2316_v32 }
 0x450   : > { %v7392_v59 = vadd.f32 %v7021_v42, %v2316_v32  ;;  %v2940_v36 = vsel %vm7364_vm5, %v2937_v52, %v2934_v19  ;;  %v2943_v29 = vmul.f32 0.6931472, %v4929_v26  ;;  %v2779_v27 = vmul.f32 1.442695, %v2724_v22 }
 0x451   : > { %v2693_v5 = vand.u32 2147483647, %v2629_v2  ;;  %v2946_v15 = vmul.f32 %v7292_v62, %v2945_v34  ;;  %v2968_v49 = vadd.f32 1.0, %v7382_v0  ;;  %v2631_v48 = vmul.f32 100.0, %v7389_v37 }
 0x452   : > { %v3098_v7 = vmul.f32 0.01, %v2922_v12  ;;  %v7401_v44 = vmul.f32 %v7331_v58, %v2963_v11  ;;  %4940 = vpow2.f32 %v2779_v27  ;;  %v2630_v42 = vmul.f32 100.0, %v7392_v59 }
 0x453   : > { %v7404_v40 = vmul.f32 0.01, %v2940_v36  ;;  %v2954_v52 = vadd.f32 1.0, %v2953_v46  ;;  %v2981_v22 = vadd.f32 1.0, %v2980_v20  ;;  %v2949_v62 = vsel %vm7374_vm6, %v2946_v15, %v2943_v29 }
 0x454   : > { %vm7409_vm7 = vcmp.lt.f32.partialorder %v2965_v56, 0.0004427343  ;;  %4942 = vlog2.f32 %v2950_v17  ;;  %v2725_v12 = vsub.f32 0.0, %v2693_v5  ;;  %v2695_v58 = vand.u32 2147483647, %v2631_v48 }
 0x455   : > { %v2956_v11 = vand.u32 2147483647, %v7372_v33  ;;  %4944 = vlog2.f32 %v2968_v49  ;;  %v2983_v2 = vand.u32 2147483647, %v7361_v47  ;;  %v7418_v46 = vadd.f32 %v7054_v6, %v2316_v32 }
 0x456   : > { %v7413_v26 = vpop.eup %4932  ;;  %v8605_v56 = vmax.f32 %v7137_v23, 0.0  ;;  %v2971_v17 = vmul.f32 -0.5, %v7382_v0  ;;  %v2694_v29 = vand.u32 2147483647, %v2630_v42  ;;  %v3101_v5 = vmul.f32 0.01, %v2949_v62 }
 0x457   : > { %v4935_v20 = vpop.eup %4934  ;;  %v2995_v48 = vadd.f32 1.0, %v7413_v26  ;;  %v7429_v15 = vmul.f32 %v7372_v33, %v2954_v52  ;;  %v2982_v6 = vmul.f32 %v7361_v47, %v2981_v22  ;;  %v7434_v32 = vadd.f32 %v7037_v41, %v7420_v25 }
 0x458   : > { %v7424_v36 = vadd.f32 %v3098_v7, %v8605_v56  ;;  %v4937_v27 = vpop.eup %4936  ;;  %v2781_v7 = vmul.f32 1.442695, %v2725_v12  ;;  %v2727_v56 = vsub.f32 0.0, %v2695_v58  ;;  %v2961_v19 = vmul.f32 0.6931472, %v4935_v20 }
 0x459   : > { %v7436_v49 = vpop.eup %4938  ;;  %v2979_v23 = vmul.f32 0.6931472, %v4937_v27  ;;  %4946 = vlog2.f32 %v2995_v48  ;;  %vm2984_vm8 = vcmp.lt.f32.partialorder %v2983_v2, 0.0004427343  ;;  %v2632_v62 = vmul.f32 100.0, %v7418_v46 }
 0x45a   : > { %v2986_v42 = vadd.f32 1.0, %v7436_v49  ;;  %v2972_v33 = vadd.f32 1.0, %v2971_v17  ;;  %v2974_v52 = vand.u32 2147483647, %v7382_v0  ;;  %v2726_v22 = vsub.f32 0.0, %v2694_v29 }
 0x45b   : > { %v2985_v47 = vsel %vm2984_vm8, %v2982_v6, %v2979_v23  ;;  %v7443_v41 = vadd.f32 %v3101_v5, %v2653_v13  ;;  %v2998_v48 = vmul.f32 -0.5, %v7413_v26  ;;  %vm7448_vm9 = vcmp.lt.f32.partialorder %v2956_v11, 0.0004427343 }
 0x45c   : > { %v3105_v61 = vmul.f32 0.01, %v2985_v47  ;;  %4948 = vlog2.f32 %v2986_v42  ;;  %v7446_v12 = vpop.eup %4940  ;;  %v2785_v2 = vmul.f32 1.442695, %v2727_v56  ;;  %v2633_v20 = vmul.f32 100.0, %v7434_v32 }
 0x45d   : > { %4950 = vpow2.f32 %v2781_v7  ;;  %v7455_v17 = vadd.f32 %v7067_v30, %v7420_v25  ;;  %v2967_v43 = vsel %vm7409_vm7, %v7401_v44, %v2961_v19  ;;  %v3004_v11 = vadd.f32 1.0, %v7446_v12 }
 0x45e   : > { %v7462_v13 = vadd.f32 %v3105_v61, %v2657_v3  ;;  %v2696_v29 = vand.u32 2147483647, %v2632_v62  ;;  %v4943_v27 = vpop.eup %4942  ;;  %v7466_v5 = vmul.f32 %v7382_v0, %v2972_v33  ;;  %v2989_v6 = vmul.f32 -0.5, %v7436_v49 }
 0x45f   : > { %v2783_v23 = vmul.f32 1.442695, %v2726_v22  ;;  %v2697_v30 = vand.u32 2147483647, %v2633_v20  ;;  %v4945_v7 = vpop.eup %4944  ;;  %v2999_v44 = vadd.f32 1.0, %v2998_v48  ;;  %4952 = vlog2.f32 %v3004_v11 }
 0x460   : > { %v4436_v34 = vpack.c.bf16 %v7462_v13, %v7443_v41  ;;  %v2635_v14 = vmul.f32 100.0, %v7455_v17  ;;  %v3103_v3 = vmul.f32 0.01, %v2967_v43  ;;  %v3001_v61 = vand.u32 2147483647, %v7413_v26 }
 0x461   : > { %4954 = vpow2.f32 %v2785_v2  ;;  %v2729_v19 = vsub.f32 0.0, %v2697_v30  ;;  %v2952_v56 = vmul.f32 0.6931472, %v4943_v27  ;;  %v2728_v0 = vsub.f32 0.0, %v2696_v29 }
 0x462   : > { %v4426_v42 = vpack.c.bf16 %v7231_v24, %v7192_v54  ;;  %v4442_v62 = vpack.c.bf16 %v7257_v39, %v7217_v50  ;;  %v2970_v47 = vmul.f32 0.6931472, %v4945_v7  ;;  %v2990_v22 = vadd.f32 1.0, %v2989_v6 }
 0x463   : > { %v4947_v33 = vpop.eup %4946  ;;  %v2992_v48 = vand.u32 2147483647, %v7436_v49  ;;  %v3007_v20 = vmul.f32 -0.5, %v7446_v12  ;;  %v3000_v11 = vmul.f32 %v7413_v26, %v2999_v44  ;;  %4956 = vpow2.f32 %v2783_v23 }
 0x464   : > { %v2997_v43 = vmul.f32 0.6931472, %v4947_v33  ;;  %v2699_v2 = vand.u32 2147483647, %v2635_v14  ;;  %4427 = vmatprep.subr.bf16.mxu0 %v4426_v42  ;;  %4443 = vmatprep.subr.bf16.mxu1 %v4442_v62  ;;  %vm7480_vm10 = vcmp.lt.f32.partialorder %v2974_v52, 0.0004427343  ;;  %v7486_v50 = vadd.f32 %v7040_v35, %v7420_v25 }
 0x465   : > { %vm3002_vm11 = vcmp.lt.f32.partialorder %v3001_v61, 0.0004427343  ;;  %v2789_v54 = vmul.f32 1.442695, %v2729_v19  ;;  %v8610_v24 = vpack.c.bf16 %v7117_v18, %v7113_v60  ;;  %v8611_v39 = vpack.c.bf16 %v7145_v1, %v7141_v63 }
 0x466   : > { %v4949_v26 = vpop.eup %4948  ;;  %v8612_v52 = vmax.f32 %v7196_v21, 0.0  ;;  %v2958_v6 = vsel %vm7448_vm9, %v7429_v15, %v2952_v56  ;;  %v3003_v23 = vsel %vm3002_vm11, %v3000_v11, %v2997_v43  ;;  %v2787_v35 = vmul.f32 1.442695, %v2728_v0  ;;  %v8614_v56 = vld [vmem:[#allocation8_spill] sm:$0xff] }
 0x467   : > { %4429 = vmatpush1.bf16.msra.mxu0 %v8610_v24  ;;  %4445 = vmatpush1.bf16.msra.mxu1 %v8611_v39  ;;  %v7501_v30 = vpop.eup %4950  ;;  %v3107_v7 = vmul.f32 0.01, %v3003_v23  ;;  %v2988_v60 = vmul.f32 0.6931472, %v4949_v26  ;;  %v2991_v18 = vmul.f32 %v7436_v49, %v2990_v22  ;;  %v3008_v44 = vadd.f32 1.0, %v3007_v20 }
 0x468   : > { %v7496_v27 = vadd.f32 %v3103_v3, %v8612_v52  ;;  %v2976_v63 = vsel %vm7480_vm10, %v7466_v5, %v2970_v47  ;;  %vm2993_vm12 = vcmp.lt.f32.partialorder %v2992_v48, 0.0004427343  ;;  %v3010_v1 = vand.u32 2147483647, %v7446_v12 }
 0x469   : > { %v2731_v21 = vsub.f32 0.0, %v2699_v2  ;;  %v8613_v58 = vmax.f32 %v7290_v38, 0.0  ;;  %v2994_v14 = vsel %vm2993_vm12, %v2991_v18, %v2988_v60  ;;  %4958 = vpow2.f32 %v2789_v54  ;;  %v4953_v61 = vpop.eup %4952 }
 0x46a   : > { %v2634_v3 = vmul.f32 100.0, %v7486_v50  ;;  %v3106_v19 = vmul.f32 0.01, %v2994_v14  ;;  %v3013_v49 = vadd.f32 1.0, %v7501_v30  ;;  %4960 = vpow2.f32 %v2787_v35 }
 0x46b   : > { %v3139_v15 = vadd.f32 %v3107_v7, %v8613_v58  ;;  %v7514_v0 = vadd.f32 %v8614_v56, %v7420_v25  ;;  %v7516_v5 = vpop.eup %4954  ;;  %v3102_v42 = vmul.f32 0.01, %v2958_v6  ;;  %v3006_v38 = vmul.f32 0.6931472, %v4953_v61 }
 0x46c   : > { %v3009_v33 = vmul.f32 %v7446_v12, %v3008_v44  ;;  %v8615_v47 = vmax.f32 %v7167_v16, 0.0  ;;  %v3104_v48 = vmul.f32 0.01, %v2976_v63  ;;  %v2660_v20 = vmax.f32 %v7338_v55, 0.0 }
 0x46d   : > { %v4452_v62 = vpack.c.bf16 %v3139_v15, %v7496_v27  ;;  %vm3011_vm13 = vcmp.lt.f32.partialorder %v3010_v1, 0.0004427343  ;;  %v8616_v43 = vmax.f32 %v7302_v31, 0.0  ;;  %v2793_v2 = vmul.f32 1.442695, %v2731_v21  ;;  %v7526_v54 = vpop.eup %4956 }
 0x46e   : > { %v3132_v22 = vadd.f32 %v7404_v40, %v8615_v47  ;;  %v3012_v11 = vsel %vm3011_vm13, %v3009_v33, %v3006_v38  ;;  %v2698_v29 = vand.u32 2147483647, %v2634_v3  ;;  %4962 = vlog2.f32 %v3013_v49 }
 0x46f   : > { %v3138_v25 = vadd.f32 %v3106_v19, %v8616_v43  ;;  %v3108_v24 = vmul.f32 0.01, %v3012_v11  ;;  %v3031_v12 = vadd.f32 1.0, %v7516_v5  ;;  %v2636_v16 = vmul.f32 100.0, %v7514_v0 }
 0x470   : > { %v8617_v40 = vmax.f32 %v7224_v57, 0.0  ;;  %4964 = vpow2.f32 %v2793_v2  ;;  %v2730_v55 = vsub.f32 0.0, %v2698_v29  ;;  %v4430_v31 = vpack.c.bf16 %v7424_v36, %v7345_v28 }
 0x471   : > { %v8618_v26 = vmax.f32 %v7227_v8, 0.0  ;;  %v3140_v27 = vadd.f32 %v3108_v24, %v2660_v20  ;;  %v2700_v6 = vand.u32 2147483647, %v2636_v16  ;;  %v4446_v23 = vpack.c.bf16 %v3132_v22, %v7355_v9 }
 0x472   : > { %v3134_v39 = vadd.f32 %v3102_v42, %v8617_v40  ;;  %v3022_v35 = vadd.f32 1.0, %v7526_v54  ;;  %v2791_v7 = vmul.f32 1.442695, %v2730_v55  ;;  %4431 = vmatprep.subr.bf16.mxu0 %v4430_v31  ;;  %4966 = vlog2.f32 %v3031_v12 }
 0x473   : > { %v3136_v52 = vadd.f32 %v3104_v48, %v8618_v26  ;;  %v2732_v57 = vsub.f32 0.0, %v2700_v6  ;;  %4447 = vmatprep.subr.bf16.mxu1 %v4446_v23  ;;  %v8619_v18 = vpack.c.bf16 %v7306_v10, %v7272_v4  ;;  %v4959_v36 = vpop.eup %4958  ;;  %v8620_v8 = vpack.c.bf16 %v7328_v45, %v7321_v53 }
 0x474   : > { %v4434_v60 = vpack.c.bf16 %v3138_v25, %v3134_v39  ;;  %4968 = vpow2.f32 %v2791_v7  ;;  %v7544_v9 = vpop.eup %4960  ;;  %v3049_v44 = vadd.f32 1.0, %v4959_v36  ;;  %v3016_v63 = vmul.f32 -0.5, %v7501_v30 }
 0x475   : > { %4433 = vmatpush1.bf16.msra.mxu0 %v8619_v18  ;;  %v4450_v28 = vpack.c.bf16 %v3140_v27, %v3136_v52  ;;  %4449 = vmatpush1.bf16.msra.mxu1 %v8620_v8  ;;  %4970 = vlog2.f32 %v3022_v35  ;;  %v2795_v1 = vmul.f32 1.442695, %v2732_v57  ;;  %v3040_v4 = vadd.f32 1.0, %v7544_v9 }
 0x476   : > { %4435 = vmatprep.subr.bf16.mxu0 %v4434_v60  ;;  %4972 = vlog2.f32 %v3049_v44  ;;  %v3017_v45 = vadd.f32 1.0, %v3016_v63  ;;  %v3034_v21 = vmul.f32 -0.5, %v7516_v5  ;;  %v3052_v58 = vmul.f32 -0.5, %v4959_v36 }
 0x477   : > { %4451 = vmatprep.subr.bf16.mxu1 %v4450_v28  ;;  %4974 = vpow2.f32 %v2795_v1  ;;  %v3019_v15 = vand.u32 2147483647, %v7501_v30  ;;  %v3037_v19 = vand.u32 2147483647, %v7516_v5  ;;  %v3025_v49 = vmul.f32 -0.5, %v7526_v54 }
 0x478   : > { %v4963_v10 = vpop.eup %4962  ;;  %4976 = vlog2.f32 %v3040_v4  ;;  %v3018_v13 = vmul.f32 %v7501_v30, %v3017_v45  ;;  %v3053_v56 = vadd.f32 1.0, %v3052_v58  ;;  %v2661_v47 = vmax.f32 %v7370_v51, 0.0 }
 0x479   : > { %4437 = vmatpush1.bf16.msra.mxu0 %v4436_v34  ;;  %4453 = vmatpush1.bf16.msra.mxu1 %v4452_v62  ;;  %v3015_v3 = vmul.f32 0.6931472, %v4963_v10  ;;  %v3035_v34 = vadd.f32 1.0, %v3034_v21  ;;  %vm7558_vm14 = vcmp.lt.f32.partialorder %v3019_v15, 0.0004427343  ;;  %v2665_v11 = vmax.f32 %v7434_v32, 0.0 }
 0x47a   : > { %v4965_v53 = vpop.eup %4964  ;;  %v3055_v62 = vand.u32 2147483647, %v4959_v36  ;;  %vm7566_vm15 = vcmp.lt.f32.partialorder %v3037_v19, 0.0004427343  ;;  %v3028_v25 = vand.u32 2147483647, %v7526_v54  ;;  %v3054_v12 = vmul.f32 %v4959_v36, %v3053_v56 }
 0x47b   : > { %v3067_v14 = vadd.f32 1.0, %v4965_v53  ;;  %v3021_v22 = vsel %vm7558_vm14, %v3018_v13, %v3015_v3  ;;  %v3070_v20 = vmul.f32 -0.5, %v4965_v53  ;;  %v3036_v29 = vmul.f32 %v7516_v5, %v3035_v34 }
 0x47c   : > { %v4967_v61 = vpop.eup %4966  ;;  %v3026_v24 = vadd.f32 1.0, %v3025_v49  ;;  %v3109_v16 = vmul.f32 0.01, %v3021_v22  ;;  %v3043_v40 = vmul.f32 -0.5, %v7544_v9  ;;  %vm3056_vm0 = vcmp.lt.f32.partialorder %v3055_v62, 0.0004427343 }
 0x47d   : > { %4978 = vlog2.f32 %v3067_v14  ;;  %v3033_v48 = vmul.f32 0.6931472, %v4967_v61  ;;  %v3071_v26 = vadd.f32 1.0, %v3070_v20  ;;  %v3073_v6 = vand.u32 2147483647, %v4965_v53 }
 0x47e   : > { %v7554_v41 = vpop.eup %4968  ;;  %v3027_v23 = vmul.f32 %v7526_v54, %v3026_v24  ;;  %vm7578_vm1 = vcmp.lt.f32.partialorder %v3028_v25, 0.0004427343  ;;  %v3046_v7 = vand.u32 2147483647, %v7544_v9  ;;  %v3141_v57 = vadd.f32 %v3109_v16, %v2661_v47 }
 0x47f   : > { %v3058_v38 = vadd.f32 1.0, %v7554_v41  ;;  %v4971_v33 = vpop.eup %4970  ;;  %v3039_v55 = vsel %vm7566_vm15, %v3036_v29, %v3033_v48  ;;  %v3061_v52 = vmul.f32 -0.5, %v7554_v41  ;;  %v3044_v28 = vadd.f32 1.0, %v3043_v40  ;;  %v3152_v40 = vld [vmem:[%s8380_s7 + $0x18] sm:$0xff] }
 0x480   : > { %v4973_v30 = vpop.eup %4972  ;;  %v3024_v32 = vmul.f32 0.6931472, %v4971_v33  ;;  %v3111_v18 = vmul.f32 0.01, %v3039_v55  ;;  %v3072_v44 = vmul.f32 %v4965_v53, %v3071_v26  ;;  %vm3074_vm3 = vcmp.lt.f32.partialorder %v3073_v6, 0.0004427343 }
 0x481   : > { %4980 = vlog2.f32 %v3058_v38  ;;  %v4975_v2 = vpop.eup %4974  ;;  %v3051_v51 = vmul.f32 0.6931472, %v4973_v30  ;;  %v3062_v63 = vadd.f32 1.0, %v3061_v52  ;;  %v3064_v54 = vand.u32 2147483647, %v7554_v41  ;;  %v3154_v55 = vld [vmem:[%s8380_s7 + $0x28] sm:$0xff]  ;;  %v3168_v52 = vpop.permute.xlu0 %3167 }
 0x482   : > { %v3076_v39 = vadd.f32 1.0, %v4975_v2  ;;  %v4977_v5 = vpop.eup %4976  ;;  %v3079_v1 = vmul.f32 -0.5, %v4975_v2  ;;  %v3030_v4 = vsel %vm7578_vm1, %v3027_v23, %v3024_v32  ;;  %v2663_v45 = vmax.f32 %v7389_v37, 0.0  ;;  %v3156_v26 = vld [vmem:[%s8380_s7 + $0x38] sm:$0xff]  ;;  %v3173_v23 = vpop.permute.xlu1 %3172 }
 0x483   : > { %v3057_v31 = vsel %vm3056_vm0, %v3054_v12, %v3051_v51  ;;  %v3042_v21 = vmul.f32 0.6931472, %v4977_v5  ;;  %v3045_v14 = vmul.f32 %v7544_v9, %v3044_v28  ;;  %vm7588_vm4 = vcmp.lt.f32.partialorder %v3046_v7, 0.0004427343 }
 0x484   : > { %v3113_v27 = vmul.f32 0.01, %v3057_v31  ;;  %4982 = vlog2.f32 %v3076_v39  ;;  %v2667_v53 = vmax.f32 %v7455_v17, 0.0  ;;  %v3110_v19 = vmul.f32 0.01, %v3030_v4  ;;  %v3153_v39 = vld [vmem:[%s8380_s7 + $0x20] sm:$0xff] }
 0x485   : > { %v3063_v34 = vmul.f32 %v7554_v41, %v3062_v63  ;;  %v3080_v49 = vadd.f32 1.0, %v3079_v1  ;;  %v3143_v56 = vadd.f32 %v3111_v18, %v2663_v45  ;;  %vm3065_vm5 = vcmp.lt.f32.partialorder %v3064_v54, 0.0004427343  ;;  %v3155_v31 = vld [vmem:[%s8380_s7 + $0x30] sm:$0xff] }
 0x486   : > { %v3145_v36 = vadd.f32 %v3113_v27, %v2665_v11  ;;  %v3082_v37 = vand.u32 2147483647, %v4975_v2  ;;  %v3048_v62 = vsel %vm7588_vm4, %v3045_v14, %v3042_v21  ;;  %v2662_v33 = vmax.f32 %v7392_v59, 0.0  ;;  %v3149_v59 = vld [vmem:[%s8380_s7] sm:$0xff] }
 0x487   : > { %v4979_v60 = vpop.eup %4978  ;;  %v2666_v17 = vmax.f32 %v7486_v50, 0.0  ;;  %v3081_v20 = vmul.f32 %v4975_v2, %v3080_v49  ;;  %v3112_v41 = vmul.f32 0.01, %v3048_v62  ;;  %v2664_v11 = vmax.f32 %v7418_v46, 0.0  ;;  %v3150_v46 = vld [vmem:[%s8380_s7 + $0x8] sm:$0xff] }
 0x488   : > { %v3069_v8 = vmul.f32 0.6931472, %v4979_v60  ;;  %v4440_v10 = vpack.c.bf16 %v3145_v36, %v3141_v57  ;;  %v3142_v30 = vadd.f32 %v3110_v19, %v2662_v33  ;;  %vm3083_vm6 = vcmp.lt.f32.partialorder %v3082_v37, 0.0004427343 }
 0x489   : > { %v2668_v29 = vmax.f32 %v7514_v0, 0.0  ;;  %v3144_v12 = vadd.f32 %v3112_v41, %v2664_v11  ;;  %v8629_v2 = vmov 0.0   ;;  %v3151_v0 = vld [vmem:[%s8380_s7 + $0x10] sm:$0xff] }
 0x48a   : > { %v3075_v58 = vsel %vm3074_vm3, %v3072_v44, %v3069_v8 }
 0x48b   : > { %v4981_v15 = vpop.eup %4980  ;;  %v3115_v61 = vmul.f32 0.01, %v3075_v58 }
 0x48c   : > { %v3060_v13 = vmul.f32 0.6931472, %v4981_v15 }
 0x48d   : > { %v3147_v42 = vadd.f32 %v3115_v61, %v2667_v53 }
 0x48e   : > { %v3066_v9 = vsel %vm3065_vm5, %v3063_v34, %v3060_v13  ;;  %v4983_v38 = vpop.eup %4982 }
 0x48f   : > { %v4456_v47 = vpack.c.bf16 %v3147_v42, %v3143_v56  ;;  %v3114_v22 = vmul.f32 0.01, %v3066_v9  ;;  %v3078_v48 = vmul.f32 0.6931472, %v4983_v38 }
 0x491   : > { %v3146_v43 = vadd.f32 %v3114_v22, %v2666_v17  ;;  %v3084_v25 = vsel %vm3083_vm6, %v3081_v20, %v3078_v48 }
 0x492   : > { %v3116_v24 = vmul.f32 0.01, %v3084_v25 }
 0x493   : > { %v4438_v51 = vpack.c.bf16 %v3146_v43, %v3142_v30 }
 0x494   : > { %v3148_v16 = vadd.f32 %v3116_v24, %v2668_v29 }
 0x495   : > { %4439 = vmatprep.subr.bf16.mxu0 %v4438_v51  ;;  %v3178_v51 = vpop.permute.xlu0 %3177 }
 0x496   : > { %4441 = vmatpush1.bf16.msra.mxu0 %v4440_v10  ;;  %v4454_v50 = vpack.c.bf16 %v3148_v16, %v3144_v12 }
 0x498   : > { %4455 = vmatprep.subr.bf16.mxu1 %v4454_v50 }
 0x499   : > { %4338 = vmatmul.mubr.msk.f32.vlgmr.msra.gmra.mrb[48].mxu0 %vm1472_vm2, %v3149_v59  ;;  %4457 = vmatpush1.bf16.msra.mxu1 %v4456_v47 }
 0x49a   : > { %3299 = vmatprep.mubr.f32.mxu0 %v8629_v2 }
 0x49c   : > { %4346 = vmatmul.mubr.msk.f32.vlgmr.msra.gmra.mrb[48].mxu1 %vm1472_vm2, %v3149_v59 }
 0x49d   : > { %4339 = vmatmul.mubr.msk.f32.gmra.mrb[50].mxu0 %vm1472_vm2, %v3150_v46  ;;  %3412 = vmatprep.mubr.f32.mxu1 %v8629_v2 }
 0x49e   : > { %3305 = vmatprep.mubr.f32.mxu0 %v8629_v2 }
 0x4a0   : > { %4347 = vmatmul.mubr.msk.f32.gmra.mrb[50].mxu1 %vm1472_vm2, %v3150_v46 }
 0x4a1   : > { %4340 = vmatmul.mubr.msk.f32.gmra.mrb[52].mxu0 %vm1472_vm2, %v3151_v0  ;;  %3418 = vmatprep.mubr.f32.mxu1 %v8629_v2 }
 0x4a2   : > { %3311 = vmatprep.mubr.f32.mxu0 %v8629_v2 }
 0x4a4   : > { %4348 = vmatmul.mubr.msk.f32.gmra.mrb[52].mxu1 %vm1472_vm2, %v3151_v0 }
 0x4a5   : > { %4341 = vmatmul.mubr.msk.f32.gmra.mrb[54].mxu0 %vm1472_vm2, %v3152_v40  ;;  %3424 = vmatprep.mubr.f32.mxu1 %v8629_v2 }
 0x4a6   : > { %3317 = vmatprep.mubr.f32.mxu0 %v8629_v2 }
 0x4a8   : > { %4349 = vmatmul.mubr.msk.f32.gmra.mrb[54].mxu1 %vm1472_vm2, %v3152_v40 }
 0x4a9   : > { %4342 = vmatmul.mubr.msk.f32.gmra.mrb[56].mxu0 %vm1472_vm2, %v3153_v39  ;;  %3430 = vmatprep.mubr.f32.mxu1 %v8629_v2 }
 0x4aa   : > { %3323 = vmatprep.mubr.f32.mxu0 %v8629_v2 }
 0x4ac   : > { %4350 = vmatmul.mubr.msk.f32.gmra.mrb[56].mxu1 %vm1472_vm2, %v3153_v39 }
 0x4ad   : > { %4343 = vmatmul.mubr.msk.f32.gmra.mrb[58].mxu0 %vm1472_vm2, %v3154_v55  ;;  %3436 = vmatprep.mubr.f32.mxu1 %v8629_v2 }
 0x4ae   : > { %3329 = vmatprep.mubr.f32.mxu0 %v8629_v2 }
 0x4b0   : > { %4351 = vmatmul.mubr.msk.f32.gmra.mrb[58].mxu1 %vm1472_vm2, %v3154_v55 }
 0x4b1   : > { %4344 = vmatmul.mubr.msk.f32.gmra.mrb[60].mxu0 %vm1472_vm2, %v3155_v31  ;;  %3442 = vmatprep.mubr.f32.mxu1 %v8629_v2 }
 0x4b2   : > { %3335 = vmatprep.mubr.f32.mxu0 %v8629_v2 }
 0x4b4   : > { %4352 = vmatmul.mubr.msk.f32.gmra.mrb[60].mxu1 %vm1472_vm2, %v3155_v31 }
 0x4b5   : > { %4345 = vmatmul.mubr.msk.f32.gmra.mrb[62].mxu0 %vm1472_vm2, %v3156_v26  ;;  %3448 = vmatprep.mubr.f32.mxu1 %v8629_v2 }
 0x4b6   : > { %4077 = vmatprep.mubr.f32.mxu0 %v8629_v2 }
 0x4b8   : > { %4353 = vmatmul.mubr.msk.f32.gmra.mrb[62].mxu1 %vm1472_vm2, %v3156_v26 }
 0x4b9   : > { %4148 = vmatprep.mubr.f32.mxu1 %v8629_v2 }
 0x56c   : > { %v3295_v32 = vpop.f32.mrb[48].mxu0 }
 0x56d   : > { %v7656_v27 = vadd.f32 %v3295_v32, %v3168_v52  ;;  %v3297_v6 = vpop.f32.mrb[49].mxu0 }
 0x56e   : > { %v7658_v5 = vadd.f32 %v3297_v6, %v3168_v52 }
 0x56f   : > { %v3455_v35 = vmul.f32 100.0, %v7656_v27  ;;  %v3408_v7 = vpop.f32.mrb[48].mxu1 }
 0x570   : > { %v3456_v60 = vmul.f32 100.0, %v7658_v5  ;;  %v3301_v57 = vpop.f32.mrb[50].mxu0  ;;  %v7662_v28 = vadd.f32 %v3408_v7, %v3168_v52  ;;  %v3410_v36 = vpop.f32.mrb[49].mxu1 }
 0x571   : > { %v3519_v18 = vand.u32 2147483647, %v3455_v35  ;;  %v7664_v8 = vadd.f32 %v3301_v57, %v3173_v23  ;;  %v3303_v44 = vpop.f32.mrb[51].mxu0  ;;  %v7666_v63 = vadd.f32 %v3410_v36, %v3168_v52 }
 0x572   : > { %v7668_v1 = vadd.f32 %v3303_v44, %v3173_v23  ;;  %v3457_v10 = vmul.f32 100.0, %v7662_v28  ;;  %v3520_v45 = vand.u32 2147483647, %v3456_v60 }
 0x573   : > { %v3551_v4 = vsub.f32 0.0, %v3519_v18  ;;  %v3459_v54 = vmul.f32 100.0, %v7664_v8  ;;  %v3458_v21 = vmul.f32 100.0, %v7666_v63  ;;  %v3414_v58 = vpop.f32.mrb[50].mxu1 }
 0x574   : > { %v3307_v15 = vpop.f32.mrb[52].mxu0  ;;  %v3521_v3 = vand.u32 2147483647, %v3457_v10  ;;  %v7673_v61 = vadd.f32 %v3414_v58, %v3173_v23  ;;  %v3460_v13 = vmul.f32 100.0, %v7668_v1  ;;  %v3416_v42 = vpop.f32.mrb[51].mxu1  ;;  %v3552_v62 = vsub.f32 0.0, %v3520_v45 }
 0x575   : > { %v3583_v14 = vmul.f32 1.442695, %v3551_v4  ;;  %v3523_v53 = vand.u32 2147483647, %v3459_v54  ;;  %v3522_v19 = vand.u32 2147483647, %v3458_v21  ;;  %v7679_v48 = vadd.f32 %v3416_v42, %v3173_v23 }
 0x576   : > { %v3553_v34 = vsub.f32 0.0, %v3521_v3  ;;  %v3461_v56 = vmul.f32 100.0, %v7673_v61  ;;  %v3309_v37 = vpop.f32.mrb[53].mxu0  ;;  %v3524_v9 = vand.u32 2147483647, %v3460_v13  ;;  %v7690_v2 = vadd.f32 %v3307_v15, %v3178_v51 }
 0x577   : > { %4984 = vpow2.f32 %v3583_v14  ;;  %v3555_v49 = vsub.f32 0.0, %v3523_v53  ;;  %v3420_v38 = vpop.f32.mrb[52].mxu1  ;;  %v3554_v20 = vsub.f32 0.0, %v3522_v19  ;;  %v3462_v25 = vmul.f32 100.0, %v7679_v48 }
 0x578   : > { %v7677_v33 = vpop.f32.mrb[54].mxu0  ;;  %v3587_v47 = vmul.f32 1.442695, %v3553_v34  ;;  %v3525_v22 = vand.u32 2147483647, %v3461_v56  ;;  %v3422_v30 = vpop.f32.mrb[53].mxu1  ;;  %v7694_v40 = vadd.f32 %v3420_v38, %v3178_v51 }
 0x579   : > { %v3591_v17 = vmul.f32 1.442695, %v3555_v49  ;;  %v7681_v41 = vpop.f32.mrb[55].mxu0  ;;  %v3585_v11 = vmul.f32 1.442695, %v3552_v62  ;;  %v3556_v16 = vsub.f32 0.0, %v3524_v9  ;;  %v7733_v49 = vadd.f32 %v3309_v37, %v3178_v51 }
 0x57a   : > { %4986 = vpow2.f32 %v3587_v47  ;;  %v3557_v43 = vsub.f32 0.0, %v3525_v22  ;;  %v3589_v50 = vmul.f32 1.442695, %v3554_v20  ;;  %v3526_v0 = vand.u32 2147483647, %v3462_v25 }
 0x57b   : > { %v7684_v29 = vpop.f32.mrb[54].mxu1  ;;  %4988 = vpow2.f32 %v3591_v17  ;;  %v3593_v26 = vmul.f32 1.442695, %v3556_v16  ;;  %v3463_v6 = vmul.f32 100.0, %v7690_v2  ;;  %v3465_v7 = vmul.f32 100.0, %v7694_v40 }
 0x57c   : > { %v7686_v24 = vpop.f32.mrb[56].mxu0  ;;  %v3595_v12 = vmul.f32 1.442695, %v3557_v43  ;;  %v7688_v59 = vpop.f32.mrb[55].mxu1  ;;  %v3558_v23 = vsub.f32 0.0, %v3526_v0  ;;  %v7742_v47 = vadd.f32 %v3422_v30, %v3178_v51 }
 0x57d   : > { %v7692_v46 = vpop.f32.mrb[57].mxu0  ;;  %v3527_v44 = vand.u32 2147483647, %v3463_v6  ;;  %v3529_v15 = vand.u32 2147483647, %v3465_v7  ;;  %v7749_v43 = vpop.permute.xlu1 %3182 }
 0x57e   : > { %4990 = vpow2.f32 %v3595_v12  ;;  %v3597_v54 = vmul.f32 1.442695, %v3558_v23  ;;  %v7759_v0 = vadd.f32 %v7677_v33, %v7749_v43 }
 0x57f   : > { %4992 = vpow2.f32 %v3585_v11  ;;  %v7696_v39 = vpop.f32.mrb[56].mxu1  ;;  %v3559_v38 = vsub.f32 0.0, %v3527_v44  ;;  %v3561_v12 = vsub.f32 0.0, %v3529_v15 }
 0x580   : > { %v7698_v55 = vpop.f32.mrb[58].mxu0  ;;  %v7702_v52 = vpop.f32.mrb[57].mxu1  ;;  %4994 = vpow2.f32 %v3589_v50  ;;  %v3464_v50 = vmul.f32 100.0, %v7733_v49 }
 0x581   : > { %v7700_v31 = vpop.eup %4984  ;;  %v7706_v35 = vpop.f32.mrb[59].mxu0  ;;  %v3599_v7 = vmul.f32 1.442695, %v3559_v38  ;;  %v3603_v11 = vmul.f32 1.442695, %v3561_v12 }
 0x582   : > { %v3647_v32 = vadd.f32 1.0, %v7700_v31  ;;  %v3650_v19 = vmul.f32 -0.5, %v7700_v31  ;;  %v3653_v17 = vand.u32 2147483647, %v7700_v31  ;;  %v3528_v20 = vand.u32 2147483647, %v3464_v50 }
 0x583   : > { %v7709_v60 = vpop.f32.mrb[58].mxu1 }
 0x584   : > { %4996 = vlog2.f32 %v3647_v32  ;;  %v7711_v57 = vpop.eup %4986  ;;  %v7713_v18 = vpop.f32.mrb[59].mxu1  ;;  %v3651_v30 = vadd.f32 1.0, %v3650_v19  ;;  %vm7768_vm7 = vcmp.lt.f32.partialorder %v3653_v17, 0.0004427343 }
 0x585   : > { %4998 = vpow2.f32 %v3593_v26  ;;  %v3665_v36 = vadd.f32 1.0, %v7711_v57  ;;  %v7716_v4 = vpop.f32.mrb[60].mxu0  ;;  %v7718_v10 = vpop.eup %4988  ;;  %v3668_v22 = vmul.f32 -0.5, %v7711_v57  ;;  %v3671_v6 = vand.u32 2147483647, %v7711_v57 }
 0x586   : > { %v7720_v45 = vpop.f32.mrb[61].mxu0  ;;  %v3683_v58 = vadd.f32 1.0, %v7718_v10  ;;  %v3686_v25 = vmul.f32 -0.5, %v7718_v10  ;;  %v3689_v34 = vand.u32 2147483647, %v7718_v10  ;;  %v3652_v38 = vmul.f32 %v7700_v31, %v3651_v30 }
 0x587   : > { %5000 = vlog2.f32 %v3665_v36  ;;  %v7724_v14 = vpop.f32.mrb[60].mxu1  ;;  %v3466_v36 = vmul.f32 100.0, %v7742_v47  ;;  %v3669_v15 = vadd.f32 1.0, %v3668_v22  ;;  %vm7777_vm8 = vcmp.lt.f32.partialorder %v3671_v6, 0.0004427343 }
 0x588   : > { %v7726_v3 = vpop.f32.mrb[62].mxu0  ;;  %v7728_v53 = vpop.eup %4990  ;;  %5002 = vlog2.f32 %v3683_v58  ;;  %vm7786_vm9 = vcmp.lt.f32.partialorder %v3689_v34, 0.0004427343  ;;  %v3467_v6 = vmul.f32 100.0, %v7759_v0 }
 0x589   : > { %v7735_v56 = vpop.f32.mrb[61].mxu1  ;;  %v7737_v42 = vpop.f32.mrb[63].mxu0  ;;  %v3701_v9 = vadd.f32 1.0, %v7728_v53  ;;  %5004 = vpow2.f32 %v3597_v54  ;;  %v3704_v23 = vmul.f32 -0.5, %v7728_v53  ;;  %v3707_v13 = vand.u32 2147483647, %v7728_v53 }
 0x58a   : > { %v7739_v62 = vpop.eup %4992  ;;  %v3670_v12 = vmul.f32 %v7711_v57, %v3669_v15  ;;  %v3530_v50 = vand.u32 2147483647, %v3466_v36  ;;  %v3560_v57 = vsub.f32 0.0, %v3528_v20  ;;  %v7802_v36 = vadd.f32 %v7684_v29, %v7749_v43 }
 0x58b   : > { %v7747_v37 = vpop.eup %4994  ;;  %5006 = vlog2.f32 %v3701_v9  ;;  %v7753_v16 = vpop.f32.mrb[62].mxu1  ;;  %v3656_v51 = vadd.f32 1.0, %v7739_v62  ;;  %v3659_v19 = vmul.f32 -0.5, %v7739_v62  ;;  %v3687_v9 = vadd.f32 1.0, %v3686_v25 }
 0x58c   : > { %v7761_v26 = vpop.f32.mrb[63].mxu1  ;;  %v3674_v33 = vadd.f32 1.0, %v7747_v37  ;;  %v3705_v22 = vadd.f32 1.0, %v3704_v23  ;;  %vm7795_vm10 = vcmp.lt.f32.partialorder %v3707_v13, 0.0004427343  ;;  %v3677_v20 = vmul.f32 -0.5, %v7747_v37 }
 0x58d   : > { %8630 = vst [vmem:[#allocation9_spill] sm:$0xff] %v7761_v26  ;;  %5008 = vlog2.f32 %v3656_v51  ;;  %v3688_v30 = vmul.f32 %v7718_v10, %v3687_v9  ;;  %v8639_v29 = vmax.f32 %v7656_v27, 0.0  ;;  %v3469_v51 = vmul.f32 100.0, %v7802_v36 }
 0x58e   : > { %v4997_v32 = vpop.eup %4996  ;;  %5010 = vpow2.f32 %v3599_v7  ;;  %v3706_v34 = vmul.f32 %v7728_v53, %v3705_v22  ;;  %v3601_v53 = vmul.f32 1.442695, %v3560_v57  ;;  %v8641_v27 = vmax.f32 %v7662_v28, 0.0 }
 0x58f   : > { %v7766_v44 = vpop.eup %4998  ;;  %v3649_v54 = vmul.f32 0.6931472, %v4997_v32  ;;  %5012 = vlog2.f32 %v3674_v33 }
 0x590   : > { %v3692_v21 = vadd.f32 1.0, %v7766_v44 }
 0x591   : > { %v5001_v32 = vpop.eup %5000  ;;  %v3655_v25 = vsel %vm7768_vm7, %v3652_v38, %v3649_v54  ;;  %v3531_v38 = vand.u32 2147483647, %v3467_v6  ;;  %v3662_v6 = vand.u32 2147483647, %v7739_v62 }
 0x592   : > { %v3667_v26 = vmul.f32 0.6931472, %v5001_v32  ;;  %v5003_v31 = vpop.eup %5002  ;;  %v3935_v10 = vmul.f32 0.01, %v3655_v25  ;;  %5014 = vlog2.f32 %v3692_v21 }
 0x593   : > { %v7791_v23 = vpop.eup %5004  ;;  %v3685_v54 = vmul.f32 0.6931472, %v5003_v31  ;;  %5016 = vpow2.f32 %v3603_v11  ;;  %v3563_v22 = vsub.f32 0.0, %v3531_v38  ;;  %v3660_v11 = vadd.f32 1.0, %v3659_v19 }
 0x594   : > { %v3673_v7 = vsel %vm7777_vm8, %v3670_v12, %v3667_v26  ;;  %v3562_v26 = vsub.f32 0.0, %v3530_v50  ;;  %v3710_v17 = vadd.f32 1.0, %v7791_v23  ;;  %v7812_v25 = vadd.f32 %v3935_v10, %v8639_v29 }
 0x595   : > { %v5007_v15 = vpop.eup %5006  ;;  %v3691_v33 = vsel %vm7786_vm9, %v3688_v30, %v3685_v54  ;;  %v3937_v13 = vmul.f32 0.01, %v3673_v7  ;;  %v8640_v12 = vmax.f32 %v7664_v8, 0.0  ;;  %v3695_v7 = vmul.f32 -0.5, %v7766_v44 }
 0x596   : > { %v3703_v9 = vmul.f32 0.6931472, %v5007_v15  ;;  %v3939_v32 = vmul.f32 0.01, %v3691_v33  ;;  %v3605_v54 = vmul.f32 1.442695, %v3562_v26  ;;  %5018 = vlog2.f32 %v3710_v17 }
 0x597   : > { %v5009_v50 = vpop.eup %5008  ;;  %v7825_v57 = vadd.f32 %v3937_v13, %v8641_v27  ;;  %v8642_v15 = vmax.f32 %v7673_v61, 0.0  ;;  %v3678_v33 = vadd.f32 1.0, %v3677_v20  ;;  %v3607_v26 = vmul.f32 1.442695, %v3563_v22 }
 0x598   : > { %v3709_v21 = vsel %vm7795_vm10, %v3706_v34, %v3703_v9  ;;  %v7816_v31 = vadd.f32 %v3939_v32, %v8640_v12  ;;  %v7821_v58 = vpop.eup %5010  ;;  %v3490_v34 = vmax.f32 %v7666_v63, 0.0  ;;  %v3680_v9 = vand.u32 2147483647, %v7747_v37 }
 0x599   : > { %v3941_v30 = vmul.f32 0.01, %v3709_v21  ;;  %v5013_v19 = vpop.eup %5012  ;;  %v3492_v38 = vmax.f32 %v7668_v1, 0.0  ;;  %5020 = vpow2.f32 %v3601_v53  ;;  %v3533_v13 = vand.u32 2147483647, %v3469_v51 }
 0x59a   : > { %v3658_v32 = vmul.f32 0.6931472, %v5009_v50  ;;  %v3494_v61 = vmax.f32 %v7679_v48, 0.0  ;;  %v3719_v21 = vadd.f32 1.0, %v7821_v58  ;;  %5022 = vpow2.f32 %v3605_v54 }
 0x59b   : > { %v7831_v10 = vadd.f32 %v3941_v30, %v8642_v15  ;;  %v3661_v29 = vmul.f32 %v7739_v62, %v3660_v11  ;;  %vm7841_vm11 = vcmp.lt.f32.partialorder %v3662_v6, 0.0004427343  ;;  %v3696_v22 = vadd.f32 1.0, %v3695_v7  ;;  %v3188_v7 = vpop.permute.xlu0 %3187 }
 0x59c   : > { %v5015_v17 = vpop.eup %5014  ;;  %v3495_v12 = vmax.f32 %v7690_v2, 0.0  ;;  %v3676_v30 = vmul.f32 0.6931472, %v5013_v19  ;;  %v3679_v53 = vmul.f32 %v7747_v37, %v3678_v33  ;;  %vm7847_vm12 = vcmp.lt.f32.partialorder %v3680_v9, 0.0004427343 }
 0x59d   : > { %5024 = vpow2.f32 %v3607_v26  ;;  %v7851_v50 = vpop.eup %5016  ;;  %v3698_v54 = vand.u32 2147483647, %v7766_v44  ;;  %v3713_v62 = vmul.f32 -0.5, %v7791_v23  ;;  %v3716_v11 = vand.u32 2147483647, %v7791_v23 }
 0x59e   : > { %v3565_v6 = vsub.f32 0.0, %v3533_v13  ;;  %v3664_v27 = vsel %vm7841_vm11, %v3661_v29, %v3658_v32  ;;  %v3694_v15 = vmul.f32 0.6931472, %v5015_v17  ;;  %5026 = vlog2.f32 %v3719_v21 }
 0x59f   : > { %v7860_v37 = vadd.f32 %v7681_v41, %v7749_v43  ;;  %v3697_v19 = vmul.f32 %v7766_v44, %v3696_v22  ;;  %v7864_v9 = vadd.f32 %v7686_v24, %v3188_v7  ;;  %v7867_v26 = vadd.f32 %v7696_v39, %v3188_v7 }
 0x5a0   : > { %v3611_v33 = vmul.f32 1.442695, %v3565_v6  ;;  %v3682_v13 = vsel %vm7847_vm12, %v3679_v53, %v3676_v30  ;;  %v3737_v32 = vadd.f32 1.0, %v7851_v50  ;;  %v7875_v41 = vadd.f32 %v7688_v59, %v7749_v43  ;;  %v5019_v17 = vpop.eup %5018 }
 0x5a1   : > { %v3468_v21 = vmul.f32 100.0, %v7860_v37  ;;  %v3936_v44 = vmul.f32 0.01, %v3664_v27  ;;  %vm7877_vm13 = vcmp.lt.f32.partialorder %v3698_v54, 0.0004427343  ;;  %v3714_v24 = vadd.f32 1.0, %v3713_v62 }
 0x5a2   : > { %5028 = vpow2.f32 %v3611_v33  ;;  %v3700_v39 = vsel %vm7877_vm13, %v3697_v19, %v3694_v15  ;;  %v3938_v59 = vmul.f32 0.01, %v3682_v13  ;;  %v3471_v51 = vmul.f32 100.0, %v7864_v9 }
 0x5a3   : > { %v3532_v30 = vand.u32 2147483647, %v3468_v21  ;;  %v7885_v53 = vpop.eup %5020  ;;  %v3473_v54 = vmul.f32 100.0, %v7867_v26  ;;  %v3712_v62 = vmul.f32 0.6931472, %v5019_v17  ;;  %5030 = vlog2.f32 %v3737_v32 }
 0x5a4   : > { %v7890_v6 = vpop.eup %5022  ;;  %vm7892_vm14 = vcmp.lt.f32.partialorder %v3716_v11, 0.0004427343  ;;  %v3470_v15 = vmul.f32 100.0, %v7875_v41  ;;  %v8651_v19 = vmax.f32 %v7658_v5, 0.0  ;;  %v3940_v13 = vmul.f32 0.01, %v3700_v39 }
 0x5a5   : > { %v3715_v21 = vmul.f32 %v7791_v23, %v3714_v24  ;;  %v3564_v29 = vsub.f32 0.0, %v3532_v30  ;;  %v3722_v22 = vmul.f32 -0.5, %v7821_v58  ;;  %v3728_v11 = vadd.f32 1.0, %v7885_v53 }
 0x5a6   : > { %v7899_v33 = vadd.f32 %v3936_v44, %v8651_v19  ;;  %v3499_v17 = vmax.f32 %v7759_v0, 0.0  ;;  %v3535_v28 = vand.u32 2147483647, %v3471_v51  ;;  %v7909_v32 = vadd.f32 %v3938_v59, %v3490_v34 }
 0x5a7   : > { %v7902_v43 = vpop.eup %5024  ;;  %v3746_v5 = vadd.f32 1.0, %v7890_v6  ;;  %v3537_v39 = vand.u32 2147483647, %v3473_v54  ;;  %v3718_v24 = vsel %vm7892_vm14, %v3715_v21, %v3712_v62  ;;  %v3725_v30 = vand.u32 2147483647, %v7821_v58 }
 0x5a8   : > { %v3755_v44 = vadd.f32 1.0, %v7902_v43  ;;  %v5027_v23 = vpop.eup %5026  ;;  %v3534_v8 = vand.u32 2147483647, %v3470_v15  ;;  %v7919_v51 = vadd.f32 %v3940_v13, %v3492_v38  ;;  %v3609_v63 = vmul.f32 1.442695, %v3564_v29 }
 0x5a9   : > { %v7922_v34 = vadd.f32 %v7692_v46, %v3188_v7  ;;  %v3723_v59 = vadd.f32 1.0, %v3722_v22  ;;  %v3740_v54 = vmul.f32 -0.5, %v7851_v50  ;;  %v3567_v27 = vsub.f32 0.0, %v3535_v28 }
 0x5aa   : > { %5032 = vlog2.f32 %v3755_v44  ;;  %v3721_v21 = vmul.f32 0.6931472, %v5027_v23  ;;  %v3569_v19 = vsub.f32 0.0, %v3537_v39  ;;  %v7928_v15 = vadd.f32 %v7702_v52, %v3188_v7  ;;  %v7941_v23 = vpop.permute.xlu1 %3192 }
 0x5ab   : > { %5034 = vlog2.f32 %v3728_v11  ;;  %v3758_v1 = vmul.f32 -0.5, %v7902_v43  ;;  %v3566_v13 = vsub.f32 0.0, %v3534_v8  ;;  %v3615_v46 = vmul.f32 1.442695, %v3567_v27 }
 0x5ac   : > { %v7925_v62 = vpop.eup %5028  ;;  %5036 = vlog2.f32 %v3746_v5  ;;  %v3942_v29 = vmul.f32 0.01, %v3718_v24  ;;  %vm7932_vm15 = vcmp.lt.f32.partialorder %v3725_v30, 0.0004427343  ;;  %v3472_v28 = vmul.f32 100.0, %v7922_v34 }
 0x5ad   : > { %v3773_v38 = vadd.f32 1.0, %v7925_v62  ;;  %5038 = vpow2.f32 %v3609_v63  ;;  %v5031_v11 = vpop.eup %5030  ;;  %v3724_v5 = vmul.f32 %v7821_v58, %v3723_v59  ;;  %v3731_v52 = vmul.f32 -0.5, %v7885_v53 }
 0x5ae   : > { %v3619_v7 = vmul.f32 1.442695, %v3569_v19  ;;  %v3741_v44 = vadd.f32 1.0, %v3740_v54  ;;  %v3743_v39 = vand.u32 2147483647, %v7851_v50  ;;  %v3474_v8 = vmul.f32 100.0, %v7928_v15 }
 0x5af   : > { %5040 = vlog2.f32 %v3773_v38  ;;  %v3727_v24 = vsel %vm7932_vm15, %v3724_v5, %v3721_v21  ;;  %v3759_v30 = vadd.f32 1.0, %v3758_v1  ;;  %v3613_v63 = vmul.f32 1.442695, %v3566_v13 }
 0x5b0   : > { %5042 = vpow2.f32 %v3615_v46  ;;  %v3536_v27 = vand.u32 2147483647, %v3472_v28  ;;  %v3739_v20 = vmul.f32 0.6931472, %v5031_v11  ;;  %v3761_v58 = vand.u32 2147483647, %v7902_v43 }
 0x5b1   : > { %v3776_v59 = vmul.f32 -0.5, %v7925_v62  ;;  %v7949_v19 = vadd.f32 %v7698_v55, %v7941_v23  ;;  %v7953_v54 = vadd.f32 %v3942_v29, %v3494_v61  ;;  %v3732_v38 = vadd.f32 1.0, %v3731_v52 }
 0x5b2   : > { %v3734_v46 = vand.u32 2147483647, %v7885_v53  ;;  %5044 = vpow2.f32 %v3619_v7  ;;  %v3943_v1 = vmul.f32 0.01, %v3727_v24  ;;  %v3742_v13 = vmul.f32 %v7851_v50, %v3741_v44 }
 0x5b3   : > { %vm7957_vm0 = vcmp.lt.f32.partialorder %v3743_v39, 0.0004427343  ;;  %v3538_v28 = vand.u32 2147483647, %v3474_v8  ;;  %v3760_v5 = vmul.f32 %v7902_v43, %v3759_v30  ;;  %5046 = vpow2.f32 %v3613_v63 }
 0x5b4   : > { %v5033_v21 = vpop.eup %5032  ;;  %v3568_v48 = vsub.f32 0.0, %v3536_v27  ;;  %v3745_v29 = vsel %vm7957_vm0, %v3742_v13, %v3739_v20  ;;  %vm3762_vm1 = vcmp.lt.f32.partialorder %v3761_v58, 0.0004427343  ;;  %v3777_v52 = vadd.f32 1.0, %v3776_v59 }
 0x5b5   : > { %v5035_v11 = vpop.eup %5034  ;;  %v3757_v55 = vmul.f32 0.6931472, %v5033_v21  ;;  %v3475_v7 = vmul.f32 100.0, %v7949_v19  ;;  %v7966_v50 = vmul.f32 %v7885_v53, %v3732_v38  ;;  %v3779_v39 = vand.u32 2147483647, %v7925_v62 }
 0x5b6   : > { %v5037_v61 = vpop.eup %5036  ;;  %v7971_v8 = vadd.f32 %v7709_v60, %v7941_v23  ;;  %v3749_v24 = vmul.f32 -0.5, %v7890_v6  ;;  %v3752_v20 = vand.u32 2147483647, %v7890_v6  ;;  %v3570_v63 = vsub.f32 0.0, %v3538_v28 }
 0x5b7   : > { %v3763_v44 = vsel %vm3762_vm1, %v3760_v5, %v3757_v55  ;;  %v7973_v43 = vpop.eup %5038  ;;  %v7979_v53 = vadd.f32 %v3943_v1, %v3495_v12  ;;  %v3945_v58 = vmul.f32 0.01, %v3745_v29  ;;  %vm7981_vm3 = vcmp.lt.f32.partialorder %v3734_v46, 0.0004427343 }
 0x5b8   : > { %v3947_v30 = vmul.f32 0.01, %v3763_v44  ;;  %v3617_v38 = vmul.f32 1.442695, %v3568_v48  ;;  %v3778_v28 = vmul.f32 %v7925_v62, %v3777_v52  ;;  %v3539_v2 = vand.u32 2147483647, %v3475_v7 }
 0x5b9   : > { %v5041_v27 = vpop.eup %5040  ;;  %vm3780_vm4 = vcmp.lt.f32.partialorder %v3779_v39, 0.0004427343  ;;  %v3764_v12 = vadd.f32 1.0, %v7973_v43  ;;  %v3477_v46 = vmul.f32 100.0, %v7971_v8  ;;  %v7997_v1 = vadd.f32 %v7706_v35, %v7941_v23 }
 0x5ba   : > { %v7986_v21 = vpop.eup %5042  ;;  %v7990_v13 = vadd.f32 %v3947_v30, %v3499_v17  ;;  %v3775_v22 = vmul.f32 0.6931472, %v5041_v27  ;;  %v3750_v55 = vadd.f32 1.0, %v3749_v24  ;;  %v3621_v17 = vmul.f32 1.442695, %v3570_v63 }
 0x5bb   : > { %vm8003_vm5 = vcmp.lt.f32.partialorder %v3752_v20, 0.0004427343  ;;  %v3791_v52 = vadd.f32 1.0, %v7986_v21  ;;  %5048 = vpow2.f32 %v3617_v38  ;;  %v8660_v7 = vmax.f32 %v7694_v40, 0.0 }
 0x5bc   : > { %v3781_v0 = vsel %vm3780_vm4, %v3778_v28, %v3775_v22  ;;  %v8001_v48 = vpop.eup %5044  ;;  %v3730_v44 = vmul.f32 0.6931472, %v5035_v11  ;;  %v3748_v39 = vmul.f32 0.6931472, %v5037_v61  ;;  %v3571_v24 = vsub.f32 0.0, %v3539_v2 }
 0x5bd   : > { %v3949_v29 = vmul.f32 0.01, %v3781_v0  ;;  %v8010_v35 = vadd.f32 %v3945_v58, %v8660_v7  ;;  %v8012_v30 = vpop.eup %5046  ;;  %v8661_v63 = vmax.f32 %v7802_v36, 0.0  ;;  %5050 = vlog2.f32 %v3764_v12 }
 0x5be   : > { %v3541_v20 = vand.u32 2147483647, %v3477_v46  ;;  %v3476_v22 = vmul.f32 100.0, %v7997_v1  ;;  %v3751_v28 = vmul.f32 %v7890_v6, %v3750_v55  ;;  %v3809_v38 = vadd.f32 1.0, %v8001_v48 }
 0x5bf   : > { %v8016_v27 = vadd.f32 %v3949_v29, %v8661_v63  ;;  %5052 = vpow2.f32 %v3621_v17  ;;  %v3623_v40 = vmul.f32 1.442695, %v3571_v24  ;;  %v8025_v36 = vadd.f32 %v7713_v18, %v7941_v23  ;;  %v8036_v17 = vpop.permute.xlu0 %3197 }
 0x5c0   : > { %5054 = vlog2.f32 %v3791_v52  ;;  %v3573_v61 = vsub.f32 0.0, %v3541_v20  ;;  %v3736_v58 = vsel %vm7981_vm3, %v7966_v50, %v3730_v44  ;;  %v3767_v2 = vmul.f32 -0.5, %v7973_v43 }
 0x5c1   : > { %v3782_v6 = vadd.f32 1.0, %v8012_v30  ;;  %5056 = vpow2.f32 %v3623_v40  ;;  %v3754_v12 = vsel %vm8003_vm5, %v3751_v28, %v3748_v39  ;;  %v3540_v0 = vand.u32 2147483647, %v3476_v22 }
 0x5c2   : > { %v3770_v18 = vand.u32 2147483647, %v7973_v43  ;;  %v3785_v23 = vmul.f32 -0.5, %v8012_v30  ;;  %5058 = vlog2.f32 %v3809_v38  ;;  %v3627_v50 = vmul.f32 1.442695, %v3573_v61 }
 0x5c3   : > { %v8040_v59 = vmul.f32 0.01, %v3736_v58  ;;  %v3478_v62 = vmul.f32 100.0, %v8025_v36  ;;  %v8046_v52 = vadd.f32 %v7716_v4, %v8036_v17  ;;  %v3768_v7 = vadd.f32 1.0, %v3767_v2 }
 0x5c4   : > { %5060 = vlog2.f32 %v3782_v6  ;;  %v3794_v44 = vmul.f32 -0.5, %v7986_v21  ;;  %v8052_v63 = vmul.f32 0.01, %v3754_v12  ;;  %v3812_v20 = vmul.f32 -0.5, %v8001_v48 }
 0x5c5   : > { %8662 = vst [vmem:[#allocation7_spill] sm:$0xff] %v8046_v52  ;;  %v8050_v24 = vpop.eup %5048  ;;  %v3572_v28 = vsub.f32 0.0, %v3540_v0  ;;  %vm8056_vm6 = vcmp.lt.f32.partialorder %v3770_v18, 0.0004427343  ;;  %v3786_v4 = vadd.f32 1.0, %v3785_v23  ;;  %5062 = vpow2.f32 %v3627_v50 }
 0x5c6   : > { %v3797_v40 = vand.u32 2147483647, %v7986_v21  ;;  %v3542_v6 = vand.u32 2147483647, %v3478_v62  ;;  %v3479_v12 = vmul.f32 100.0, %v8046_v52  ;;  %v3769_v5 = vmul.f32 %v7973_v43, %v3768_v7 }
 0x5c7   : > { %v5051_v61 = vpop.eup %5050  ;;  %v3625_v2 = vmul.f32 1.442695, %v3572_v28  ;;  %v3788_v0 = vand.u32 2147483647, %v8012_v30  ;;  %v3795_v18 = vadd.f32 1.0, %v3794_v44  ;;  %v3800_v22 = vadd.f32 1.0, %v8050_v24 }
 0x5c8   : > { %v3813_v39 = vadd.f32 1.0, %v3812_v20  ;;  %v3574_v50 = vsub.f32 0.0, %v3542_v6  ;;  %v8070_v46 = vadd.f32 %v7724_v14, %v8036_v17  ;;  %v8075_v28 = vmul.f32 %v8012_v30, %v3786_v4 }
 0x5c9   : > { %v8063_v11 = vpop.eup %5052  ;;  %5064 = vpow2.f32 %v3625_v2  ;;  %vm8077_vm7 = vcmp.lt.f32.partialorder %v3797_v40, 0.0004427343  ;;  %v3815_v7 = vand.u32 2147483647, %v8001_v48  ;;  %v3766_v20 = vmul.f32 0.6931472, %v5051_v61 }
 0x5ca   : > { %v5055_v23 = vpop.eup %5054  ;;  %8665 = vst [vmem:[#allocation10_spill] sm:$0xff] %v8070_v46  ;;  %v3818_v2 = vadd.f32 1.0, %v8063_v11  ;;  %v3543_v14 = vand.u32 2147483647, %v3479_v12  ;;  %vm8085_vm8 = vcmp.lt.f32.partialorder %v3788_v0, 0.0004427343  ;;  %v3796_v4 = vmul.f32 %v7986_v21, %v3795_v18 }
 0x5cb   : > { %v8072_v62 = vpop.eup %5056  ;;  %v3793_v30 = vmul.f32 0.6931472, %v5055_v23  ;;  %5066 = vlog2.f32 %v3800_v22  ;;  %v3629_v40 = vmul.f32 1.442695, %v3574_v50  ;;  %v3814_v29 = vmul.f32 %v8001_v48, %v3813_v39 }
 0x5cc   : > { %v3827_v6 = vadd.f32 1.0, %v8072_v62  ;;  %v5059_v60 = vpop.eup %5058  ;;  %v3481_v61 = vmul.f32 100.0, %v8070_v46  ;;  %v8094_v44 = vadd.f32 %v7720_v45, %v8036_v17  ;;  %vm8096_vm9 = vcmp.lt.f32.partialorder %v3815_v7, 0.0004427343 }
 0x5cd   : > { %v3803_v23 = vmul.f32 -0.5, %v8050_v24  ;;  %v3821_v21 = vmul.f32 -0.5, %v8063_v11  ;;  %v3772_v48 = vsel %vm8056_vm6, %v3769_v5, %v3766_v20  ;;  %v3811_v39 = vmul.f32 0.6931472, %v5059_v60 }
 0x5ce   : > { %5068 = vlog2.f32 %v3827_v6  ;;  %8670 = vst [vmem:[#allocation11_spill] sm:$0xff] %v8094_v44  ;;  %v5061_v12 = vpop.eup %5060  ;;  %v3575_v22 = vsub.f32 0.0, %v3543_v14  ;;  %v3799_v45 = vsel %vm8077_vm7, %v3796_v4, %v3793_v30  ;;  %v3806_v50 = vand.u32 2147483647, %v8050_v24 }
 0x5cf   : > { %5070 = vpow2.f32 %v3629_v40  ;;  %v8104_v18 = vpop.eup %5062  ;;  %v3830_v7 = vmul.f32 -0.5, %v8072_v62  ;;  %v3480_v6 = vmul.f32 100.0, %v8094_v44  ;;  %v8111_v55 = vmul.f32 0.6931472, %v5061_v12 }
 0x5d0   : > { %5072 = vlog2.f32 %v3818_v2  ;;  %v3845_v40 = vadd.f32 1.0, %v8104_v18  ;;  %v3545_v60 = vand.u32 2147483647, %v3481_v61  ;;  %v8115_v38 = vmul.f32 0.01, %v3772_v48 }
 0x5d1   : > { %v3804_v20 = vadd.f32 1.0, %v3803_v23  ;;  %v3822_v2 = vadd.f32 1.0, %v3821_v21  ;;  %v8119_v43 = vadd.f32 %v7735_v56, %v8036_v17  ;;  %v3951_v30 = vmul.f32 0.01, %v3799_v45 }
 0x5d2   : > { %v3817_v4 = vsel %vm8096_vm9, %v3814_v29, %v3811_v39  ;;  %5074 = vlog2.f32 %v3845_v40  ;;  %v3631_v12 = vmul.f32 1.442695, %v3575_v22  ;;  %v3831_v44 = vadd.f32 1.0, %v3830_v7  ;;  %v8133_v29 = vpop.permute.xlu1 %3202 }
 0x5d3   : > { %8673 = vst [vmem:[#allocation8_spill] sm:$0xff] %v8119_v43  ;;  %v8121_v14 = vpop.eup %5064  ;;  %v3833_v5 = vand.u32 2147483647, %v8072_v62  ;;  %v3544_v48 = vand.u32 2147483647, %v3480_v6  ;;  %v3848_v23 = vmul.f32 -0.5, %v8104_v18  ;;  %v8136_v22 = vmul.f32 %v8050_v24, %v3804_v20 }
 0x5d4   : > { %v3836_v61 = vadd.f32 1.0, %v8121_v14  ;;  %v3824_v17 = vand.u32 2147483647, %v8063_v11  ;;  %v3577_v21 = vsub.f32 0.0, %v3545_v60  ;;  %v3953_v39 = vmul.f32 0.01, %v3817_v4 }
 0x5d5   : > { %v5067_v0 = vpop.eup %5066  ;;  %v3482_v45 = vmul.f32 100.0, %v8119_v43  ;;  %v8674_v6 = vmax.f32 %v7864_v9, 0.0  ;;  %v8144_v56 = vmul.f32 %v8063_v11, %v3822_v2  ;;  %v8148_v60 = vadd.f32 %v7726_v3, %v8133_v29 }
 0x5d6   : > { %5076 = vlog2.f32 %v3836_v61  ;;  %v3832_v20 = vmul.f32 %v8072_v62, %v3831_v44  ;;  %vm3834_vm10 = vcmp.lt.f32.partialorder %v3833_v5, 0.0004427343  ;;  %v3576_v61 = vsub.f32 0.0, %v3544_v48 }
 0x5d7   : > { %v8141_v40 = vadd.f32 %v3951_v30, %v8674_v6  ;;  %5078 = vpow2.f32 %v3631_v12  ;;  %v3849_v46 = vadd.f32 1.0, %v3848_v23  ;;  %v3839_v9 = vmul.f32 -0.5, %v8121_v14 }
 0x5d8   : > { %v5069_v7 = vpop.eup %5068  ;;  %v3635_v11 = vmul.f32 1.442695, %v3577_v21  ;;  %v8675_v2 = vmax.f32 %v7867_v26, 0.0  ;;  %v3851_v6 = vand.u32 2147483647, %v8104_v18  ;;  %v3483_v26 = vmul.f32 100.0, %v8148_v60 }
 0x5d9   : > { %v8150_v4 = vpop.eup %5070  ;;  %v3829_v24 = vmul.f32 0.6931472, %v5069_v7  ;;  %v3546_v52 = vand.u32 2147483647, %v3482_v45  ;;  %vm8160_vm11 = vcmp.lt.f32.partialorder %v3806_v50, 0.0004427343  ;;  %v4474_v58 = vpack.c.bf16 %v7953_v54, %v7909_v32 }
 0x5da   : > { %v5073_v43 = vpop.eup %5072  ;;  %v3854_v30 = vadd.f32 1.0, %v8150_v4  ;;  %v8157_v12 = vadd.f32 %v3953_v39, %v8675_v2  ;;  %vm8164_vm12 = vcmp.lt.f32.partialorder %v3824_v17, 0.0004427343  ;;  %v3842_v5 = vand.u32 2147483647, %v8121_v14 }
 0x5db   : > { %v3835_v3 = vsel %vm3834_vm10, %v3832_v20, %v3829_v24  ;;  %v3802_v48 = vmul.f32 0.6931472, %v5067_v0  ;;  %v3820_v23 = vmul.f32 0.6931472, %v5073_v43  ;;  %v3633_v21 = vmul.f32 1.442695, %v3576_v61  ;;  %4475 = vmatprep.subr.bf16.mxu1 %v4474_v58 }
 0x5dc   : > { %v3955_v44 = vmul.f32 0.01, %v3835_v3  ;;  %5080 = vlog2.f32 %v3854_v30  ;;  %v8172_v39 = vadd.f32 %v7753_v16, %v8133_v29  ;;  %v5075_v50 = vpop.eup %5074  ;;  %v8680_v45 = vmax.f32 %v7949_v19, 0.0 }
 0x5dd   : > { %v3850_v24 = vmul.f32 %v8104_v18, %v3849_v46  ;;  %v3840_v20 = vadd.f32 1.0, %v3839_v9  ;;  %5082 = vpow2.f32 %v3635_v11  ;;  %v3847_v2 = vmul.f32 0.6931472, %v5075_v50 }
 0x5de   : > { %v8176_v17 = vadd.f32 %v3955_v44, %v8680_v45  ;;  %v3857_v30 = vmul.f32 -0.5, %v8150_v4  ;;  %v3578_v3 = vsub.f32 0.0, %v3546_v52  ;;  %v8182_v43 = vadd.f32 %v7737_v42, %v8133_v29 }
 0x5df   : > { %vm3852_vm13 = vcmp.lt.f32.partialorder %v3851_v6, 0.0004427343  ;;  %vm8186_vm14 = vcmp.lt.f32.partialorder %v3842_v5, 0.0004427343  ;;  %v3547_v0 = vand.u32 2147483647, %v3483_v26  ;;  %5084 = vpow2.f32 %v3633_v21 }
 0x5e0   : > { %v5077_v46 = vpop.eup %5076  ;;  %v3853_v18 = vsel %vm3852_vm13, %v3850_v24, %v3847_v2  ;;  %v3860_v61 = vand.u32 2147483647, %v8150_v4  ;;  %v3485_v52 = vmul.f32 100.0, %v8172_v39  ;;  %v3841_v44 = vmul.f32 %v8121_v14, %v3840_v20 }
 0x5e1   : > { %v8192_v9 = vpop.eup %5078  ;;  %v3957_v42 = vmul.f32 0.01, %v3853_v18  ;;  %v3838_v11 = vmul.f32 0.6931472, %v5077_v46  ;;  %v3579_v50 = vsub.f32 0.0, %v3547_v0  ;;  %v3858_v6 = vadd.f32 1.0, %v3857_v30 }
 0x5e2   : > { %v3637_v5 = vmul.f32 1.442695, %v3578_v3  ;;  %v3549_v45 = vand.u32 2147483647, %v3485_v52  ;;  %v3484_v16 = vmul.f32 100.0, %v8182_v43  ;;  %v8683_v26 = vmax.f32 %v7971_v8, 0.0 }
 0x5e3   : > { %v3844_v21 = vsel %vm8186_vm14, %v3841_v44, %v3838_v11  ;;  %v3639_v2 = vmul.f32 1.442695, %v3579_v50  ;;  %v4458_v18 = vpack.c.bf16 %v7919_v51, %v7899_v33  ;;  %v3808_v14 = vsel %vm8160_vm11, %v8136_v22, %v3802_v48  ;;  %v8684_v8 = vld [vmem:[#allocation9_spill] sm:$0xff] }
 0x5e4   : > { %v8198_v24 = vadd.f32 %v3957_v42, %v8683_v26  ;;  %v3826_v20 = vsel %vm8164_vm12, %v8144_v56, %v3820_v23  ;;  %v3863_v30 = vadd.f32 1.0, %v8192_v9  ;;  %v8213_v3 = vadd.f32 %v8684_v8, %v8133_v29 }
 0x5e5   : > { %5086 = vpow2.f32 %v3639_v2  ;;  %v3581_v33 = vsub.f32 0.0, %v3549_v45  ;;  %v3548_v51 = vand.u32 2147483647, %v3484_v16  ;;  %4459 = vmatprep.subr.bf16.mxu0 %v4458_v18  ;;  %v8685_v22 = vsel %vm8085_vm8, %v8075_v28, %v8111_v55 }
 0x5e6   : > { %v5081_v19 = vpop.eup %5080  ;;  %v4484_v0 = vpack.c.bf16 %v8198_v24, %v8157_v12  ;;  %v3950_v56 = vmul.f32 0.01, %v8685_v22  ;;  %v3956_v7 = vmul.f32 0.01, %v3844_v21  ;;  %v3859_v48 = vmul.f32 %v8150_v4, %v3858_v6 }
 0x5e7   : > { %v3856_v62 = vmul.f32 0.6931472, %v5081_v19  ;;  %v8686_v29 = vpack.c.bf16 %v7816_v31, %v7812_v25  ;;  %v8226_v23 = vpop.eup %5082  ;;  %vm3861_vm15 = vcmp.lt.f32.partialorder %v3860_v61, 0.0004427343  ;;  %5088 = vpow2.f32 %v3637_v5 }
 0x5e8   : > { %v3643_v16 = vmul.f32 1.442695, %v3581_v33  ;;  %v3952_v46 = vmul.f32 0.01, %v3808_v14  ;;  %v3954_v52 = vmul.f32 0.01, %v3826_v20  ;;  %5090 = vlog2.f32 %v3863_v30 }
 0x5e9   : > { %4461 = vmatpush1.bf16.msra.mxu0 %v8686_v29  ;;  %v3862_v55 = vsel %vm3861_vm15, %v3859_v48, %v3856_v62  ;;  %v3580_v28 = vsub.f32 0.0, %v3548_v51  ;;  %v3510_v42 = vmax.f32 %v8025_v36, 0.0  ;;  %v3486_v4 = vmul.f32 100.0, %v8213_v3  ;;  %v8232_v25 = vpop.eup %5084 }
 0x5ea   : > { %v3958_v11 = vmul.f32 0.01, %v3862_v55  ;;  %v8687_v31 = vmax.f32 %v7860_v37, 0.0  ;;  %v8688_v44 = vmax.f32 %v7875_v41, 0.0  ;;  %v8689_v54 = vmax.f32 %v7997_v1, 0.0  ;;  %v8698_v55 = vld [vmem:[#allocation7_spill] sm:$0xff] }
 0x5eb   : > { %5092 = vpow2.f32 %v3643_v16  ;;  %v8690_v36 = vpack.c.bf16 %v7831_v10, %v7825_v57  ;;  %v3881_v5 = vadd.f32 1.0, %v8226_v23  ;;  %v3641_v45 = vmul.f32 1.442695, %v3580_v28 }
 0x5ec   : > { %v3980_v61 = vadd.f32 %v8115_v38, %v8687_v31  ;;  %v3982_v32 = vadd.f32 %v3950_v56, %v8688_v44  ;;  %v3988_v50 = vadd.f32 %v3956_v7, %v8689_v54  ;;  %v3990_v6 = vadd.f32 %v3958_v11, %v3510_v42  ;;  %v8701_v11 = vld [vmem:[#allocation10_spill] sm:$0xff] }
 0x5ed   : > { %4477 = vmatpush1.bf16.msra.mxu1 %v8690_v36  ;;  %v8691_v26 = vmax.f32 %v7733_v49, 0.0  ;;  %v8692_v38 = vmax.f32 %v7742_v47, 0.0  ;;  %v8693_v1 = vmax.f32 %v7922_v34, 0.0  ;;  %v8694_v2 = vmax.f32 %v7928_v15, 0.0 }
 0x5ee   : > { %v3872_v57 = vadd.f32 1.0, %v8232_v25  ;;  %5094 = vpow2.f32 %v3641_v45  ;;  %v3550_v10 = vand.u32 2147483647, %v3486_v4  ;;  %v3866_v47 = vmul.f32 -0.5, %v8192_v9 }
 0x5ef   : > { %v3976_v37 = vadd.f32 %v8040_v59, %v8691_v26  ;;  %v3978_v41 = vadd.f32 %v8052_v63, %v8692_v38  ;;  %v3984_v21 = vadd.f32 %v3952_v46, %v8693_v1  ;;  %v3986_v18 = vadd.f32 %v3954_v52, %v8694_v2  ;;  %v5087_v8 = vpop.eup %5086 }
 0x5f0   : > { %5096 = vlog2.f32 %v3881_v5  ;;  %v3582_v59 = vsub.f32 0.0, %v3550_v10  ;;  %v3899_v63 = vadd.f32 1.0, %v5087_v8  ;;  %v8695_v19 = vpack.c.bf16 %v7990_v13, %v7979_v53 }
 0x5f1   : > { %v4462_v14 = vpack.c.bf16 %v3980_v61, %v3976_v37  ;;  %v4478_v20 = vpack.c.bf16 %v3982_v32, %v3978_v41  ;;  %v4466_v30 = vpack.c.bf16 %v3988_v50, %v3984_v21  ;;  %v4482_v49 = vpack.c.bf16 %v3990_v6, %v3986_v18  ;;  %v8257_v34 = vpop.eup %5088  ;;  %v8702_v61 = vld [vmem:[#allocation11_spill] sm:$0xff] }
 0x5f2   : > { %5098 = vlog2.f32 %v3872_v57  ;;  %v3645_v15 = vmul.f32 1.442695, %v3582_v59  ;;  %v8696_v33 = vpack.c.bf16 %v8016_v27, %v8010_v35  ;;  %v5091_v51 = vpop.eup %5090  ;;  %v3867_v56 = vadd.f32 1.0, %v3866_v47 }
 0x5f3   : > { %4463 = vmatprep.subr.bf16.mxu0 %v4462_v14  ;;  %4479 = vmatprep.subr.bf16.mxu1 %v4478_v20  ;;  %5100 = vlog2.f32 %v3899_v63  ;;  %v3890_v7 = vadd.f32 1.0, %v8257_v34  ;;  %v3869_v62 = vand.u32 2147483647, %v8192_v9  ;;  %v3884_v48 = vmul.f32 -0.5, %v8226_v23 }
 0x5f4   : > { %4465 = vmatpush1.bf16.msra.mxu0 %v8695_v19  ;;  %4481 = vmatpush1.bf16.msra.mxu1 %v8696_v33  ;;  %5102 = vpow2.f32 %v3645_v15  ;;  %v3902_v53 = vmul.f32 -0.5, %v5087_v8  ;;  %v8697_v35 = vpack.c.bf16 %v8176_v17, %v8141_v40  ;;  %v3865_v27 = vmul.f32 0.6931472, %v5091_v51 }
 0x5f5   : > { %4467 = vmatprep.subr.bf16.mxu0 %v4466_v30  ;;  %4483 = vmatprep.subr.bf16.mxu1 %v4482_v49  ;;  %v8265_v22 = vpop.eup %5092  ;;  %v3868_v16 = vmul.f32 %v8192_v9, %v3867_v56  ;;  %v3875_v58 = vmul.f32 -0.5, %v8232_v25  ;;  %v3511_v28 = vmax.f32 %v8698_v55, 0.0  ;;  %vm8283_vm0 = vcmp.lt.f32.partialorder %v3869_v62, 0.0004427343 }
 0x5f6   : > { %v3917_v13 = vadd.f32 1.0, %v8265_v22  ;;  %v3885_v12 = vadd.f32 1.0, %v3884_v48  ;;  %v3903_v17 = vadd.f32 1.0, %v3902_v53  ;;  %v3920_v9 = vmul.f32 -0.5, %v8265_v22 }
 0x5f7   : > { %v3871_v24 = vsel %vm8283_vm0, %v3868_v16, %v3865_v27  ;;  %v3513_v4 = vmax.f32 %v8701_v11, 0.0  ;;  %v3887_v31 = vand.u32 2147483647, %v8226_v23  ;;  %v3512_v44 = vmax.f32 %v8702_v61, 0.0 }
 0x5f8   : > { %4469 = vmatpush1.bf16.msra.mxu0 %v8697_v35  ;;  %4485 = vmatpush1.bf16.msra.mxu1 %v4484_v0  ;;  %v8277_v29 = vpop.eup %5094  ;;  %5104 = vlog2.f32 %v3917_v13  ;;  %v3905_v0 = vand.u32 2147483647, %v5087_v8  ;;  %v3515_v32 = vmax.f32 %v8148_v60, 0.0  ;;  %v3876_v36 = vadd.f32 1.0, %v3875_v58 }
 0x5f9   : > { %5106 = vlog2.f32 %v3890_v7  ;;  %v3908_v46 = vadd.f32 1.0, %v8277_v29  ;;  %v3878_v6 = vand.u32 2147483647, %v8232_v25  ;;  %v3893_v5 = vmul.f32 -0.5, %v8257_v34 }
 0x5fa   : > { %v5097_v52 = vpop.eup %5096  ;;  %v3959_v26 = vmul.f32 0.01, %v3871_v24  ;;  %v3904_v38 = vmul.f32 %v5087_v8, %v3903_v17  ;;  %v3911_v41 = vmul.f32 -0.5, %v8277_v29  ;;  %v3886_v1 = vmul.f32 %v8226_v23, %v3885_v12 }
 0x5fb   : > { %5108 = vlog2.f32 %v3908_v46  ;;  %v3883_v50 = vmul.f32 0.6931472, %v5097_v52  ;;  %vm3906_vm1 = vcmp.lt.f32.partialorder %v3905_v0, 0.0004427343  ;;  %v3921_v21 = vadd.f32 1.0, %v3920_v9 }
 0x5fc   : > { %v5099_v42 = vpop.eup %5098  ;;  %vm8298_vm3 = vcmp.lt.f32.partialorder %v3887_v31, 0.0004427343  ;;  %v3923_v10 = vand.u32 2147483647, %v8265_v22  ;;  %vm8305_vm4 = vcmp.lt.f32.partialorder %v3878_v6, 0.0004427343  ;;  %v3991_v49 = vadd.f32 %v3959_v26, %v3511_v28 }
 0x5fd   : > { %v5101_v54 = vpop.eup %5100  ;;  %v3874_v18 = vmul.f32 0.6931472, %v5099_v42  ;;  %v3889_v14 = vsel %vm8298_vm3, %v3886_v1, %v3883_v50  ;;  %v3877_v8 = vmul.f32 %v8232_v25, %v3876_v36  ;;  %v3894_v59 = vadd.f32 1.0, %v3893_v5  ;;  %v3999_v6 = vld [vmem:[%s8382_s9] sm:$0x1] }
 0x5fe   : > { %v5103_v45 = vpop.eup %5102  ;;  %v3901_v37 = vmul.f32 0.6931472, %v5101_v54  ;;  %v3912_v47 = vadd.f32 1.0, %v3911_v41  ;;  %v3922_v33 = vmul.f32 %v8265_v22, %v3921_v21  ;;  %v3914_v51 = vand.u32 2147483647, %v8277_v29 }
 0x5ff   : > { %v3926_v2 = vadd.f32 1.0, %v5103_v45  ;;  %v3961_v56 = vmul.f32 0.01, %v3889_v14  ;;  %v3880_v7 = vsel %vm8305_vm4, %v3877_v8, %v3874_v18  ;;  %vm3924_vm5 = vcmp.lt.f32.partialorder %v3923_v10, 0.0004427343 }
 0x600   : > { %v3907_v57 = vsel %vm3906_vm1, %v3904_v38, %v3901_v37  ;;  %v3929_v62 = vmul.f32 -0.5, %v5103_v45  ;;  %v3896_v53 = vand.u32 2147483647, %v8257_v34  ;;  %v3517_v25 = vmax.f32 %v8172_v39, 0.0  ;;  %v4004_v38 = vpop.permute.xlu0 %4003 }
 0x601   : > { %v3963_v30 = vmul.f32 0.01, %v3907_v57  ;;  %5110 = vlog2.f32 %v3926_v2  ;;  %v3913_v22 = vmul.f32 %v8277_v29, %v3912_v47  ;;  %v3960_v46 = vmul.f32 0.01, %v3880_v7 }
 0x602   : > { %v5105_v23 = vpop.eup %5104  ;;  %v3895_v52 = vmul.f32 %v8257_v34, %v3894_v59  ;;  %v3516_v55 = vmax.f32 %v8182_v43, 0.0  ;;  %vm3915_vm6 = vcmp.lt.f32.partialorder %v3914_v51, 0.0004427343  ;;  %v3993_v28 = vadd.f32 %v3961_v56, %v3513_v4  ;;  %v8707_v43 = vld [vmem:[#allocation8_spill] sm:$0xff] }
 0x603   : > { %v5107_v63 = vpop.eup %5106  ;;  %v3995_v15 = vadd.f32 %v3963_v30, %v3515_v32  ;;  %v3919_v19 = vmul.f32 0.6931472, %v5105_v23  ;;  %v3930_v17 = vadd.f32 1.0, %v3929_v62  ;;  %vm3897_vm7 = vcmp.lt.f32.partialorder %v3896_v53, 0.0004427343 }
 0x604   : > { %v3892_v27 = vmul.f32 0.6931472, %v5107_v63  ;;  %v3932_v0 = vand.u32 2147483647, %v5103_v45  ;;  %v3992_v11 = vadd.f32 %v3960_v46, %v3512_v44  ;;  %v3514_v50 = vmax.f32 %v8707_v43, 0.0 }
 0x605   : > { %v5109_v48 = vpop.eup %5108  ;;  %v4472_v13 = vpack.c.bf16 %v3995_v15, %v3991_v49  ;;  %v3925_v35 = vsel %vm3924_vm5, %v3922_v33, %v3919_v19  ;;  %v3931_v29 = vmul.f32 %v5103_v45, %v3930_v17  ;;  %v3518_v4 = vmax.f32 %v8213_v3, 0.0 }
 0x606   : > { %v3965_v16 = vmul.f32 0.01, %v3925_v35  ;;  %v3910_v58 = vmul.f32 0.6931472, %v5109_v48  ;;  %v3898_v39 = vsel %vm3897_vm7, %v3895_v52, %v3892_v27  ;;  %vm3933_vm8 = vcmp.lt.f32.partialorder %v3932_v0, 0.0004427343 }
 0x607   : > { %v3962_v32 = vmul.f32 0.01, %v3898_v39  ;;  %v4006_v45 = vlaneseq  ;;  %v5178_v41 = vmov 1966171168  }
 0x608   : > { %v3997_v40 = vadd.f32 %v3965_v16, %v3517_v25  ;;  %v3916_v12 = vsel %vm3915_vm6, %v3913_v22, %v3910_v58  ;;  %v4162_v1 = vunpack.c.l.s4 %v5178_v41 }
 0x609   : > { %v3964_v24 = vmul.f32 0.01, %v3916_v12  ;;  %v3994_v5 = vadd.f32 %v3962_v32, %v3514_v50  ;;  %v4007_v37 = vshrl.u32 %v4006_v45, 7 }
 0x60a   : > { %v4488_v9 = vpack.c.bf16 %v3997_v40, %v3993_v28  ;;  %v4163_v57 = vunpack.c.0.s8 %v4162_v1 }
 0x60b   : > { %v5111_v42 = vpop.eup %5110  ;;  %v3996_v31 = vadd.f32 %v3964_v24, %v3516_v55  ;;  %v4008_v3 = vsub.s32 0, %v4007_v37 }
 0x60c   : > { %v3928_v61 = vmul.f32 0.6931472, %v5111_v42  ;;  %v4166_v20 = vsub.s32 %v4163_v57, %v4007_v37 }
 0x60d   : > { %v4470_v34 = vpack.c.bf16 %v3996_v31, %v3992_v11  ;;  %v4009_v21 = vrot.slane %v4004_v38, %v4008_v3 }
 0x60e   : > { %v3934_v54 = vsel %vm3933_vm8, %v3931_v29, %v3928_v61 }
 0x60f   : > { %v3966_v36 = vmul.f32 0.01, %v3934_v54  ;;  %4471 = vmatprep.subr.bf16.mxu0 %v4470_v34 }
 0x610   : > { %4473 = vmatpush1.bf16.msra.mxu0 %v4472_v13 }
 0x611   : > { %v3998_v44 = vadd.f32 %v3966_v36, %v3518_v4 }
 0x613   : > { %v4486_v26 = vpack.c.bf16 %v3998_v44, %v3994_v5  ;;  %4354 = vmatmul.mubr.msk.f32.vlgmr.msra.gmra.mrb[64].mxu0 %vm1472_vm2, %v3999_v6 }
 0x615   : > { %4487 = vmatprep.subr.bf16.mxu1 %v4486_v26 }
 0x616   : > { %4489 = vmatpush1.bf16.msra.mxu1 %v4488_v9 }
 0x619   : > { %4355 = vmatmul.mubr.msk.f32.vlgmr.msra.gmra.mrb[64].mxu1 %vm1472_vm2, %v3999_v6  ;;  %vm4186_vm2 = vcmp.lt.s32.totalorder %v4006_v45, 512 }
 0x6e6   : > { %v4079_v2 = vpop.f32.mrb[64].mxu0 }
 0x6e7   : > { %v4080_v60 = vadd.f32 %v4079_v2, %v4009_v21  ;;  %v4081_v18 = vpop.f32.mrb[65].mxu0 }
 0x6e8   : > { %v4082_v10 = vadd.f32 %v4081_v18, %v4009_v21 }
 0x6ea   : > { %v4159_v14 = vcombine.low %v4080_v60, %v4082_v10 }
 0x6ec   : > { %v4150_v30 = vpop.f32.mrb[64].mxu1  ;;  %v4167_v59 = vrot.slane %v4159_v14, %v4166_v20 }
 0x6ed   : > { %v4151_v23 = vadd.f32 %v4150_v30, %v4009_v21  ;;  %v4152_v49 = vpop.f32.mrb[65].mxu1 }
 0x6ee   : > { %v4153_v8 = vadd.f32 %v4152_v49, %v4009_v21 }
 0x6f0   : > { %v4160_v47 = vcombine.low %v4151_v23, %v4153_v8 }
 0x6f2   : > { %v4174_v63 = vrot.slane %v4160_v47, %v4166_v20 }
 0x6f4   : > { %v4175_v15 = vcombine.low %v4167_v59, %v4174_v63 }
 0x6f6   : > { %v4182_v19 = vrot.slane %v4175_v15, %v4166_v20 }
 0x6f8   : > { %4188 = vst.msk [vmem:[%s382_s25] sm:$0xf] %vm4186_vm2, %v4182_v19 }
 0x6f9   : > { %5125 = shalt.err (!%p5122_p3)
}
 0x6fa   : > { %s5126_s17 = scalar_lea.hbm %s8331_s14, 64  ;;  %s5130_s25 = scalar_lea.hbm %s8384_s11, 128 }
 0x6fb   : > { %p5127_p4 = scmp.ne.s32.totalorder %s8331_s14, %s5126_s17  ;;  %p5131_p9 = scmp.lt.u32.totalorder %s8331_s14, %s8384_s11 }
 0x6fc   : > { %p5132_p10 = scmp.lt.u32.totalorder %s5130_s25, %s5126_s17  ;;  %p5134_p12 = scmp.lt.u32.totalorder %s5126_s17, %s8331_s14 }
 0x6fd   : > { %p5128_p7 = pnand %p5127_p4, %p5281_p5 }
 0x6fe   : > { %p5133_p11 = por %p5132_p10, %p5131_p9 }
 0x6ff   : > { %p5129_p8 = pneg %p5128_p7 }
 0x700   : > { %p5135_p13 = por %p5134_p12, %p5133_p11 }
 0x702   : > { %p5136_p0 = pnand %p5135_p13, %p5129_p8 }
 0x704   : > { %5139 = shalt.err (!%p5136_p0)
}
 0x705   : > { %4554 = dma.vmem_to_hbm [thread:$0]  (%p5281_p5), %s8333_s26, 64, %s8331_s14, %s4190_s30  }
 0x706 PF: > { %p4560_p1 = scmp.ge.s32.totalorder %s5174_s22, 2  ;;  %s4216_s15 = sand.u32 1, %s5162_s19  }
 0x707   : > { %s4217_s10 = scalar_lea.sflag [#allocation4], %s4216_s15 }
 0x708   : > { %p4557_p2 = pnand %p4560_p1, %p5285_p6 }
 0x70a   : > { %5157 = dma.done.wait (!%p4557_p2), %s4217_s10, 64  }
 0x70b   : > { %5159 = vsyncadd (!%p4557_p2), %s4217_s10, 4294967232  ;;  %s8708_s27 = sld [smem:[#allocation6_spill]]  ;;  %p23_p3 = scmp.ge.s32.totalorder %s5268_s24, 4  }
 0x70c   : > { %s8709_s19 = smov %s5166_s20  ;;  %s8710_s20 = smov %s5170_s21 }
 0x70d   : > { %s8712_s22 = smov %s5268_s24  ;;  %25 = sbr.rel (!%p23_p3) target bundleno = 6 (0x6), region = 99 }
 0x711   : > { %s8711_s21 = smov %s8708_s27 }
 0x714   :  { %4222 = vsyncpa [#allocation4], 1 }
 0x715   :  { %4224 = vsyncpa [#allocation4 + $0x1], 1 }

</bundles_post_ra>
